<compile_context>
chip_gen: v5e
topology: v5e:2x2
jax: 0.10.0
libtpu: 0.0.40
codegen_flags: <defaults>
</compile_context>

<pallas_src>
import functools

import jax
import jax.numpy as jnp
from jax.experimental import pallas as pl
from jax.experimental.pallas import tpu as pltpu


def _apply_act(h, name):
    if name == "relu":
        return jnp.maximum(h, 0.0)
    elif name == "sine":
        return jnp.sin(h)
    else:
        raise NotImplementedError(f"activation {name!r}")


def _tiny_nerf_kernel(x_ref, w0_ref, b0_ref, wrest_ref, brest_ref,
                      wout_ref, bout_ref, o_ref, *, D, activations):
    # x_ref: (input_ch, tile_m)   -- batch on lanes
    # w0_ref: (W, input_ch), b0_ref: (W, 1)
    # wrest_ref: (n_rest, W, W), brest_ref: (n_rest, W, 1)
    # wout_ref: (output_ch, W), bout_ref: (output_ch, 1)
    # o_ref: (output_ch, tile_m)
    dt = w0_ref.dtype  # compute dtype for MXU inputs (f32 or bf16)

    # First hidden layer: (W, input_ch) @ (input_ch, tile_m) + (W, 1)
    h = jnp.dot(w0_ref[...], x_ref[...].astype(dt),
                preferred_element_type=jnp.float32) + b0_ref[...].astype(jnp.float32)
    h = _apply_act(h, activations[0])

    # Remaining D-1 hidden layers (unrolled; activations are static).
    for i in range(D - 1):
        h = jnp.dot(wrest_ref[i], h.astype(dt),
                    preferred_element_type=jnp.float32) + brest_ref[i].astype(jnp.float32)
        h = _apply_act(h, activations[i + 1])

    # Output linear: (output_ch, W) @ (W, tile_m) + (output_ch, 1)
    out = jnp.dot(wout_ref[...], h.astype(dt),
                  preferred_element_type=jnp.float32) + bout_ref[...].astype(jnp.float32)
    o_ref[...] = out.astype(o_ref.dtype)


def tiny_nerf_forward(x, params, *, D, activations, input_ch, input_ch_views,
                      W, output_ch, tile_m=512, compute_dtype=jnp.float32):
    """Pallas implementation of TinyNeRF.forward.

    x: [N, input_ch + input_ch_views] float32
    params: dict with weights in PyTorch (out, in) layout:
        w0: (W, input_ch),            b0: (W, 1)
        wrest: (max(D-1,1), W, W),    brest: (max(D-1,1), W, 1)
        wout: (output_ch, W),         bout: (output_ch, 1)
    returns: [N, output_ch] float32
    """
    N, C = x.shape
    assert C == input_ch + input_ch_views
    assert tile_m % 128 == 0, "tile_m must be a multiple of 128 (lane width)"

    n_rest = params["wrest"].shape[0]
    n_tiles = pl.cdiv(N, tile_m)
    N_pad = n_tiles * tile_m

    # Keep only the pts columns (views are discarded, matching torch.split),
    # pad to a multiple of tile_m, and transpose so batch sits on lanes.
    pts = x[:, :input_ch]
    if N_pad != N:
        pts = jnp.pad(pts, ((0, N_pad - N), (0, 0)))
    xT = pts.T  # (input_ch, N_pad) -- wrapper-side layout plumbing only

    w0 = params["w0"].astype(compute_dtype)
    wrest = params["wrest"].astype(compute_dtype)
    wout = params["wout"].astype(compute_dtype)
    b0, brest, bout = params["b0"], params["brest"], params["bout"]

    kernel = functools.partial(
        _tiny_nerf_kernel, D=D, activations=tuple(activations))

    out_t = pl.pallas_call(
        kernel,
        out_shape=jax.ShapeDtypeStruct((output_ch, N_pad), jnp.float32),
        grid_spec=pltpu.PrefetchScalarGridSpec(
            num_scalar_prefetch=0,
            grid=(n_tiles,),
            in_specs=[
                # xT: full feature rows, batch tiled over lanes.
                pl.BlockSpec((input_ch, tile_m), lambda i: (0, i)),
                # weights / biases: whole arrays, resident for every grid step.
                pl.BlockSpec((W, input_ch), lambda i: (0, 0)),
                pl.BlockSpec((W, 1), lambda i: (0, 0)),
                pl.BlockSpec((n_rest, W, W), lambda i: (0, 0, 0)),
                pl.BlockSpec((n_rest, W, 1), lambda i: (0, 0, 0)),
                pl.BlockSpec((output_ch, W), lambda i: (0, 0)),
                pl.BlockSpec((output_ch, 1), lambda i: (0, 0)),
            ],
            out_specs=pl.BlockSpec((output_ch, tile_m), lambda i: (0, i)),
        ),
        compiler_params=pltpu.CompilerParams(
            dimension_semantics=("parallel",)),
    )(xT, w0, b0, wrest, brest, wout, bout)

    # Back to (N, output_ch), dropping the pad rows.
    return out_t[:, :N].T


def init_params(key, *, D, W, input_ch, output_ch):
    """Deterministic synthetic parameters in nn.Linear's (out, in) layout."""
    ks = jax.random.split(key, 6)
    scale = 0.1
    w0 = scale * jax.random.normal(ks[0], (W, input_ch), jnp.float32)
    b0 = scale * jax.random.normal(ks[1], (W, 1), jnp.float32)
    n_rest = max(D - 1, 1)
    wrest = scale * jax.random.normal(ks[2], (n_rest, W, W), jnp.float32)
    brest = scale * jax.random.normal(ks[3], (n_rest, W, 1), jnp.float32)
    if D == 1:  # unused placeholders when there are no extra hidden layers
        wrest = jnp.zeros_like(wrest)
        brest = jnp.zeros_like(brest)
    wout = scale * jax.random.normal(ks[4], (output_ch, W), jnp.float32)
    bout = scale * jax.random.normal(ks[5], (output_ch, 1), jnp.float32)
    return dict(w0=w0, b0=b0, wrest=wrest, brest=brest, wout=wout, bout=bout)


def reference_forward(x, params, *, D, activations, input_ch):
    """Pure-JAX reference mirroring the PyTorch forward."""
    h = x[:, :input_ch]
    h = h @ params["w0"].T + params["b0"].T
    h = _apply_act(h, activations[0])
    for i in range(D - 1):
        h = h @ params["wrest"][i].T + params["brest"][i].T
        h = _apply_act(h, activations[i + 1])
    return h @ params["wout"].T + params["bout"].T


if __name__ == "__main__":
    # Small config consistent with TinyNeRF's constructor.
    D = 3
    activations = ["relu", "sine", "relu"]
    W = 32
    input_ch = 3
    input_ch_views = 3
    output_ch = 4
    N = 16  # batch of rays/points (ragged w.r.t. tile_m; wrapper pads)

    key = jax.random.PRNGKey(0)
    kx, kp = jax.random.split(key)
    x = jax.random.normal(kx, (N, input_ch + input_ch_views), jnp.float32)
    params = init_params(kp, D=D, W=W, input_ch=input_ch, output_ch=output_ch)

    out = tiny_nerf_forward(
        x, params, D=D, activations=activations, input_ch=input_ch,
        input_ch_views=input_ch_views, W=W, output_ch=output_ch, tile_m=512)
    out = jax.block_until_ready(out)

    ref = reference_forward(x, params, D=D, activations=activations,
                            input_ch=input_ch)
    assert out.shape == (N, output_ch)
    assert jnp.allclose(out, ref, atol=1e-4, rtol=1e-4)

    print("KERNEL_OK")
</pallas_src>

<mosaic_0001>
module attributes {stable_mosaic.version = 11 : i64} {
  func.func @_tiny_nerf_kernel(%arg0: i32, %arg1: memref<3x512xf32, #tpu.memory_space<vmem>>, %arg2: memref<32x3xf32, #tpu.memory_space<vmem>>, %arg3: memref<32x1xf32, #tpu.memory_space<vmem>>, %arg4: memref<2x32x32xf32, #tpu.memory_space<vmem>>, %arg5: memref<2x32x1xf32, #tpu.memory_space<vmem>>, %arg6: memref<4x32xf32, #tpu.memory_space<vmem>>, %arg7: memref<4x1xf32, #tpu.memory_space<vmem>>, %arg8: memref<4x512xf32, #tpu.memory_space<vmem>>) attributes {dimension_semantics = [#tpu.dimension_semantics<parallel>], iteration_bounds = array<i64: 1>, scalar_prefetch = 0 : i64, scratch_operands = 0 : i64, tpu.core_type = #tpu.core_type<tc>, window_params = [{transform_indices = @transform_0, window_bounds = array<i64: 3, 512>}, {pipeline_mode = #tpu.pipeline_mode<synchronous>, transform_indices = @transform_1, window_bounds = array<i64: 32, 3>}, {pipeline_mode = #tpu.pipeline_mode<synchronous>, transform_indices = @transform_2, window_bounds = array<i64: 32, 1>}, {pipeline_mode = #tpu.pipeline_mode<synchronous>, transform_indices = @transform_3, window_bounds = array<i64: 2, 32, 32>}, {pipeline_mode = #tpu.pipeline_mode<synchronous>, transform_indices = @transform_4, window_bounds = array<i64: 2, 32, 1>}, {pipeline_mode = #tpu.pipeline_mode<synchronous>, transform_indices = @transform_5, window_bounds = array<i64: 4, 32>}, {pipeline_mode = #tpu.pipeline_mode<synchronous>, transform_indices = @transform_6, window_bounds = array<i64: 4, 1>}, {transform_indices = @transform_7, window_bounds = array<i64: 4, 512>}]} {
    %c0 = arith.constant 0 : index
    %c0_0 = arith.constant 0 : index
    %0 = vector.load %arg2[%c0, %c0_0] : memref<32x3xf32, #tpu.memory_space<vmem>>, vector<32x3xf32>
    %c0_1 = arith.constant 0 : index
    %c0_2 = arith.constant 0 : index
    %1 = vector.load %arg1[%c0_1, %c0_2] : memref<3x512xf32, #tpu.memory_space<vmem>>, vector<3x512xf32>
    %cst = arith.constant dense<0.000000e+00> : vector<32x512xf32>
    %2 = tpu.matmul %0, %1, %cst {dimension_numbers = #tpu.dot_dimension_numbers<[1], [0], [0], [1], [0, 0, 1, 1], [], []>} : vector<32x3xf32>, vector<3x512xf32>, vector<32x512xf32> -> vector<32x512xf32>
    %c0_3 = arith.constant 0 : index
    %c0_4 = arith.constant 0 : index
    %3 = vector.load %arg3[%c0_3, %c0_4] : memref<32x1xf32, #tpu.memory_space<vmem>>, vector<32x1xf32>
    %4 = vector.broadcast %3 : vector<32x1xf32> to vector<32x512xf32>
    %5 = arith.addf %2, %4 : vector<32x512xf32>
    %cst_5 = arith.constant 0.000000e+00 : f32
    %6 = vector.broadcast %cst_5 : f32 to vector<32x512xf32>
    %7 = arith.maximumf %5, %6 : vector<32x512xf32>
    %c0_6 = arith.constant 0 : index
    %c0_7 = arith.constant 0 : index
    %c0_8 = arith.constant 0 : index
    %8 = vector.load %arg4[%c0_6, %c0_7, %c0_8] : memref<2x32x32xf32, #tpu.memory_space<vmem>>, vector<1x32x32xf32>
    %9 = vector.shape_cast %8 : vector<1x32x32xf32> to vector<32x32xf32>
    %cst_9 = arith.constant dense<0.000000e+00> : vector<32x512xf32>
    %10 = tpu.matmul %9, %7, %cst_9 {dimension_numbers = #tpu.dot_dimension_numbers<[1], [0], [0], [1], [0, 0, 1, 1], [], []>} : vector<32x32xf32>, vector<32x512xf32>, vector<32x512xf32> -> vector<32x512xf32>
    %c0_10 = arith.constant 0 : index
    %c0_11 = arith.constant 0 : index
    %c0_12 = arith.constant 0 : index
    %11 = vector.load %arg5[%c0_10, %c0_11, %c0_12] : memref<2x32x1xf32, #tpu.memory_space<vmem>>, vector<1x32x1xf32>
    %12 = vector.shape_cast %11 : vector<1x32x1xf32> to vector<32x1xf32>
    %13 = vector.broadcast %12 : vector<32x1xf32> to vector<32x512xf32>
    %14 = arith.addf %10, %13 : vector<32x512xf32>
    %15 = math.sin %14 : vector<32x512xf32>
    %c1 = arith.constant 1 : index
    %c0_13 = arith.constant 0 : index
    %c0_14 = arith.constant 0 : index
    %16 = vector.load %arg4[%c1, %c0_13, %c0_14] : memref<2x32x32xf32, #tpu.memory_space<vmem>>, vector<1x32x32xf32>
    %17 = vector.shape_cast %16 : vector<1x32x32xf32> to vector<32x32xf32>
    %cst_15 = arith.constant dense<0.000000e+00> : vector<32x512xf32>
    %18 = tpu.matmul %17, %15, %cst_15 {dimension_numbers = #tpu.dot_dimension_numbers<[1], [0], [0], [1], [0, 0, 1, 1], [], []>} : vector<32x32xf32>, vector<32x512xf32>, vector<32x512xf32> -> vector<32x512xf32>
    %c1_16 = arith.constant 1 : index
    %c0_17 = arith.constant 0 : index
    %c0_18 = arith.constant 0 : index
    %19 = vector.load %arg5[%c1_16, %c0_17, %c0_18] : memref<2x32x1xf32, #tpu.memory_space<vmem>>, vector<1x32x1xf32>
    %20 = vector.shape_cast %19 : vector<1x32x1xf32> to vector<32x1xf32>
    %21 = vector.broadcast %20 : vector<32x1xf32> to vector<32x512xf32>
    %22 = arith.addf %18, %21 : vector<32x512xf32>
    %cst_19 = arith.constant 0.000000e+00 : f32
    %23 = vector.broadcast %cst_19 : f32 to vector<32x512xf32>
    %24 = arith.maximumf %22, %23 : vector<32x512xf32>
    %c0_20 = arith.constant 0 : index
    %c0_21 = arith.constant 0 : index
    %25 = vector.load %arg6[%c0_20, %c0_21] : memref<4x32xf32, #tpu.memory_space<vmem>>, vector<4x32xf32>
    %cst_22 = arith.constant dense<0.000000e+00> : vector<4x512xf32>
    %26 = tpu.matmul %25, %24, %cst_22 {dimension_numbers = #tpu.dot_dimension_numbers<[1], [0], [0], [1], [0, 0, 1, 1], [], []>} : vector<4x32xf32>, vector<32x512xf32>, vector<4x512xf32> -> vector<4x512xf32>
    %c0_23 = arith.constant 0 : index
    %c0_24 = arith.constant 0 : index
    %27 = vector.load %arg7[%c0_23, %c0_24] : memref<4x1xf32, #tpu.memory_space<vmem>>, vector<4x1xf32>
    %28 = vector.broadcast %27 : vector<4x1xf32> to vector<4x512xf32>
    %29 = arith.addf %26, %28 : vector<4x512xf32>
    %c0_25 = arith.constant 0 : index
    %c0_26 = arith.constant 0 : index
    %30 = vector.load %arg8[%c0_25, %c0_26] : memref<4x512xf32, #tpu.memory_space<vmem>>, vector<4x512xf32>
    tpu.vector_store %arg8[%c0_25, %c0_26], %29 {strides = array<i32>} : memref<4x512xf32, #tpu.memory_space<vmem>>, vector<4x512xf32>,
    return
  }
  func.func @transform_0(%arg0: i32) -> (i32, i32) {
    %c0_i32 = arith.constant 0 : i32
    %c0_i32_0 = arith.constant 0 : i32
    return %c0_i32, %arg0 : i32, i32
  }
  func.func @transform_1(%arg0: i32) -> (i32, i32) {
    %c0_i32 = arith.constant 0 : i32
    %c0_i32_0 = arith.constant 0 : i32
    %c0_i32_1 = arith.constant 0 : i32
    return %c0_i32, %c0_i32_0 : i32, i32
  }
  func.func @transform_2(%arg0: i32) -> (i32, i32) {
    %c0_i32 = arith.constant 0 : i32
    %c0_i32_0 = arith.constant 0 : i32
    %c0_i32_1 = arith.constant 0 : i32
    return %c0_i32, %c0_i32_0 : i32, i32
  }
  func.func @transform_3(%arg0: i32) -> (i32, i32, i32) {
    %c0_i32 = arith.constant 0 : i32
    %c0_i32_0 = arith.constant 0 : i32
    %c0_i32_1 = arith.constant 0 : i32
    %c0_i32_2 = arith.constant 0 : i32
    return %c0_i32, %c0_i32_0, %c0_i32_1 : i32, i32, i32
  }
  func.func @transform_4(%arg0: i32) -> (i32, i32, i32) {
    %c0_i32 = arith.constant 0 : i32
    %c0_i32_0 = arith.constant 0 : i32
    %c0_i32_1 = arith.constant 0 : i32
    %c0_i32_2 = arith.constant 0 : i32
    return %c0_i32, %c0_i32_0, %c0_i32_1 : i32, i32, i32
  }
  func.func @transform_5(%arg0: i32) -> (i32, i32) {
    %c0_i32 = arith.constant 0 : i32
    %c0_i32_0 = arith.constant 0 : i32
    %c0_i32_1 = arith.constant 0 : i32
    return %c0_i32, %c0_i32_0 : i32, i32
  }
  func.func @transform_6(%arg0: i32) -> (i32, i32) {
    %c0_i32 = arith.constant 0 : i32
    %c0_i32_0 = arith.constant 0 : i32
    %c0_i32_1 = arith.constant 0 : i32
    return %c0_i32, %c0_i32_0 : i32, i32
  }
  func.func @transform_7(%arg0: i32) -> (i32, i32) {
    %c0_i32 = arith.constant 0 : i32
    %c0_i32_0 = arith.constant 0 : i32
    return %c0_i32, %arg0 : i32, i32
  }
}

</mosaic_0001>

<bundles_post_ra>
// kernel: tpu_custom_call.1
= control target key start
LH: loop header
LB: loop body
LE: loop exit
PB: predicated region body
PF: predicated region fallthrough
CT: control target
= control target key end

     0   :  { %v6141_v3 = vmov 0   ;;  %s6128_s0 = inlined_call_operand.vmem [shape: f32[3,512], index: 0, kind: input, shape index: {}]   ;;  %s6129_s1 = inlined_call_operand.vmem [shape: f32[32,3], index: 1, kind: input, shape index: {}]   ;;  %s6130_s2 = inlined_call_operand.vmem [shape: f32[32,1], index: 2, kind: input, shape index: {}]   ;;  %s6131_s3 = inlined_call_operand.vmem [shape: f32[2,32,32], index: 3, kind: input, shape index: {}]   ;;  %s6132_s4 = inlined_call_operand.vmem [shape: f32[2,32,1], index: 4, kind: input, shape index: {}]   ;;  %s6133_s5 = inlined_call_operand.vmem [shape: f32[4,32], index: 5, kind: input, shape index: {}]   ;;  %s6134_s6 = inlined_call_operand.vmem [shape: f32[4,1], index: 6, kind: input, shape index: {}]   ;;  %s6135_s7 = inlined_call_operand.hbm [shape: f32[4,512], index: 7, kind: output, shape index: {}]  }
   0x1   :  { %v31_v0 = vld [vmem:[%s6128_s0] sm:$0x77]  ;;  %v32_v1 = vld [vmem:[%s6128_s0 + $0x8] sm:$0x77]  ;;  %v36_v2 = vld [vmem:[%s6130_s2 + $0x18] sm:$0xff]  ;;  %3270 = vset.pattern.permute.xlu0 %v6141_v3  ;;  %3271 = vset.pattern.permute.xlu1 %v6141_v3 }
   0x2   :  { %59 = vst [vmem:[#allocation1] ss:$2 sm:$0xff] %v31_v0  ;;  %v34_v4 = vld [vmem:[%s6130_s2 + $0x8] sm:$0xff]  ;;  %54 = vperm.xlu0 %3270, %v36_v2   ;;  %3272 = vset.pattern.permute.xlu2 %v6141_v3 }
   0x3   :  { %61 = vst [vmem:[#allocation1 + $0x10] ss:$2 sm:$0xff] %v32_v1  ;;  %44 = vperm.xlu1 %3271, %v34_v4  }
   0x4   :  { %12 = vsyncpa [#allocation3], 0  ;;  %vm79_vm0 = vcmask 1042432   ;;  %v27_v5 = vld [vmem:[%s6129_s1] sm:$0xff]  ;;  %vm66_vm1 = vcmask 23552   ;;  %v35_v10 = vld [vmem:[%s6130_s2 + $0x10] sm:$0xff] }
   0x5   :  { %v33_v11 = vld [vmem:[%s6130_s2] sm:$0xff]  ;;  %v28_v12 = vld [vmem:[%s6129_s1 + $0x8] sm:$0xff]  ;;  %v29_v15 = vld [vmem:[%s6129_s1 + $0x10] sm:$0xff]  ;;  %vm6184_vm2 = vcmask 261120   ;;  %s3141_s29 = sshll.u32 %s6135_s7, 4  ;;  %s3142_s29 = int_to_ptr.hbm [resolvable:$true] %s3141_s29 }
   0x6   :  { %v225_v13 = vld [vmem:[%s6132_s4 + $0x8] sm:$0xff]  ;;  %v224_v14 = vld [vmem:[%s6132_s4] sm:$0xff]  ;;  %v3240_v16 = vld [vmem:[%s6132_s4 + $0x30] sm:$0xff] }
   0x7   :  { %v3239_v17 = vld [vmem:[%s6132_s4 + $0x28] sm:$0xff]  ;;  %v30_v18 = vld [vmem:[%s6129_s1 + $0x18] sm:$0xff]  ;;  %v3032_v19 = vld [vmem:[%s6134_s6] sm:$0xf] }
   0x8   :  { %v220_v0 = vld [vmem:[%s6131_s3] sm:$0xff] }
   0x9   :  { %v62_v6 = vld.sshfl [vmem:[#allocation1] sm:$0xff pattern:$0x75316420]  ;;  %v63_v7 = vld.sshfl [vmem:[#allocation1 + $0x8] sm:$0xff pattern:$0x75316420] }
   0xa   :  { %3150 = vmatpush.msk.msra.mxu0 %vm79_vm0, %v62_v6  ;;  %3155 = vmatpush.msk.msra.mxu1 %vm79_vm0, %v63_v7  ;;  %v64_v8 = vld.sshfl [vmem:[#allocation1 + $0x10] sm:$0xff pattern:$0x75316420]  ;;  %v65_v9 = vld.sshfl [vmem:[#allocation1 + $0x18] sm:$0xff pattern:$0x75316420] }
   0xb   :  { %3160 = vmatpush.msk.msra.mxu2 %vm79_vm0, %v64_v8  ;;  %3165 = vmatpush.msk.msra.mxu3 %vm79_vm0, %v65_v9  ;;  %v227_v6 = vld [vmem:[%s6132_s4 + $0x18] sm:$0xff] }
   0xc   :  { %3151 = vmatmul.msk.f32.vlgmr.msra.gmra.mxu0 %vm66_vm1, %v27_v5  ;;  %3156 = vmatmul.msk.f32.vlgmr.msra.gmra.mxu1 %vm66_vm1, %v27_v5 }
   0xd   :  { %3161 = vmatmul.msk.f32.vlgmr.msra.gmra.mxu2 %vm66_vm1, %v27_v5  ;;  %3166 = vmatmul.msk.f32.vlgmr.msra.gmra.mxu3 %vm66_vm1, %v27_v5 }
   0xe   :  { %49 = vperm.xlu0 %3270, %v35_v10   ;;  %39 = vperm.xlu1 %3271, %v33_v11   ;;  %v221_v11 = vld [vmem:[%s6131_s3 + $0x8] sm:$0xff] }
   0xf   :  { %245 = vperm.xlu2 %3272, %v227_v6  }
  0x14   :  { %3152 = vmatmul.msk.f32.gmra.mxu0 %vm66_vm1, %v28_v12  ;;  %3157 = vmatmul.msk.f32.gmra.mxu1 %vm66_vm1, %v28_v12 }
  0x15   :  { %3162 = vmatmul.msk.f32.gmra.mxu2 %vm66_vm1, %v28_v12  ;;  %3167 = vmatmul.msk.f32.gmra.mxu3 %vm66_vm1, %v28_v12  ;;  %v226_v12 = vld [vmem:[%s6132_s4 + $0x10] sm:$0xff] }
  0x16   :  { %235 = vperm.xlu0 %3270, %v225_v13   ;;  %230 = vperm.xlu1 %3271, %v224_v14   ;;  %v222_v13 = vld [vmem:[%s6131_s3 + $0x10] sm:$0xff]  ;;  %v3241_v14 = vld [vmem:[%s6132_s4 + $0x38] sm:$0xff] }
  0x17   :  { %240 = vperm.xlu2 %3272, %v226_v12  }
  0x1c   :  { %3153 = vmatmul.msk.f32.gmra.mxu0 %vm66_vm1, %v29_v15  ;;  %3158 = vmatmul.msk.f32.gmra.mxu1 %vm66_vm1, %v29_v15 }
  0x1d   :  { %3163 = vmatmul.msk.f32.gmra.mxu2 %vm66_vm1, %v29_v15  ;;  %3168 = vmatmul.msk.f32.gmra.mxu3 %vm66_vm1, %v29_v15  ;;  %v223_v15 = vld [vmem:[%s6131_s3 + $0x18] sm:$0xff] }
  0x1e   :  { %2879 = vperm.xlu0 %3270, %v3240_v16   ;;  %2874 = vperm.xlu1 %3271, %v3239_v17   ;;  %v3238_v16 = vld [vmem:[%s6132_s4 + $0x20] sm:$0xff] }
  0x1f   :  { %2884 = vperm.xlu2 %3272, %v3241_v14  }
  0x24   :  { %3154 = vmatmul.msk.f32.gmra.mxu0 %vm66_vm1, %v30_v18  ;;  %3159 = vmatmul.msk.f32.gmra.mxu1 %vm66_vm1, %v30_v18 }
  0x25   :  { %3164 = vmatmul.msk.f32.gmra.mxu2 %vm66_vm1, %v30_v18  ;;  %3169 = vmatmul.msk.f32.gmra.mxu3 %vm66_vm1, %v30_v18 }
  0x26   :  { %3035 = vperm.xlu0 %3270, %v3032_v19  }
  0x27   :  { %2869 = vperm.xlu2 %3272, %v3238_v16   ;;  %v6147_v16 = vmov 1326507024  }
  0x74   :  { %v55_v26 = vpop.permute.xlu0 %54 }
  0x75   :  { %v45_v31 = vpop.permute.xlu1 %44 }
  0x80   :  { %v50_v32 = vpop.permute.xlu0 %49  ;;  %v40_v43 = vpop.permute.xlu1 %39 }
  0x88   :  { %v3452_v18 = vpop.permute.xlu1 %230 }
  0x89   :  { %v105_v20 = vpop.f32.mrf.mxu0  ;;  %v134_v21 = vpop.f32.mrf.mxu1 }
  0x8a   :  { %v106_v46 = vadd.f32 %v105_v20, %v40_v43  ;;  %v135_v47 = vadd.f32 %v134_v21, %v40_v43 }
  0x8c   :  { %v204_v58 = vmax.f32 %v106_v46, 0.0  ;;  %v205_v59 = vmax.f32 %v135_v47, 0.0 }
  0x90   :  { %v163_v22 = vpop.f32.mrf.mxu2  ;;  %v192_v23 = vpop.f32.mrf.mxu3 }
  0x91   :  { %v108_v24 = vpop.f32.mrf.mxu0  ;;  %v137_v25 = vpop.f32.mrf.mxu1  ;;  %v164_v1 = vadd.f32 %v163_v22, %v40_v43  ;;  %v193_v2 = vadd.f32 %v192_v23, %v40_v43 }
  0x92   :  { %v109_v35 = vadd.f32 %v108_v24, %v45_v31  ;;  %v138_v36 = vadd.f32 %v137_v25, %v45_v31 }
  0x93   :  { %v206_v9 = vmax.f32 %v164_v1, 0.0  ;;  %v207_v10 = vmax.f32 %v193_v2, 0.0  ;;  %v6160_v2 = vmov 2131351028  }
  0x94   :  { %v208_v48 = vmax.f32 %v109_v35, 0.0  ;;  %v209_v49 = vmax.f32 %v138_v36, 0.0 }
  0x98   :  { %v166_v27 = vpop.f32.mrf.mxu2  ;;  %v195_v28 = vpop.f32.mrf.mxu3 }
  0x99   :  { %v111_v29 = vpop.f32.mrf.mxu0  ;;  %v140_v30 = vpop.f32.mrf.mxu1  ;;  %v167_v60 = vadd.f32 %v166_v27, %v45_v31  ;;  %v196_v61 = vadd.f32 %v195_v28, %v45_v31 }
  0x9a   :  { %v112_v39 = vadd.f32 %v111_v29, %v50_v32  ;;  %v141_v40 = vadd.f32 %v140_v30, %v50_v32  ;;  %v3464_v31 = vpop.permute.xlu0 %235 }
  0x9b   :  { %v210_v7 = vmax.f32 %v167_v60, 0.0  ;;  %v211_v8 = vmax.f32 %v196_v61, 0.0 }
  0x9c   :  { %v212_v50 = vmax.f32 %v112_v39, 0.0  ;;  %v213_v51 = vmax.f32 %v141_v40, 0.0 }
  0xa0   :  { %v169_v33 = vpop.f32.mrf.mxu2  ;;  %v198_v34 = vpop.f32.mrf.mxu3 }
  0xa1   :  { %v114_v37 = vpop.f32.mrf.mxu0  ;;  %v143_v38 = vpop.f32.mrf.mxu1  ;;  %v170_v54 = vadd.f32 %v169_v33, %v50_v32  ;;  %v199_v55 = vadd.f32 %v198_v34, %v50_v32 }
  0xa2   :  { %v115_v41 = vadd.f32 %v114_v37, %v55_v26  ;;  %v144_v42 = vadd.f32 %v143_v38, %v55_v26 }
  0xa3   :  { %v214_v4 = vmax.f32 %v170_v54, 0.0  ;;  %v215_v5 = vmax.f32 %v199_v55, 0.0 }
  0xa4   :  { %v216_v44 = vmax.f32 %v115_v41, 0.0  ;;  %v217_v45 = vmax.f32 %v144_v42, 0.0 }
  0xa6   :  { %273 = vmatpush.msrb.mxu0 %v216_v44  ;;  %302 = vmatpush.msrb.mxu1 %v217_v45 }
  0xa8   :  { %v172_v52 = vpop.f32.mrf.mxu2  ;;  %v201_v53 = vpop.f32.mrf.mxu3  ;;  %274 = vmatpush.msrb.mxu0 %v212_v50  ;;  %303 = vmatpush.msrb.mxu1 %v213_v51 }
  0xa9   :  { %v173_v56 = vadd.f32 %v172_v52, %v55_v26  ;;  %v202_v57 = vadd.f32 %v201_v53, %v55_v26 }
  0xaa   :  { %275 = vmatpush.msrb.mxu0 %v208_v48  ;;  %304 = vmatpush.msrb.mxu1 %v209_v49 }
  0xab   :  { %v218_v62 = vmax.f32 %v173_v56, 0.0  ;;  %v219_v63 = vmax.f32 %v202_v57, 0.0 }
  0xac   :  { %276 = vmatpush.msrb.mxu0 %v204_v58  ;;  %305 = vmatpush.msrb.mxu1 %v205_v59  ;;  %v6143_v59 = vmov 683565275  }
  0xad   :  { %331 = vmatpush.msrb.mxu2 %v218_v62  ;;  %360 = vmatpush.msrb.mxu3 %v219_v63 }
  0xae   :  { %3170 = vmatmul.msk.f32.vlgmr.msrb.gmra.mxu0 %vm6184_vm2, %v220_v0  ;;  %3174 = vmatmul.msk.f32.vlgmr.msrb.gmra.mxu1 %vm6184_vm2, %v220_v0 }
  0xaf   :  { %332 = vmatpush.msrb.mxu2 %v214_v4  ;;  %361 = vmatpush.msrb.mxu3 %v215_v5 }
  0xb1   :  { %333 = vmatpush.msrb.mxu2 %v210_v7  ;;  %362 = vmatpush.msrb.mxu3 %v211_v8  ;;  %v6162_v8 = vmov 2102212464  }
  0xb3   :  { %334 = vmatpush.msrb.mxu2 %v206_v9  ;;  %363 = vmatpush.msrb.mxu3 %v207_v10  ;;  %v6157_v10 = vmov 920167782  }
  0xb4   :  { %3178 = vmatmul.msk.f32.vlgmr.msrb.gmra.mxu2 %vm6184_vm2, %v220_v0  ;;  %3182 = vmatmul.msk.f32.vlgmr.msrb.gmra.mxu3 %vm6184_vm2, %v220_v0  ;;  %v6145_v0 = vmov 2475754826  }
  0xb6   :  { %3171 = vmatmul.msk.f32.gmra.mxu0 %vm6184_vm2, %v221_v11  ;;  %3175 = vmatmul.msk.f32.gmra.mxu1 %vm6184_vm2, %v221_v11 }
  0xbc   :  { %3179 = vmatmul.msk.f32.gmra.mxu2 %vm6184_vm2, %v221_v11  ;;  %3183 = vmatmul.msk.f32.gmra.mxu3 %vm6184_vm2, %v221_v11 }
  0xbe   :  { %3172 = vmatmul.msk.f32.gmra.mxu0 %vm6184_vm2, %v222_v13  ;;  %3176 = vmatmul.msk.f32.gmra.mxu1 %vm6184_vm2, %v222_v13 }
  0xc4   :  { %3180 = vmatmul.msk.f32.gmra.mxu2 %vm6184_vm2, %v222_v13  ;;  %3184 = vmatmul.msk.f32.gmra.mxu3 %vm6184_vm2, %v222_v13 }
  0xc6   :  { %3173 = vmatmul.msk.f32.gmra.mxu0 %vm6184_vm2, %v223_v15  ;;  %3177 = vmatmul.msk.f32.gmra.mxu1 %vm6184_vm2, %v223_v15 }
  0xcc   :  { %3181 = vmatmul.msk.f32.gmra.mxu2 %vm6184_vm2, %v223_v15  ;;  %3185 = vmatmul.msk.f32.gmra.mxu3 %vm6184_vm2, %v223_v15 }
 0x12b   :  { %v278_v17 = vpop.f32.mrf.mxu0  ;;  %v307_v20 = vpop.f32.mrf.mxu1 }
 0x12c   :  { %v3455_v19 = vadd.f32 %v278_v17, %v3452_v18  ;;  %v3459_v22 = vadd.f32 %v307_v20, %v3452_v18 }
 0x12e   :  { %6333 = vst [vmem:[#allocation5_spill] sm:$0xff] %v3455_v19  ;;  %v380_v21 = vand.u32 2139095040, %v3455_v19  ;;  %v535_v24 = vand.u32 2139095040, %v3459_v22  ;;  %v6137_v27 = vand.u32 2147483647, %v3455_v19 }
 0x12f   :  { %6334 = vst [vmem:[#allocation6_spill] sm:$0xff] %v3459_v22  ;;  %v6136_v30 = vand.u32 2147483647, %v3459_v22 }
 0x130   :  { %v381_v23 = vshrl.u32 %v380_v21, 23  ;;  %v536_v26 = vshrl.u32 %v535_v24, 23  ;;  %v384_v34 = vand.u32 8388607, %v6137_v27 }
 0x131   :  { %v539_v35 = vand.u32 8388607, %v6136_v30 }
 0x132   :  { %v3186_v25 = vadd.s32 4294967169, %v381_v23  ;;  %v3189_v32 = vadd.s32 4294967169, %v536_v26  ;;  %v385_v39 = vor.u32 8388608, %v384_v34 }
 0x133   :  { %v281_v28 = vpop.f32.mrf.mxu0  ;;  %v310_v38 = vpop.f32.mrf.mxu1  ;;  %v540_v41 = vor.u32 8388608, %v539_v35 }
 0x134   :  { %v387_v29 = vadd.s32 1, %v3186_v25  ;;  %v3467_v33 = vadd.f32 %v281_v28, %v3464_v31  ;;  %v542_v36 = vadd.s32 1, %v3189_v32  ;;  %v3475_v42 = vadd.f32 %v310_v38, %v3464_v31 }
 0x135   :  { %v3477_v45 = vshll.u32 %v385_v39, 8  ;;  %v3479_v47 = vshll.u32 %v540_v41, 8 }
 0x136   :  { %6335 = vst [vmem:[#allocation7_spill] sm:$0xff] %v3467_v33  ;;  %vm388_vm3 = vcmp.gt.s32.totalorder %v387_v29, 0  ;;  %v1000_v37 = vand.u32 2139095040, %v3467_v33  ;;  %vm543_vm4 = vcmp.gt.s32.totalorder %v542_v36, 0  ;;  %v6139_v48 = vand.u32 2147483647, %v3467_v33 }
 0x137   :  { %v389_v40 = vsel %vm388_vm3, %v387_v29, 0  ;;  %6336 = vst [vmem:[#allocation8_spill] sm:$0xff] %v3475_v42  ;;  %v544_v46 = vsel %vm543_vm4, %v542_v36, 0  ;;  %v1155_v49 = vand.u32 2139095040, %v3475_v42  ;;  %v3486_v52 = vand.u32 65535, %v3477_v45  ;;  %v336_v54 = vpop.f32.mrf.mxu2 }
 0x138   :  { %v391_v43 = vand.u32 31, %v389_v40  ;;  %v1001_v44 = vshrl.u32 %v1000_v37, 23  ;;  %6337 = vst [vmem:[#allocation9_spill] sm:$0xff] %v3477_v45  ;;  %v546_v53 = vand.u32 31, %v544_v46  ;;  %v3488_v55 = vshrl.u32 %v389_v40, 5 }
 0x139   :  { %6338 = vst [vmem:[#allocation10_spill] sm:$0xff] %v3479_v47  ;;  %v3491_v56 = vshrl.u32 %v3477_v45, 16  ;;  %v3494_v57 = vand.u32 65535, %v3479_v47  ;;  %v3497_v58 = vshrl.u32 %v3479_v47, 16  ;;  %v3500_v61 = vshrl.u32 %v544_v46, 5 }
 0x13a   :  { %v3483_v50 = vsub.s32 32, %v391_v43  ;;  %v3198_v51 = vadd.s32 4294967169, %v1001_v44  ;;  %6340 = vst [vmem:[#allocation12_spill] sm:$0xff] %v3486_v52  ;;  %v394_v60 = vshll.u32 %v6143_v59, %v391_v43  ;;  %v3504_v62 = vand.u32 8388607, %v6139_v48 }
 0x13b   :  { %6341 = vst [vmem:[#allocation13_spill] sm:$0xff] %v3488_v55  ;;  %v1156_v63 = vshrl.u32 %v1155_v49, 23  ;;  %v3511_v6 = vadd.f32 %v336_v54, %v3452_v18  ;;  %v397_v7 = vshll.u32 %v6145_v0, %v391_v43  ;;  %v3518_v12 = vsub.s32 32, %v546_v53  ;;  %v284_v27 = vpop.f32.mrf.mxu0 }
 0x13c   :  { %6339 = vst [vmem:[#allocation11_spill] sm:$0xff] %v3483_v50  ;;  %v395_v1 = vshrl.u32 %v6145_v0, %v3483_v50  ;;  %v398_v4 = vshrl.u32 %v6160_v2, %v3483_v50  ;;  %v1007_v5 = vadd.s32 1, %v3198_v51  ;;  %v401_v9 = vshrl.u32 %v6162_v8, %v3483_v50 }
 0x13d   :  { %6342 = vst [vmem:[#allocation14_spill] sm:$0xff] %v3491_v56  ;;  %v404_v11 = vshrl.u32 %v6157_v10, %v3483_v50  ;;  %v400_v13 = vshll.u32 %v6160_v2, %v391_v43  ;;  %v403_v14 = vshll.u32 %v6162_v8, %v391_v43  ;;  %v406_v15 = vshll.u32 %v6157_v10, %v391_v43 }
 0x13e   :  { %6343 = vst [vmem:[#allocation15_spill] sm:$0xff] %v3494_v57  ;;  %v407_v17 = vshrl.u32 %v6147_v16, %v3483_v50  ;;  %vm6242_vm5 = vcmp.lt.s32.totalorder %v3488_v55, 1  ;;  %vm6243_vm6 = vcmp.lt.s32.totalorder %v3488_v55, 4  ;;  %v549_v20 = vshll.u32 %v6143_v59, %v546_v53 }
 0x13f   :  { %6344 = vst [vmem:[#allocation16_spill] sm:$0xff] %v3497_v58  ;;  %v3201_v21 = vadd.s32 4294967169, %v1156_v63  ;;  %v3528_v23 = vor.u32 %v395_v1, %v394_v60  ;;  %v3530_v24 = vor.u32 %v398_v4, %v397_v7  ;;  %vm6241_vm7 = vcmp.lt.s32.totalorder %v3488_v55, 3  ;;  %v365_v1 = vpop.f32.mrf.mxu3  ;;  %v339_v56 = vpop.f32.mrf.mxu2 }
 0x140   :  { %6345 = vst [vmem:[#allocation17_spill] sm:$0xff] %v3500_v61  ;;  %vm1008_vm8 = vcmp.gt.s32.totalorder %v1007_v5, 0  ;;  %v690_v25 = vand.u32 2139095040, %v3511_v6  ;;  %v3534_v26 = vor.u32 %v401_v9, %v400_v13  ;;  %v405_v28 = vor.u32 %v404_v11, %v403_v14 }
 0x141   :  { %6346 = vst [vmem:[#allocation18_spill] sm:$0xff] %v3511_v6  ;;  %v559_v29 = vshrl.u32 %v6157_v10, %v3518_v12  ;;  %v6138_v32 = vand.u32 2147483647, %v3475_v42  ;;  %v408_v34 = vor.u32 %v407_v17, %v406_v15  ;;  %v550_v35 = vshrl.u32 %v6145_v0, %v3518_v12  ;;  %v3577_v15 = vpop.permute.xlu2 %245 }
 0x142   :  { %6347 = vst [vmem:[#allocation19_spill] sm:$0xff] %v3518_v12  ;;  %v552_v36 = vshll.u32 %v6145_v0, %v546_v53  ;;  %v562_v37 = vshrl.u32 %v6147_v16, %v3518_v12  ;;  %v553_v38 = vshrl.u32 %v6160_v2, %v3518_v12  ;;  %v558_v39 = vshll.u32 %v6162_v8, %v546_v53 }
 0x143   :  { %6348 = vst [vmem:[#allocation20_spill] sm:$0xff] %v3528_v23  ;;  %v1009_v40 = vsel %vm1008_vm8, %v1007_v5, 0  ;;  %v1162_v41 = vadd.s32 1, %v3201_v21  ;;  %v3551_v43 = vsel %vm6242_vm5, %v3528_v23, %v3530_v24  ;;  %v556_v44 = vshrl.u32 %v6162_v8, %v3518_v12 }
 0x144   :  { %6349 = vst [vmem:[#allocation21_spill] sm:$0xff] %v3530_v24  ;;  %v561_v46 = vshll.u32 %v6157_v10, %v546_v53  ;;  %v691_v49 = vshrl.u32 %v690_v25, 23  ;;  %v418_v51 = vsel %vm6243_vm6, %v405_v28, 920167782  ;;  %v560_v54 = vor.u32 %v559_v29, %v558_v39 }
 0x145   :  { %6350 = vst [vmem:[#allocation22_spill] sm:$0xff] %v3534_v26  ;;  %v1005_v60 = vor.u32 8388608, %v3504_v62  ;;  %v1159_v63 = vand.u32 8388607, %v6138_v32  ;;  %v3565_v4 = vsel %vm6242_vm5, %v3530_v24, %v3534_v26  ;;  %v555_v5 = vshll.u32 %v6160_v2, %v546_v53 }
 0x146   :  { %6351 = vst [vmem:[#allocation23_spill] sm:$0xff] %v3551_v43  ;;  %v563_v7 = vor.u32 %v562_v37, %v561_v46  ;;  %v1011_v9 = vand.u32 31, %v1009_v40  ;;  %v422_v11 = vsel %vm6243_vm6, %v408_v34, 1326507024  ;;  %v3570_v13 = vor.u32 %v550_v35, %v549_v20 }
 0x147   :  { %6352 = vst [vmem:[#allocation24_spill] sm:$0xff] %v3565_v4  ;;  %v3572_v62 = vor.u32 %v553_v38, %v552_v36  ;;  %vm1163_vm9 = vcmp.gt.s32.totalorder %v1162_v41, 0  ;;  %v3574_v14 = vor.u32 %v556_v44, %v555_v5  ;;  %vm6225_vm10 = vcmp.lt.s32.totalorder %v3500_v61, 4 }
 0x148   :  { %6353 = vst [vmem:[#allocation25_spill] sm:$0xff] %v3570_v13  ;;  %v3192_v17 = vadd.s32 4294967169, %v691_v49  ;;  %v3580_v21 = vadd.f32 %v365_v1, %v3452_v18  ;;  %v3585_v53 = vsel %vm6241_vm7, %v3534_v26, %v418_v51  ;;  %v573_v20 = vsel %vm6225_vm10, %v560_v54, 920167782 }
 0x149   :  { %6354 = vst [vmem:[#allocation26_spill] sm:$0xff] %v3572_v62  ;;  %v3589_v25 = vshll.u32 %v1005_v60, 8  ;;  %v1160_v29 = vor.u32 8388608, %v1159_v63  ;;  %vm6222_vm11 = vcmp.lt.s32.totalorder %v3500_v61, 1  ;;  %v577_v34 = vsel %vm6225_vm10, %v563_v7, 1326507024 }
 0x14a   :  { %6355 = vst [vmem:[#allocation27_spill] sm:$0xff] %v3574_v14  ;;  %v3594_v35 = vsub.s32 32, %v1011_v9  ;;  %v1164_v18 = vsel %vm1163_vm9, %v1162_v41, 0  ;;  %v3598_v36 = vsel %vm6241_vm7, %v405_v28, %v422_v11  ;;  %vm6221_vm12 = vcmp.lt.s32.totalorder %v3500_v61, 3 }
 0x14b   :  { %6356 = vst [vmem:[#allocation28_spill] sm:$0xff] %v3580_v21  ;;  %v3605_v37 = vsel %vm6222_vm11, %v3570_v13, %v3572_v62  ;;  %v6140_v38 = vand.u32 2147483647, %v3511_v6  ;;  %v3611_v39 = vsel %vm6221_vm12, %v3574_v14, %v573_v20  ;;  %v3617_v28 = vsel %vm6222_vm11, %v3572_v62, %v3574_v14 }
 0x14c   :  { %6357 = vst [vmem:[#allocation29_spill] sm:$0xff] %v3585_v53  ;;  %v697_v41 = vadd.s32 1, %v3192_v17  ;;  %v845_v44 = vand.u32 2139095040, %v3580_v21  ;;  %v3622_v46 = vsel %vm6221_vm12, %v560_v54, %v577_v34  ;;  %v3625_v49 = vand.u32 65535, %v3589_v25 }
 0x14d   :  { %6358 = vst [vmem:[#allocation30_spill] sm:$0xff] %v3589_v25  ;;  %v3627_v51 = vand.u32 31, %v1164_v18  ;;  %v3629_v60 = vshll.u32 %v1160_v29, 8  ;;  %v1015_v63 = vshrl.u32 %v6145_v0, %v3594_v35  ;;  %v1018_v1 = vshrl.u32 %v6160_v2, %v3594_v35 }
 0x14e   :  { %6359 = vst [vmem:[#allocation31_spill] sm:$0xff] %v3594_v35  ;;  %v3636_v5 = vshrl.u32 %v3589_v25, 16  ;;  %v3639_v54 = vshrl.u32 %v1009_v40, 5  ;;  %v1014_v11 = vshll.u32 %v6143_v59, %v1011_v9  ;;  %v1017_v17 = vshll.u32 %v6145_v0, %v1011_v9  ;;  %v3666_v0 = vpop.permute.xlu2 %240 }
 0x14f   :  { %6360 = vst [vmem:[#allocation32_spill] sm:$0xff] %v3598_v36  ;;  %v694_v20 = vand.u32 8388607, %v6140_v38  ;;  %v1021_v29 = vshrl.u32 %v6162_v8, %v3594_v35  ;;  %v1024_v34 = vshrl.u32 %v6157_v10, %v3594_v35  ;;  %vm698_vm13 = vcmp.gt.s32.totalorder %v697_v41, 0 }
 0x150   :  { %6361 = vst [vmem:[#allocation33_spill] sm:$0xff] %v3605_v37  ;;  %v846_v30 = vshrl.u32 %v845_v44, 23  ;;  %v1027_v40 = vshrl.u32 %v6147_v16, %v3594_v35  ;;  %v3652_v32 = vsub.s32 32, %v3627_v51  ;;  %v3655_v48 = vand.u32 65535, %v3629_v60 }
 0x151   :  { %6362 = vst [vmem:[#allocation34_spill] sm:$0xff] %v3611_v39  ;;  %v3658_v38 = vshrl.u32 %v3629_v60, 16  ;;  %v3660_v3 = vor.u32 %v1015_v63, %v1014_v11  ;;  %v3662_v7 = vor.u32 %v1018_v1, %v1017_v17  ;;  %v1020_v59 = vshll.u32 %v6160_v2, %v1011_v9 }
 0x152   :  { %6363 = vst [vmem:[#allocation35_spill] sm:$0xff] %v3617_v28  ;;  %v1023_v44 = vshll.u32 %v6162_v8, %v1011_v9  ;;  %v1026_v16 = vshll.u32 %v6157_v10, %v1011_v9  ;;  %v695_v6 = vor.u32 8388608, %v694_v20  ;;  %v699_v22 = vsel %vm698_vm13, %v697_v41, 0 }
 0x153   :  { %6364 = vst [vmem:[#allocation36_spill] sm:$0xff] %v3622_v46  ;;  %v3670_v47 = vadd.f32 %v284_v27, %v3666_v0  ;;  %v3672_v19 = vor.u32 %v1021_v29, %v1020_v59  ;;  %vm1029_vm14 = vcmp.lt.s32.totalorder %v3639_v54, 1  ;;  %v3195_v63 = vadd.s32 4294967169, %v846_v30 }
 0x154   :  { %6365 = vst [vmem:[#allocation37_spill] sm:$0xff] %v3625_v49  ;;  %v1025_v62 = vor.u32 %v1024_v34, %v1023_v44  ;;  %v1028_v1 = vor.u32 %v1027_v40, %v1026_v16  ;;  %vm1031_vm15 = vcmp.lt.s32.totalorder %v3639_v54, 3  ;;  %vm1032_vm0 = vcmp.lt.s32.totalorder %v3639_v54, 4  ;;  %v313_v16 = vpop.f32.mrf.mxu1 }
 0x155   :  { %6366 = vst [vmem:[#allocation38_spill] sm:$0xff] %v3629_v60  ;;  %v1179_v11 = vshrl.u32 %v6157_v10, %v3652_v32  ;;  %v3683_v27 = vsel %vm1029_vm14, %v3660_v3, %v3662_v7  ;;  %v3685_v59 = vshrl.u32 %v1164_v18, 5  ;;  %v1178_v9 = vshll.u32 %v6162_v8, %v3627_v51 }
 0x156   :  { %6367 = vst [vmem:[#allocation39_spill] sm:$0xff] %v3636_v5  ;;  %v701_v30 = vand.u32 31, %v699_v22  ;;  %v6378_v41 = vmov 2475754826   ;;  %v1173_v20 = vshrl.u32 %v6160_v2, %v3652_v32  ;;  %v1176_v29 = vshrl.u32 %v6162_v8, %v3652_v32 }
 0x157   :  { %6368 = vst [vmem:[#allocation40_spill] sm:$0xff] %v3639_v54  ;;  %v1170_v17 = vshrl.u32 %v6378_v41, %v3652_v32  ;;  %v1620_v34 = vand.u32 2139095040, %v3670_v47  ;;  %v1038_v18 = vsel %vm1032_vm0, %v1025_v62, 920167782  ;;  %v3702_v40 = vsel %vm1029_vm14, %v3662_v7, %v3672_v19 }
 0x158   :  { %6369 = vst [vmem:[#allocation41_spill] sm:$0xff] %v3652_v32  ;;  %v6380_v44 = vmov 683565275   ;;  %v852_v13 = vadd.s32 1, %v3195_v63  ;;  %v1172_v2 = vshll.u32 %v6378_v41, %v3627_v51  ;;  %v6381_v8 = vmov 2131351028  }
 0x159   :  { %6370 = vst [vmem:[#allocation42_spill] sm:$0xff] %v3655_v48  ;;  %v1169_v10 = vshll.u32 %v6380_v44, %v3627_v51  ;;  %v1175_v12 = vshll.u32 %v6381_v8, %v3627_v51  ;;  %v1180_v14 = vor.u32 %v1179_v11, %v1178_v9  ;;  %v3711_v58 = vadd.f32 %v313_v16, %v3666_v0 }
 0x15a   :  { %6371 = vst [vmem:[#allocation43_spill] sm:$0xff] %v3658_v38  ;;  %v1042_v57 = vsel %vm1032_vm0, %v1028_v1, 1326507024  ;;  %v6383_v28 = vmov 1326507024   ;;  %v3717_v45 = vsub.s32 32, %v701_v30  ;;  %v3723_v39 = vor.u32 %v1173_v20, %v1172_v2 }
 0x15b   :  { %6372 = vst [vmem:[#allocation44_spill] sm:$0xff] %v3660_v3  ;;  %v1182_v46 = vshrl.u32 %v6383_v28, %v3652_v32  ;;  %v3719_v37 = vshll.u32 %v695_v6, 8  ;;  %v3721_v63 = vor.u32 %v1170_v17, %v1169_v10  ;;  %v3725_v61 = vor.u32 %v1176_v29, %v1175_v12 }
 0x15c   :  { %6373 = vst [vmem:[#allocation45_spill] sm:$0xff] %v3662_v7  ;;  %v1621_v11 = vshrl.u32 %v1620_v34, 23  ;;  %v3730_v9 = vsel %vm1031_vm15, %v3672_v19, %v1038_v18  ;;  %v6390_v1 = vmov 920167782   ;;  %vm6246_vm1 = vcmp.lt.s32.totalorder %v3685_v59, 4 }
 0x15d   :  { %6374 = vst [vmem:[#allocation46_spill] sm:$0xff] %v3670_v47  ;;  %v1181_v16 = vshll.u32 %v6390_v1, %v3627_v51  ;;  %vm853_vm3 = vcmp.gt.s32.totalorder %v852_v13, 0  ;;  %v3737_v6 = vsel %vm1031_vm15, %v1025_v62, %v1042_v57  ;;  %vm6245_vm4 = vcmp.lt.s32.totalorder %v3685_v59, 1 }
 0x15e   :  { %6375 = vst [vmem:[#allocation47_spill] sm:$0xff] %v3672_v19  ;;  %v1193_v2 = vsel %vm6246_vm1, %v1180_v14, 920167782  ;;  %v1775_v10 = vand.u32 2139095040, %v3711_v58  ;;  %vm6244_vm8 = vcmp.lt.s32.totalorder %v3685_v59, 3  ;;  %v714_v51 = vshrl.u32 %v6390_v1, %v3717_v45 }
 0x15f   :  { %6376 = vst [vmem:[#allocation48_spill] sm:$0xff] %v3683_v27  ;;  %v1183_v12 = vor.u32 %v1182_v46, %v1181_v16  ;;  %v3747_v17 = vand.u32 65535, %v3719_v37  ;;  %v3753_v57 = vsel %vm6245_vm4, %v3721_v63, %v3723_v39  ;;  %v3759_v62 = vsel %vm6245_vm4, %v3723_v39, %v3725_v61 }
 0x160   :  { %6377 = vst [vmem:[#allocation49_spill] sm:$0xff] %v3685_v59  ;;  %v854_v46 = vsel %vm853_vm3, %v852_v13, 0  ;;  %v3210_v20 = vadd.s32 4294967169, %v1621_v11  ;;  %v3764_v29 = vsel %vm6244_vm8, %v3725_v61, %v1193_v2  ;;  %v3766_v34 = vshrl.u32 %v699_v22, 5 }
 0x161   :  { %6379 = vst [vmem:[#allocation50_spill] sm:$0xff] %v3702_v40  ;;  %v6397_v18 = vmov 2102212464   ;;  %v705_v24 = vshrl.u32 %v6378_v41, %v3717_v45  ;;  %v708_v23 = vshrl.u32 %v6381_v8, %v3717_v45  ;;  %v1776_v11 = vshrl.u32 %v1775_v10, 23 }
 0x162   :  { %6382 = vst [vmem:[#allocation51_spill] sm:$0xff] %v3711_v58  ;;  %v713_v16 = vshll.u32 %v6397_v18, %v701_v30  ;;  %v711_v13 = vshrl.u32 %v6397_v18, %v3717_v45  ;;  %v1197_v2 = vsel %vm6246_vm1, %v1183_v12, 1326507024  ;;  %v704_v22 = vshll.u32 %v6380_v44, %v701_v30 }
 0x163   :  { %6384 = vst [vmem:[#allocation52_spill] sm:$0xff] %v3717_v45  ;;  %v856_v50 = vand.u32 31, %v854_v46  ;;  %v717_v43 = vshrl.u32 %v6383_v28, %v3717_v45  ;;  %v1627_v53 = vadd.s32 1, %v3210_v20  ;;  %v716_v52 = vshll.u32 %v6390_v1, %v701_v30 }
 0x164   :  { %6385 = vst [vmem:[#allocation53_spill] sm:$0xff] %v3719_v37  ;;  %v715_v26 = vor.u32 %v714_v51, %v713_v16  ;;  %vm6196_vm9 = vcmp.lt.s32.totalorder %v3766_v34, 4  ;;  %v3787_v4 = vor.u32 %v705_v24, %v704_v22  ;;  %v3213_v36 = vadd.s32 4294967169, %v1776_v11 }
 0x165   :  { %6386 = vst [vmem:[#allocation54_spill] sm:$0xff] %v3721_v63  ;;  %v3795_v55 = vsel %vm6244_vm8, %v1180_v14, %v1197_v2  ;;  %v718_v12 = vor.u32 %v717_v43, %v716_v52  ;;  %v3805_v24 = vshrl.u32 %v3719_v37, 16  ;;  %vm1628_vm13 = vcmp.gt.s32.totalorder %v1627_v53, 0 }
 0x166   :  { %6387 = vst [vmem:[#allocation55_spill] sm:$0xff] %v3723_v39  ;;  %v728_v20 = vsel %vm6196_vm9, %v715_v26, 920167782  ;;  %vm6210_vm3 = vcmp.lt.s32.totalorder %v3766_v34, 1  ;;  %vm6197_vm2 = vcmp.lt.s32.totalorder %v3766_v34, 3  ;;  %v1782_v11 = vadd.s32 1, %v3213_v36 }
 0x167   :  { %6388 = vst [vmem:[#allocation56_spill] sm:$0xff] %v3725_v61  ;;  %v6411_v36 = vand.u32 2147483647, %v3711_v58  ;;  %v868_v45 = vshll.u32 %v6397_v18, %v856_v50 }
 0x168   :  { %6389 = vst [vmem:[#allocation57_spill] sm:$0xff] %v3730_v9 }
 0x169   :  { %6391 = vst [vmem:[#allocation58_spill] sm:$0xff] %v3737_v6  ;;  %v1779_v37 = vand.u32 8388607, %v6411_v36 }
 0x16a   :  { %6392 = vst [vmem:[#allocation59_spill] sm:$0xff] %v3747_v17  ;;  %v6398_v17 = vand.u32 2147483647, %v3580_v21  ;;  %v707_v21 = vshll.u32 %v6378_v41, %v701_v30 }
 0x16b   :  { %6393 = vst [vmem:[#allocation60_spill] sm:$0xff] %v3753_v57  ;;  %v1780_v63 = vor.u32 8388608, %v1779_v37 }
 0x16c   :  { %6394 = vst [vmem:[#allocation61_spill] sm:$0xff] %v3759_v62  ;;  %v849_v42 = vand.u32 8388607, %v6398_v17  ;;  %v710_v17 = vshll.u32 %v6381_v8, %v701_v30  ;;  %v3789_v51 = vor.u32 %v708_v23, %v707_v21  ;;  %v3799_v30 = vsub.s32 32, %v856_v50 }
 0x16d   :  { %6395 = vst [vmem:[#allocation62_spill] sm:$0xff] %v3764_v29  ;;  %v6407_v21 = vand.u32 2147483647, %v3670_v47 }
 0x16e   :  { %6396 = vst [vmem:[#allocation63_spill] sm:$0xff] %v3766_v34  ;;  %v850_v10 = vor.u32 8388608, %v849_v42  ;;  %v3791_v16 = vor.u32 %v711_v13, %v710_v17  ;;  %v3802_v42 = vadd.f32 %v339_v56, %v3464_v31  ;;  %v3818_v52 = vsel %vm6210_vm3, %v3787_v4, %v3789_v51 }
 0x16f   :  { %6399 = vst [vmem:[#allocation64_spill] sm:$0xff] %v3787_v4  ;;  %v1624_v13 = vand.u32 8388607, %v6407_v21  ;;  %v860_v2 = vshrl.u32 %v6378_v41, %v3799_v30  ;;  %v863_v22 = vshrl.u32 %v6381_v8, %v3799_v30  ;;  %v1629_v17 = vsel %vm1628_vm13, %v1627_v53, 0 }
 0x170   :  { %6400 = vst [vmem:[#allocation65_spill] sm:$0xff] %v3789_v51  ;;  %v3810_v14 = vshll.u32 %v850_v10, 8  ;;  %v3823_v56 = vsel %vm6197_vm2, %v3791_v16, %v728_v20  ;;  %v3829_v43 = vsel %vm6210_vm3, %v3789_v51, %v3791_v16  ;;  %v1310_v10 = vand.u32 2139095040, %v3802_v42 }
 0x171   :  { %6401 = vst [vmem:[#allocation66_spill] sm:$0xff] %v3791_v16  ;;  %v732_v20 = vsel %vm6196_vm9, %v718_v12, 1326507024  ;;  %v869_v21 = vshrl.u32 %v6390_v1, %v3799_v30  ;;  %v872_v23 = vshrl.u32 %v6383_v28, %v3799_v30  ;;  %v3844_v51 = vshrl.u32 %v854_v46, 5 }
 0x172   :  { %6402 = vst [vmem:[#allocation67_spill] sm:$0xff] %v3795_v55  ;;  %v859_v16 = vshll.u32 %v6380_v44, %v856_v50  ;;  %v862_v53 = vshll.u32 %v6378_v41, %v856_v50  ;;  %v1625_v4 = vor.u32 8388608, %v1624_v13  ;;  %v871_v12 = vshll.u32 %v6390_v1, %v856_v50 }
 0x173   :  { %6403 = vst [vmem:[#allocation68_spill] sm:$0xff] %v3799_v30  ;;  %vm1783_vm13 = vcmp.gt.s32.totalorder %v1782_v11, 0  ;;  %v866_v36 = vshrl.u32 %v6397_v18, %v3799_v30  ;;  %v1311_v46 = vshrl.u32 %v1310_v10, 23  ;;  %v3856_v60 = vor.u32 %v869_v21, %v868_v45 }
 0x174   :  { %6404 = vst [vmem:[#allocation69_spill] sm:$0xff] %v3802_v42  ;;  %v873_v39 = vor.u32 %v872_v23, %v871_v12  ;;  %v3859_v13 = vand.u32 65535, %v3810_v14  ;;  %v3863_v33 = vsel %vm6197_vm2, %v715_v26, %v732_v20  ;;  %vm6211_vm9 = vcmp.lt.s32.totalorder %v3844_v51, 1  ;;  %v368_v23 = vpop.f32.mrf.mxu3 }
 0x175   :  { %6405 = vst [vmem:[#allocation70_spill] sm:$0xff] %v3805_v24  ;;  %v3852_v24 = vor.u32 %v863_v22, %v862_v53  ;;  %v1784_v22 = vsel %vm1783_vm13, %v1782_v11, 0  ;;  %v3870_v10 = vshrl.u32 %v3810_v14, 16  ;;  %vm6209_vm2 = vcmp.lt.s32.totalorder %v3844_v51, 4 }
 0x176   :  { %6406 = vst [vmem:[#allocation71_spill] sm:$0xff] %v3810_v14  ;;  %v3204_v26 = vadd.s32 4294967169, %v1311_v46  ;;  %v1786_v11 = vand.u32 31, %v1784_v22  ;;  %v3895_v20 = vshll.u32 %v1780_v63, 8  ;;  %v3897_v53 = vshrl.u32 %v1629_v17, 5 }
 0x177   :  { %6408 = vst [vmem:[#allocation72_spill] sm:$0xff] %v3818_v52  ;;  %v1631_v52 = vand.u32 31, %v1629_v17  ;;  %v3906_v46 = vadd.f32 %v368_v23, %v3464_v31 }
 0x178   :  { %6409 = vst [vmem:[#allocation73_spill] sm:$0xff] %v3823_v56  ;;  %v3850_v56 = vor.u32 %v860_v2, %v859_v16  ;;  %v865_v16 = vshll.u32 %v6381_v8, %v856_v50  ;;  %v3866_v2 = vshll.u32 %v1625_v4, 8  ;;  %v3889_v4 = vsel %vm6209_vm2, %v3856_v60, 920167782 }
 0x179   :  { %6410 = vst [vmem:[#allocation74_spill] sm:$0xff] %v3829_v43  ;;  %v287_v43 = vpop.f32.mrf.mxu0  ;;  %v3872_v45 = vsub.s32 32, %v1631_v52  ;;  %v1634_v14 = vshll.u32 %v6380_v44, %v1631_v52  ;;  %v1637_v63 = vshll.u32 %v6378_v41, %v1631_v52  ;;  %v1643_v30 = vshll.u32 %v6397_v18, %v1631_v52 }
 0x17a   :  { %6412 = vst [vmem:[#allocation75_spill] sm:$0xff] %v3844_v51  ;;  %v3875_v21 = vadd.f32 %v287_v43, %v3577_v15  ;;  %v3877_v37 = vor.u32 %v866_v36, %v865_v16  ;;  %v3884_v50 = vsel %vm6211_vm9, %v3850_v56, %v3852_v24  ;;  %v3893_v43 = vsel %vm6209_vm2, %v873_v39, 1326507024  ;;  %v316_v16 = vpop.f32.mrf.mxu1 }
 0x17b   :  { %6413 = vst [vmem:[#allocation76_spill] sm:$0xff] %v3850_v56  ;;  %v3900_v12 = vand.u32 65535, %v3866_v2  ;;  %v3903_v36 = vshrl.u32 %v3866_v2, 16  ;;  %v1635_v39 = vshrl.u32 %v6378_v41, %v3872_v45  ;;  %v1638_v56 = vshrl.u32 %v6381_v8, %v3872_v45 }
 0x17c   :  { %6414 = vst [vmem:[#allocation77_spill] sm:$0xff] %v3852_v24  ;;  %v2240_v17 = vand.u32 2139095040, %v3875_v21  ;;  %v1317_v31 = vadd.s32 1, %v3204_v26  ;;  %v3918_v23 = vsub.s32 32, %v1786_v11  ;;  %v1647_v24 = vshrl.u32 %v6383_v28, %v3872_v45 }
 0x17d   :  { %6415 = vst [vmem:[#allocation78_spill] sm:$0xff] %v3856_v60  ;;  %v3925_v60 = vadd.f32 %v316_v16, %v3577_v15  ;;  %v3933_v26 = vor.u32 %v1635_v39, %v1634_v14  ;;  %v1640_v51 = vshll.u32 %v6381_v8, %v1631_v52  ;;  %vm1652_vm13 = vcmp.lt.s32.totalorder %v3897_v53, 4 }
 0x17e   :  { %6416 = vst [vmem:[#allocation79_spill] sm:$0xff] %v3859_v13  ;;  %v1644_v13 = vshrl.u32 %v6390_v1, %v3872_v45  ;;  %v3939_v16 = vor.u32 %v1638_v56, %v1637_v63  ;;  %vm1649_vm2 = vcmp.lt.s32.totalorder %v3897_v53, 1  ;;  %vm1651_vm3 = vcmp.lt.s32.totalorder %v3897_v53, 3 }
 0x17f   :  { %6417 = vst [vmem:[#allocation80_spill] sm:$0xff] %v3863_v33  ;;  %v1641_v33 = vshrl.u32 %v6397_v18, %v3872_v45  ;;  %vm1318_vm9 = vcmp.gt.s32.totalorder %v1317_v31, 0  ;;  %v1799_v14 = vshrl.u32 %v6390_v1, %v3918_v23  ;;  %v1465_v61 = vand.u32 2139095040, %v3906_v46 }
 0x180   :  { %6418 = vst [vmem:[#allocation81_spill] sm:$0xff] %v3866_v2  ;;  %v3949_v56 = vshrl.u32 %v1784_v22, 5  ;;  %v1792_v63 = vshll.u32 %v6378_v41, %v1786_v11  ;;  %v1795_v38 = vshll.u32 %v6381_v8, %v1786_v11  ;;  %v1319_v48 = vsel %vm1318_vm9, %v1317_v31, 0 }
 0x181   :  { %6419 = vst [vmem:[#allocation82_spill] sm:$0xff] %v3870_v10  ;;  %v3921_v10 = vand.u32 65535, %v3895_v20  ;;  %v1796_v22 = vshrl.u32 %v6397_v18, %v3918_v23  ;;  %v1466_v25 = vshrl.u32 %v1465_v61, 23  ;;  %v2395_v61 = vand.u32 2139095040, %v3925_v60 }
 0x182   :  { %6420 = vst [vmem:[#allocation83_spill] sm:$0xff] %v3872_v45  ;;  %vm1807_vm12 = vcmp.lt.s32.totalorder %v3949_v56, 4  ;;  %vm1804_vm11 = vcmp.lt.s32.totalorder %v3949_v56, 1  ;;  %vm1806_vm10 = vcmp.lt.s32.totalorder %v3949_v56, 3  ;;  %v6451_v7 = vand.u32 2147483647, %v3906_v46 }
 0x183   :  { %6421 = vst [vmem:[#allocation84_spill] sm:$0xff] %v3875_v21 }
 0x184   :  { %6422 = vst [vmem:[#allocation85_spill] sm:$0xff] %v3877_v37  ;;  %v3931_v37 = vshrl.u32 %v3895_v20, 16  ;;  %v1469_v58 = vand.u32 8388607, %v6451_v7 }
 0x185   :  { %6423 = vst [vmem:[#allocation86_spill] sm:$0xff] %v3884_v50  ;;  %v1645_v50 = vor.u32 %v1644_v13, %v1643_v30  ;;  %v1801_v30 = vshll.u32 %v6390_v1, %v1786_v11  ;;  %v1802_v13 = vshrl.u32 %v6383_v28, %v3918_v23 }
 0x186   :  { %6424 = vst [vmem:[#allocation87_spill] sm:$0xff] %v3889_v4  ;;  %v2241_v4 = vshrl.u32 %v2240_v17, 23  ;;  %v1798_v17 = vshll.u32 %v6397_v18, %v1786_v11  ;;  %v1470_v5 = vor.u32 8388608, %v1469_v58 }
 0x187   :  { %6425 = vst [vmem:[#allocation88_spill] sm:$0xff] %v3893_v43  ;;  %v1646_v43 = vshll.u32 %v6390_v1, %v1631_v52  ;;  %v6436_v52 = vand.u32 2147483647, %v3802_v42  ;;  %v3963_v42 = vor.u32 %v1641_v33, %v1640_v51  ;;  %v1803_v57 = vor.u32 %v1802_v13, %v1801_v30 }
 0x188   :  { %6426 = vst [vmem:[#allocation89_spill] sm:$0xff] %v3895_v20  ;;  %v3222_v34 = vadd.s32 4294967169, %v2241_v4  ;;  %v1789_v4 = vshll.u32 %v6380_v44, %v1786_v11  ;;  %v1800_v62 = vor.u32 %v1799_v14, %v1798_v17  ;;  %v1321_v11 = vand.u32 31, %v1319_v48 }
 0x189   :  { %6427 = vst [vmem:[#allocation90_spill] sm:$0xff] %v3900_v12  ;;  %v1314_v39 = vand.u32 8388607, %v6436_v52  ;;  %v1648_v32 = vor.u32 %v1647_v24, %v1646_v43  ;;  %v1790_v52 = vshrl.u32 %v6378_v41, %v3918_v23  ;;  %v1793_v24 = vshrl.u32 %v6381_v8, %v3918_v23 }
 0x18a   :  { %6428 = vst [vmem:[#allocation91_spill] sm:$0xff] %v3903_v36  ;;  %v2247_v43 = vadd.s32 1, %v3222_v34  ;;  %v1658_v31 = vsel %vm1652_vm13, %v1645_v50, 920167782  ;;  %v3975_v51 = vor.u32 %v1796_v22, %v1795_v38  ;;  %v1813_v17 = vsel %vm1807_vm12, %v1800_v62, 920167782 }
 0x18b   :  { %6429 = vst [vmem:[#allocation92_spill] sm:$0xff] %v3906_v46  ;;  %v1315_v55 = vor.u32 8388608, %v1314_v39  ;;  %v1662_v29 = vsel %vm1652_vm13, %v1648_v32, 1326507024  ;;  %v3971_v34 = vor.u32 %v1790_v52, %v1789_v4  ;;  %v3973_v33 = vor.u32 %v1793_v24, %v1792_v63 }
 0x18c   :  { %6430 = vst [vmem:[#allocation93_spill] sm:$0xff] %v3918_v23  ;;  %vm2248_vm9 = vcmp.gt.s32.totalorder %v2247_v43, 0  ;;  %v3207_v39 = vadd.s32 4294967169, %v1466_v25  ;;  %v1817_v32 = vsel %vm1807_vm12, %v1803_v57, 1326507024  ;;  %v3985_v30 = vsub.s32 32, %v1321_v11 }
 0x18d   :  { %6431 = vst [vmem:[#allocation94_spill] sm:$0xff] %v3921_v10  ;;  %v2249_v59 = vsel %vm2248_vm9, %v2247_v43, 0  ;;  %v3981_v14 = vshll.u32 %v1315_v55, 8  ;;  %v3994_v38 = vsel %vm1649_vm2, %v3933_v26, %v3939_v16  ;;  %v3999_v55 = vsel %vm1651_vm3, %v3963_v42, %v1658_v31 }
 0x18e   :  { %6432 = vst [vmem:[#allocation95_spill] sm:$0xff] %v3925_v60  ;;  %v3988_v4 = vand.u32 31, %v2249_v59  ;;  %v4005_v25 = vsel %vm1649_vm2, %v3939_v16, %v3963_v42  ;;  %v4009_v57 = vsel %vm1651_vm3, %v1645_v50, %v1662_v29  ;;  %v4015_v63 = vsel %vm1804_vm11, %v3971_v34, %v3973_v33 }
 0x18f   :  { %6433 = vst [vmem:[#allocation96_spill] sm:$0xff] %v3931_v37  ;;  %v4020_v52 = vsel %vm1806_vm10, %v3975_v51, %v1813_v17  ;;  %v4026_v24 = vsel %vm1804_vm11, %v3973_v33, %v3975_v51  ;;  %v2396_v22 = vshrl.u32 %v2395_v61, 23  ;;  %v4030_v29 = vsel %vm1806_vm10, %v1800_v62, %v1817_v32 }
 0x190   :  { %6434 = vst [vmem:[#allocation97_spill] sm:$0xff] %v3933_v26  ;;  %v4032_v50 = vshrl.u32 %v1319_v48, 5  ;;  %v4035_v43 = vand.u32 65535, %v3981_v14  ;;  %v1472_v31 = vadd.s32 1, %v3207_v39  ;;  %v1325_v17 = vshrl.u32 %v6378_v41, %v3985_v30 }
 0x191   :  { %6435 = vst [vmem:[#allocation98_spill] sm:$0xff] %v3939_v16  ;;  %v4040_v13 = vshrl.u32 %v3981_v14, 16  ;;  %v4045_v61 = vsub.s32 32, %v3988_v4  ;;  %v1328_v48 = vshrl.u32 %v6381_v8, %v3985_v30  ;;  %v1334_v62 = vshrl.u32 %v6390_v1, %v3985_v30 }
 0x192   :  { %6437 = vst [vmem:[#allocation99_spill] sm:$0xff] %v3949_v56  ;;  %v1337_v39 = vshrl.u32 %v6383_v28, %v3985_v30  ;;  %v1330_v7 = vshll.u32 %v6381_v8, %v1321_v11  ;;  %v3225_v46 = vadd.s32 4294967169, %v2396_v22  ;;  %v1333_v3 = vshll.u32 %v6397_v18, %v1321_v11 }
 0x193   :  { %6438 = vst [vmem:[#allocation100_spill] sm:$0xff] %v3963_v42  ;;  %v1336_v19 = vshll.u32 %v6390_v1, %v1321_v11  ;;  %vm1473_vm9 = vcmp.gt.s32.totalorder %v1472_v31, 0  ;;  %v2266_v32 = vshll.u32 %v6390_v1, %v3988_v4  ;;  %v2267_v49 = vshrl.u32 %v6383_v28, %v4045_v61 }
 0x194   :  { %6439 = vst [vmem:[#allocation101_spill] sm:$0xff] %v3971_v34  ;;  %v1335_v22 = vor.u32 %v1334_v62, %v1333_v3  ;;  %v4069_v6 = vshrl.u32 %v2249_v59, 5  ;;  %v2402_v58 = vadd.s32 1, %v3225_v46  ;;  %v2261_v27 = vshrl.u32 %v6397_v18, %v4045_v61 }
 0x195   :  { %6440 = vst [vmem:[#allocation102_spill] sm:$0xff] %v3973_v33  ;;  %v1338_v40 = vor.u32 %v1337_v39, %v1336_v19  ;;  %v2263_v3 = vshll.u32 %v6397_v18, %v3988_v4  ;;  %v2264_v19 = vshrl.u32 %v6390_v1, %v4045_v61  ;;  %vm6261_vm7 = vcmp.lt.s32.totalorder %v4032_v50, 3 }
 0x196   :  { %6441 = vst [vmem:[#allocation103_spill] sm:$0xff] %v3975_v51  ;;  %vm6320_vm5 = vcmp.lt.s32.totalorder %v4032_v50, 4  ;;  %vm2272_vm6 = vcmp.lt.s32.totalorder %v4069_v6, 4  ;;  %v6457_v62 = vand.u32 2147483647, %v3875_v21  ;;  %vm2403_vm8 = vcmp.gt.s32.totalorder %v2402_v58, 0 }
 0x197   :  { %6442 = vst [vmem:[#allocation104_spill] sm:$0xff] %v3981_v14  ;;  %v1324_v14 = vshll.u32 %v6380_v44, %v1321_v11  ;;  %vm2269_vm4 = vcmp.lt.s32.totalorder %v4069_v6, 1  ;;  %vm2271_vm1 = vcmp.lt.s32.totalorder %v4069_v6, 3 }
 0x198   :  { %6443 = vst [vmem:[#allocation105_spill] sm:$0xff] %v3985_v30  ;;  %v2244_v39 = vand.u32 8388607, %v6457_v62 }
 0x199   :  { %6444 = vst [vmem:[#allocation106_spill] sm:$0xff] %v4015_v63  ;;  %v4061_v35 = vor.u32 %v1325_v17, %v1324_v14  ;;  %v2260_v14 = vshll.u32 %v6381_v8, %v3988_v4  ;;  %v2258_v17 = vshrl.u32 %v6381_v8, %v4045_v61 }
 0x19a   :  { %6445 = vst [vmem:[#allocation107_spill] sm:$0xff] %v4020_v52 }
 0x19b   :  { %6446 = vst [vmem:[#allocation108_spill] sm:$0xff] %v4026_v24  ;;  %v6481_v24 = vmov 0  }
 0x19c   :  { %6447 = vst [vmem:[#allocation109_spill] sm:$0xff] %v4030_v29 }
 0x19d   :  { %6448 = vst [vmem:[#allocation110_spill] sm:$0xff] %v4032_v50 }
 0x19e   :  { %6449 = vst [vmem:[#allocation111_spill] sm:$0xff] %v4035_v43  ;;  %v1331_v43 = vshrl.u32 %v6397_v18, %v3985_v30  ;;  %v1474_v30 = vsel %vm1473_vm9, %v1472_v31, 0  ;;  %vm6273_vm9 = vcmp.lt.s32.totalorder %v4032_v50, 1  ;;  %v4088_v31 = vshll.u32 %v1470_v5, 8 }
 0x19f   :  { %6450 = vst [vmem:[#allocation112_spill] sm:$0xff] %v4040_v13  ;;  %v1327_v13 = vshll.u32 %v6378_v41, %v1321_v11  ;;  %v2257_v11 = vshll.u32 %v6378_v41, %v3988_v4  ;;  %v1476_v46 = vand.u32 31, %v1474_v30 }
 0x1a0   :  { %6452 = vst [vmem:[#allocation113_spill] sm:$0xff] %v4061_v35  ;;  %v4083_v59 = vor.u32 %v1331_v43, %v1330_v7  ;;  %v1348_v43 = vsel %vm6320_vm5, %v1335_v22, 920167782  ;;  %v2265_v7 = vor.u32 %v2264_v19, %v2263_v3  ;;  %v4128_v19 = vshrl.u32 %v4088_v31, 16 }
 0x1a1   :  { %v4067_v20 = vor.u32 %v1328_v48, %v1327_v13  ;;  %v2268_v13 = vor.u32 %v2267_v49, %v2266_v32  ;;  %6455 = vst [vmem:[#allocation116_spill] sm:$0xff] %v4088_v31  ;;  %v1352_v49 = vsel %vm6320_vm5, %v1338_v40, 1326507024  ;;  %v2259_v5 = vor.u32 %v2258_v17, %v2257_v11  ;;  %v342_v17 = vpop.f32.mrf.mxu2 }
 0x1a2   :  { %6454 = vst [vmem:[#allocation115_spill] sm:$0xff] %v4083_v59  ;;  %v2262_v32 = vor.u32 %v2261_v27, %v2260_v14  ;;  %v4116_v40 = vsel %vm6261_vm7, %v4083_v59, %v1348_v43  ;;  %v4118_v27 = vsub.s32 32, %v1476_v46  ;;  %v4121_v11 = vand.u32 65535, %v4088_v31 }
 0x1a3   :  { %6453 = vst [vmem:[#allocation114_spill] sm:$0xff] %v4067_v20  ;;  %v4095_v48 = vsel %vm6273_vm9, %v4061_v35, %v4067_v20  ;;  %v4107_v9 = vsel %vm6273_vm9, %v4067_v20, %v4083_v59  ;;  %v2282_v62 = vsel %vm2272_vm6, %v2268_v13, 1326507024  ;;  %v2404_v14 = vsel %vm2403_vm8, %v2402_v58, 0 }
 0x1a4   :  { %6456 = vst [vmem:[#allocation117_spill] sm:$0xff] %v4095_v48  ;;  %v4125_v3 = vsel %vm6261_vm7, %v1335_v22, %v1352_v49  ;;  %v2245_v13 = vor.u32 8388608, %v2244_v39  ;;  %v2254_v43 = vshll.u32 %v6380_v44, %v3988_v4  ;;  %v2255_v35 = vshrl.u32 %v6378_v41, %v4045_v61 }
 0x1a5   :  { %6458 = vst [vmem:[#allocation118_spill] sm:$0xff] %v4107_v9  ;;  %v2281_v58 = vsel %vm2269_vm4, %v2259_v5, %v2262_v32  ;;  %v4139_v22 = vshrl.u32 %v1474_v30, 5  ;;  %v1479_v49 = vshll.u32 %v6380_v44, %v1476_v46  ;;  %v2406_v31 = vand.u32 31, %v2404_v14 }
 0x1a6   :  { %6459 = vst [vmem:[#allocation119_spill] sm:$0xff] %v4116_v40  ;;  %v4143_v39 = vadd.f32 %v342_v17, %v3666_v0  ;;  %v1480_v4 = vshrl.u32 %v6378_v41, %v4118_v27  ;;  %v1482_v20 = vshll.u32 %v6378_v41, %v1476_v46  ;;  %vm2270_vm8 = vcmp.lt.s32.totalorder %v4069_v6, 2 }
 0x1a7   :  { %6460 = vst [vmem:[#allocation120_spill] sm:$0xff] %v4118_v27  ;;  %v1486_v30 = vshrl.u32 %v6397_v18, %v4118_v27  ;;  %v1489_v59 = vshrl.u32 %v6390_v1, %v4118_v27  ;;  %v2253_v48 = vshrl.u32 %v6380_v44, %v4045_v61  ;;  %v2256_v40 = vor.u32 %v2255_v35, %v2254_v43 }
 0x1a8   :  { %6461 = vst [vmem:[#allocation121_spill] sm:$0xff] %v4121_v11  ;;  %v2283_v11 = vsel %vm2271_vm1, %v2265_v7, %v2282_v62  ;;  %v1483_v62 = vshrl.u32 %v6381_v8, %v4118_v27  ;;  %v4162_v9 = vshll.u32 %v2245_v13, 8  ;;  %v1488_v54 = vshll.u32 %v6397_v18, %v1476_v46 }
 0x1a9   :  { %6462 = vst [vmem:[#allocation122_spill] sm:$0xff] %v4125_v3  ;;  %v4158_v17 = vsel %vm2270_vm8, %v2281_v58, %v2283_v11  ;;  %v6466_v3 = vand.u32 2147483647, %v3925_v60  ;;  %v4168_v47 = vshll.u32 %v6390_v1, %v1476_v46  ;;  %v4170_v33 = vsub.s32 32, %v2406_v31 }
 0x1aa   :  { %6463 = vst [vmem:[#allocation123_spill] sm:$0xff] %v4128_v19  ;;  %v1485_v19 = vshll.u32 %v6381_v8, %v1476_v46  ;;  %v1930_v34 = vand.u32 2139095040, %v4143_v39  ;;  %v4173_v11 = vor.u32 %v1480_v4, %v1479_v49  ;;  %v4177_v61 = vshrl.u32 %v6383_v28, %v4118_v27 }
 0x1ab   :  { %6464 = vst [vmem:[#allocation124_spill] sm:$0xff] %v4139_v22  ;;  %v2399_v50 = vand.u32 8388607, %v6466_v3  ;;  %vm6274_vm7 = vcmp.lt.s32.totalorder %v4139_v22, 1  ;;  %v6264_v35 = vshrl.u32 %v4158_v17, 16  ;;  %v4181_v3 = vor.u32 %v1483_v62, %v1482_v20 }
 0x1ac   :  { %6465 = vst [vmem:[#allocation125_spill] sm:$0xff] %v4143_v39  ;;  %v4183_v13 = vor.u32 %v1486_v30, %v1485_v19  ;;  %v2274_v46 = vsel %vm2272_vm6, %v2262_v32, 2102212464  ;;  %v2278_v43 = vsel %vm2272_vm6, %v2265_v7, 920167782  ;;  %v4189_v58 = vor.u32 %v1489_v59, %v1488_v54 }
 0x1ad   :  { %6467 = vst [vmem:[#allocation126_spill] sm:$0xff] %v4168_v47  ;;  %v2273_v49 = vsel %vm2269_vm4, %v2253_v48, %v2256_v40  ;;  %v4194_v4 = vand.u32 65535, %v4162_v9  ;;  %v2400_v27 = vor.u32 8388608, %v2399_v50  ;;  %v2277_v20 = vsel %vm2269_vm4, %v2256_v40, %v2259_v5  ;;  %v345_v47 = vpop.f32.mrf.mxu2 }
 0x1ae   :  { %6468 = vst [vmem:[#allocation127_spill] sm:$0xff] %v4173_v11  ;;  %v2421_v19 = vshll.u32 %v6390_v1, %v2406_v31  ;;  %v2422_v62 = vshrl.u32 %v6383_v28, %v4170_v33  ;;  %v1931_v30 = vshrl.u32 %v1930_v34, 23  ;;  %v2275_v54 = vsel %vm2271_vm1, %v2259_v5, %v2274_v46 }
 0x1af   :  { %6469 = vst [vmem:[#allocation128_spill] sm:$0xff] %v4177_v61  ;;  %v2279_v59 = vsel %vm2271_vm1, %v2262_v32, %v2278_v43  ;;  %v4208_v48 = vmul.u32 %v6264_v35, %v4194_v4  ;;  %v4210_v50 = vshrl.u32 %v2404_v14, 5  ;;  %v2409_v7 = vshll.u32 %v6380_v44, %v2406_v31  ;;  %v371_v43 = vpop.f32.mrf.mxu3 }
 0x1b0   :  { %6470 = vst [vmem:[#allocation129_spill] sm:$0xff] %v4181_v3  ;;  %v2412_v40 = vshll.u32 %v6378_v41, %v2406_v31  ;;  %v2419_v34 = vshrl.u32 %v6390_v1, %v4170_v33  ;;  %v2410_v5 = vshrl.u32 %v6378_v41, %v4170_v33  ;;  %v2413_v32 = vshrl.u32 %v6381_v8, %v4170_v33 }
 0x1b1   :  { %6471 = vst [vmem:[#allocation130_spill] sm:$0xff] %v4183_v13  ;;  %v2418_v13 = vshll.u32 %v6397_v18, %v2406_v31  ;;  %v2415_v46 = vshll.u32 %v6381_v8, %v2406_v31  ;;  %v2416_v14 = vshrl.u32 %v6397_v18, %v4170_v33  ;;  %v2287_v35 = vshrl.u32 %v4162_v9, 16 }
 0x1b2   :  { %6472 = vst [vmem:[#allocation131_spill] sm:$0xff] %v4189_v58  ;;  %v2423_v58 = vor.u32 %v2422_v62, %v2421_v19  ;;  %v3216_v51 = vadd.s32 4294967169, %v1931_v30  ;;  %v4231_v63 = vsel %vm6274_vm7, %v4173_v11, %v4181_v3  ;;  %v2288_v52 = vand.u32 65535, %v4158_v17 }
 0x1b3   :  { %6473 = vst [vmem:[#allocation132_spill] sm:$0xff] %v4231_v63  ;;  %vm2427_vm6 = vcmp.lt.s32.totalorder %v4210_v50, 4  ;;  %v6279_v31 = vand.u32 2147483647, %v4143_v39  ;;  %v4238_v23 = vsel %vm2270_vm8, %v2273_v49, %v2275_v54  ;;  %v2280_v19 = vsel %vm2270_vm8, %v2277_v20, %v2279_v59 }
 0x1b4   :  { %6474 = vst [vmem:[#allocation133_spill] sm:$0xff] %v4238_v23  ;;  %v2420_v62 = vor.u32 %v2419_v34, %v2418_v13  ;;  %v4242_v30 = vshll.u32 %v2400_v27, 8  ;;  %v2294_v11 = vshll.u32 %v4208_v48, 16  ;;  %v2411_v63 = vor.u32 %v2410_v5, %v2409_v7 }
 0x1b5   :  { %v2414_v3 = vor.u32 %v2413_v32, %v2412_v40  ;;  %v2417_v61 = vor.u32 %v2416_v14, %v2415_v46  ;;  %vm2424_vm1 = vcmp.lt.s32.totalorder %v4210_v50, 1  ;;  %vm2426_vm4 = vcmp.lt.s32.totalorder %v4210_v50, 3 }
 0x1b6   :  { %6475 = vst [vmem:[#allocation134_spill] sm:$0xff] %v4242_v30  ;;  %v2437_v49 = vsel %vm2427_vm6, %v2423_v58, 1326507024  ;;  %v1937_v54 = vadd.s32 1, %v3216_v51  ;;  %v2290_v6 = vmul.u32 %v2288_v52, %v4194_v4  ;;  %v4253_v13 = vadd.f32 %v371_v43, %v3666_v0 }
 0x1b7   :  { %v4256_v20 = vadd.f32 %v345_v47, %v3577_v15  ;;  %v2310_v59 = vand.u32 65535, %v2280_v19  ;;  %v2311_v7 = vshrl.u32 %v2280_v19, 16  ;;  %v2433_v40 = vsel %vm2427_vm6, %v2420_v62, 920167782  ;;  %v374_v29 = vpop.f32.mrf.mxu3 }
 0x1b8   :  { %6476 = vst [vmem:[#allocation135_spill] sm:$0xff] %v4253_v13  ;;  %v2441_v34 = vand.u32 65535, %v4242_v30  ;;  %vm4261_vm8 = vc.u32 %v2290_v6, %v2294_v11  ;;  %v2436_v58 = vsel %vm2424_vm1, %v2414_v3, %v2417_v61  ;;  %v2438_v0 = vsel %vm2426_vm4, %v2420_v62, %v2437_v49 }
 0x1b9   :  { %6477 = vst [vmem:[#allocation136_spill] sm:$0xff] %v4256_v20  ;;  %v2442_v47 = vshrl.u32 %v4242_v30, 16  ;;  %v2408_v5 = vshrl.u32 %v6380_v44, %v4170_v33  ;;  %vm2425_vm9 = vcmp.lt.s32.totalorder %v4210_v50, 2  ;;  %v2432_v32 = vsel %vm2424_vm1, %v2411_v63, %v2414_v3 }
 0x1ba   :  { %vm1938_vm7 = vcmp.gt.s32.totalorder %v1937_v54, 0  ;;  %v2429_v46 = vsel %vm2427_vm6, %v2417_v61, 2102212464  ;;  %v2434_v14 = vsel %vm2426_vm4, %v2417_v61, %v2433_v40  ;;  %v2085_v43 = vand.u32 2139095040, %v4253_v13 }
 0x1bb   :  { %v2550_v19 = vand.u32 2139095040, %v4256_v20  ;;  %v4281_v62 = vmul.u32 %v2288_v52, %v2287_v35  ;;  %v6480_v33 = vshrl.u32 %v4158_v17, 16  ;;  %v2439_v27 = vsel %vm2425_vm9, %v2436_v58, %v2438_v0 }
 0x1bc   :  { %v1934_v22 = vand.u32 8388607, %v6279_v31  ;;  %v4290_v37 = vmul.u32 %v2310_v59, %v4194_v4  ;;  %v4293_v61 = vmul.u32 %v2311_v7, %v4194_v4  ;;  %v1939_v40 = vsel %vm1938_vm7, %v1937_v54, 0 }
 0x1bd   :  { %v2293_v49 = vmul.u32 %v6480_v33, %v2287_v35  ;;  %v2551_v10 = vshrl.u32 %v2550_v19, 23  ;;  %v2299_v52 = vsel %vm4261_vm8, 1, %v6481_v24  ;;  %v2428_v17 = vsel %vm2424_vm1, %v2408_v5, %v2411_v63 }
 0x1be   :  { %v2430_v58 = vsel %vm2426_vm4, %v2414_v3, %v2429_v46  ;;  %v2435_v0 = vsel %vm2425_vm9, %v2432_v32, %v2434_v14  ;;  %v2443_v33 = vand.u32 65535, %v2439_v27  ;;  %v2444_v31 = vshrl.u32 %v2439_v27, 16 }
 0x1bf   :  { %v2086_v39 = vshrl.u32 %v2085_v43, 23  ;;  %v3228_v4 = vadd.s32 4294967169, %v2551_v10  ;;  %v4304_v54 = vmul.u32 %v2310_v59, %v2287_v35  ;;  %v4306_v19 = vmul.u32 %v2311_v7, %v2287_v35 }
 0x1c0   :  { %v1935_v51 = vor.u32 8388608, %v1934_v22  ;;  %v1941_v2 = vand.u32 31, %v1939_v40  ;;  %v4311_v63 = vsel %vm2425_vm9, %v2428_v17, %v2430_v58  ;;  %v2465_v3 = vand.u32 65535, %v2435_v0 }
 0x1c1   :  { %6482 = vst [vmem:[#allocation137_spill] sm:$0xff] %v4311_v63  ;;  %v2466_v5 = vshrl.u32 %v2435_v0, 16  ;;  %v4313_v32 = vadd.s32 %v2294_v11, %v2290_v6  ;;  %v4315_v27 = vadd.s32 %v2299_v52, %v2293_v49  ;;  %v2557_v10 = vadd.s32 1, %v3228_v4 }
 0x1c2   :  { %v4318_v59 = vadd.f32 %v374_v29, %v3577_v15  ;;  %v4320_v35 = vmul.u32 %v2444_v31, %v2441_v34  ;;  %v4322_v22 = vmul.u32 %v2443_v33, %v2442_v47  ;;  %v6285_v7 = vand.u32 2147483647, %v4253_v13 }
 0x1c3   :  { %v3219_v46 = vadd.s32 4294967169, %v2086_v39  ;;  %v2445_v50 = vmul.u32 %v2443_v33, %v2441_v34  ;;  %v4327_v43 = vsub.s32 32, %v1941_v2  ;;  %v4329_v11 = vshll.u32 %v1935_v51, 8 }
 0x1c4   :  { %6483 = vst [vmem:[#allocation138_spill] sm:$0xff] %v4318_v59  ;;  %v2448_v6 = vmul.u32 %v2444_v31, %v2442_v47  ;;  %v4331_v49 = vmul.u32 %v2465_v3, %v2441_v34  ;;  %v4333_v15 = vmul.u32 %v2466_v5, %v2441_v34  ;;  %v6293_v29 = vand.u32 2147483647, %v4256_v20 }
 0x1c5   :  { %6484 = vst [vmem:[#allocation139_spill] sm:$0xff] %v4327_v43  ;;  %v4336_v52 = vmul.u32 %v2465_v3, %v2442_v47  ;;  %v4338_v17 = vmul.u32 %v2466_v5, %v2442_v47  ;;  %vm2558_vm7 = vcmp.gt.s32.totalorder %v2557_v10, 0  ;;  %v2705_v39 = vand.u32 2139095040, %v4318_v59 }
 0x1c6   :  { %6485 = vst [vmem:[#allocation140_spill] sm:$0xff] %v4329_v11  ;;  %v2449_v58 = vshll.u32 %v4320_v35, 16  ;;  %v2089_v31 = vand.u32 8388607, %v6285_v7  ;;  %v2092_v33 = vadd.s32 1, %v3219_v46  ;;  %v1953_v34 = vshll.u32 %v6397_v18, %v1941_v2 }
 0x1c7   :  { %v1954_v4 = vshrl.u32 %v6390_v1, %v4327_v43  ;;  %v1956_v51 = vshll.u32 %v6390_v1, %v1941_v2  ;;  %v1957_v47 = vshrl.u32 %v6383_v28, %v4327_v43  ;;  %v4351_v3 = vshrl.u32 %v1939_v40, 5 }
 0x1c8   :  { %v1944_v5 = vshll.u32 %v6380_v44, %v1941_v2  ;;  %v2554_v14 = vand.u32 8388607, %v6293_v29  ;;  %v2559_v0 = vsel %vm2558_vm7, %v2557_v10, 0  ;;  %v1945_v46 = vshrl.u32 %v6378_v41, %v4327_v43 }
 0x1c9   :  { %6486 = vst [vmem:[#allocation141_spill] sm:$0xff] %v4351_v3  ;;  %v1947_v7 = vshll.u32 %v6378_v41, %v1941_v2  ;;  %v1948_v56 = vshrl.u32 %v6381_v8, %v4327_v43  ;;  %v2706_v13 = vshrl.u32 %v2705_v39, 23  ;;  %v1950_v60 = vshll.u32 %v6381_v8, %v1941_v2 }
 0x1ca   :  { %v1951_v40 = vshrl.u32 %v6397_v18, %v4327_v43  ;;  %v2090_v16 = vor.u32 8388608, %v2089_v31  ;;  %vm2093_vm9 = vcmp.gt.s32.totalorder %v2092_v33, 0  ;;  %vm2453_vm6 = vc.u32 %v2445_v50, %v2449_v58 }
 0x1cb   :  { %v1955_v20 = vor.u32 %v1954_v4, %v1953_v34  ;;  %v1958_v29 = vor.u32 %v1957_v47, %v1956_v51  ;;  %v2561_v10 = vand.u32 31, %v2559_v0  ;;  %v4365_v26 = vand.u32 65535, %v4329_v11 }
 0x1cc   :  { %v4368_v42 = vshrl.u32 %v4329_v11, 16  ;;  %v2555_v21 = vor.u32 8388608, %v2554_v14  ;;  %v6301_v39 = vand.u32 2147483647, %v4318_v59  ;;  %v4371_v45 = vor.u32 %v1945_v46, %v1944_v5 }
 0x1cd   :  { %6487 = vst [vmem:[#allocation142_spill] sm:$0xff] %v4365_v26  ;;  %v4373_v2 = vor.u32 %v1948_v56, %v1947_v7  ;;  %v2094_v43 = vsel %vm2093_vm9, %v2092_v33, 0  ;;  %v3231_v31 = vadd.s32 4294967169, %v2706_v13  ;;  %v2454_v63 = vsel %vm2453_vm6, 1, %v6481_v24 }
 0x1ce   :  { %6488 = vst [vmem:[#allocation143_spill] sm:$0xff] %v4368_v42  ;;  %v4376_v34 = vor.u32 %v1951_v40, %v1950_v60  ;;  %vm6332_vm1 = vcmp.lt.s32.totalorder %v4351_v3, 4  ;;  %v4379_v4 = vshll.u32 %v2090_v16, 8  ;;  %v4381_v51 = vadd.s32 %v2449_v58, %v2445_v50 }
 0x1cf   :  { %6489 = vst [vmem:[#allocation144_spill] sm:$0xff] %v4371_v45  ;;  %v1968_v14 = vsel %vm6332_vm1, %v1955_v20, 920167782  ;;  %v1972_v47 = vsel %vm6332_vm1, %v1958_v29, 1326507024  ;;  %v2562_v56 = vsub.s32 32, %v2561_v10  ;;  %v4392_v33 = vadd.s32 %v2454_v63, %v2448_v6 }
 0x1d0   :  { %6490 = vst [vmem:[#allocation145_spill] sm:$0xff] %v4373_v2  ;;  %vm6331_vm4 = vcmp.lt.s32.totalorder %v4351_v3, 1  ;;  %v2096_v13 = vand.u32 31, %v2094_v43  ;;  %v4388_v7 = vshll.u32 %v2555_v21, 8  ;;  %v2709_v60 = vand.u32 8388607, %v6301_v39 }
 0x1d1   :  { %6491 = vst [vmem:[#allocation146_spill] sm:$0xff] %v4376_v34  ;;  %vm6322_vm8 = vcmp.lt.s32.totalorder %v4351_v3, 3  ;;  %v4399_v16 = vsel %vm6331_vm4, %v4371_v45, %v4373_v2  ;;  %v2712_v50 = vadd.s32 1, %v3231_v31  ;;  %v4410_v21 = vsel %vm6331_vm4, %v4373_v2, %v4376_v34 }
 0x1d2   :  { %6492 = vst [vmem:[#allocation147_spill] sm:$0xff] %v4379_v4  ;;  %v4404_v29 = vsel %vm6322_vm8, %v4376_v34, %v1968_v14  ;;  %v4414_v63 = vsel %vm6322_vm8, %v1955_v20, %v1972_v47  ;;  %v4417_v6 = vand.u32 65535, %v4379_v4  ;;  %v4419_v58 = vshrl.u32 %v2094_v43, 5 }
 0x1d3   :  { %6493 = vst [vmem:[#allocation148_spill] sm:$0xff] %v4399_v16  ;;  %v4422_v5 = vshrl.u32 %v4379_v4, 16  ;;  %v2571_v46 = vshrl.u32 %v6397_v18, %v2562_v56  ;;  %v2577_v40 = vshrl.u32 %v6383_v28, %v2562_v56  ;;  %v4426_v31 = vsub.s32 32, %v2096_v13 }
 0x1d4   :  { %6494 = vst [vmem:[#allocation149_spill] sm:$0xff] %v4404_v29  ;;  %v4429_v14 = vand.u32 65535, %v4388_v7  ;;  %v4432_v20 = vshrl.u32 %v4388_v7, 16  ;;  %v2710_v47 = vor.u32 8388608, %v2709_v60  ;;  %v2570_v39 = vshll.u32 %v6381_v8, %v2561_v10 }
 0x1d5   :  { %6495 = vst [vmem:[#allocation150_spill] sm:$0xff] %v4410_v21  ;;  %v2574_v43 = vshrl.u32 %v6390_v1, %v2562_v56  ;;  %v2576_v4 = vshll.u32 %v6390_v1, %v2561_v10  ;;  %vm2713_vm7 = vcmp.gt.s32.totalorder %v2712_v50, 0  ;;  %v2565_v11 = vshrl.u32 %v6378_v41, %v2562_v56 }
 0x1d6   :  { %6496 = vst [vmem:[#allocation151_spill] sm:$0xff] %v4414_v63  ;;  %v2568_v59 = vshrl.u32 %v6381_v8, %v2562_v56  ;;  %v2102_v42 = vshll.u32 %v6378_v41, %v2096_v13  ;;  %v2572_v16 = vor.u32 %v2571_v46, %v2570_v39  ;;  %v2573_v29 = vshll.u32 %v6397_v18, %v2561_v10 }
 0x1d7   :  { %6497 = vst [vmem:[#allocation152_spill] sm:$0xff] %v4417_v6  ;;  %v2560_v6 = vshrl.u32 %v2559_v0, 5  ;;  %v2578_v60 = vor.u32 %v2577_v40, %v2576_v4  ;;  %v2112_v2 = vshrl.u32 %v6383_v28, %v4426_v31  ;;  %v2564_v26 = vshll.u32 %v6380_v44, %v2561_v10 }
 0x1d8   :  { %6498 = vst [vmem:[#allocation153_spill] sm:$0xff] %v4419_v58  ;;  %v2567_v45 = vshll.u32 %v6378_v41, %v2561_v10  ;;  %v2714_v34 = vsel %vm2713_vm7, %v2712_v50, 0  ;;  %v2105_v0 = vshll.u32 %v6381_v8, %v2096_v13  ;;  %v2108_v21 = vshll.u32 %v6397_v18, %v2096_v13 }
 0x1d9   :  { %6499 = vst [vmem:[#allocation154_spill] sm:$0xff] %v4422_v5  ;;  %v2099_v5 = vshll.u32 %v6380_v44, %v2096_v13  ;;  %v2111_v63 = vshll.u32 %v6390_v1, %v2096_v13  ;;  %v2575_v3 = vor.u32 %v2574_v43, %v2573_v29  ;;  %v2100_v39 = vshrl.u32 %v6378_v41, %v4426_v31 }
 0x1da   :  { %6500 = vst [vmem:[#allocation155_spill] sm:$0xff] %v4426_v31  ;;  %v2566_v46 = vor.u32 %v2565_v11, %v2564_v26  ;;  %v2569_v4 = vor.u32 %v2568_v59, %v2567_v45  ;;  %vm2582_vm9 = vcmp.lt.s32.totalorder %v2560_v6, 4  ;;  %v2103_v40 = vshrl.u32 %v6381_v8, %v4426_v31 }
 0x1db   :  { %v2584_v28 = vsel %vm2582_vm9, %v2572_v16, 2102212464  ;;  %v2592_v30 = vsel %vm2582_vm9, %v2578_v60, 1326507024  ;;  %v4453_v10 = vand.u32 31, %v2714_v34  ;;  %v2106_v50 = vshrl.u32 %v6397_v18, %v4426_v31 }
 0x1dc   :  { %v2109_v13 = vshrl.u32 %v6390_v1, %v4426_v31  ;;  %v2113_v29 = vor.u32 %v2112_v2, %v2111_v63  ;;  %v2563_v43 = vshrl.u32 %v6380_v44, %v2562_v56  ;;  %vm2579_vm6 = vcmp.lt.s32.totalorder %v2560_v6, 1 }
 0x1dd   :  { %vm2581_vm7 = vcmp.lt.s32.totalorder %v2560_v6, 3  ;;  %v2588_v45 = vsel %vm2582_vm9, %v2575_v3, 920167782  ;;  %v4460_v26 = vshll.u32 %v2710_v47, 8  ;;  %v2591_v36 = vsel %vm2579_vm6, %v2569_v4, %v2572_v16 }
 0x1de   :  { %v2583_v59 = vsel %vm2579_vm6, %v2563_v43, %v2566_v46  ;;  %v2585_v11 = vsel %vm2581_vm7, %v2569_v4, %v2584_v28  ;;  %v2593_v60 = vsel %vm2581_vm7, %v2575_v3, %v2592_v30  ;;  %v4462_v12 = vor.u32 %v2100_v39, %v2099_v5 }
 0x1df   :  { %v4464_v23 = vor.u32 %v2103_v40, %v2102_v42  ;;  %vm6323_vm5 = vcmp.lt.s32.totalorder %v4419_v58, 4  ;;  %v4468_v31 = vsub.s32 32, %v4453_v10  ;;  %v4470_v2 = vor.u32 %v2106_v50, %v2105_v0 }
 0x1e0   :  { %6501 = vst [vmem:[#allocation156_spill] sm:$0xff] %v4462_v12  ;;  %vm2580_vm8 = vcmp.lt.s32.totalorder %v2560_v6, 2  ;;  %v2587_v56 = vsel %vm2579_vm6, %v2566_v46, %v2569_v4  ;;  %v2589_v63 = vsel %vm2581_vm7, %v2572_v16, %v2588_v45  ;;  %v6505_v28 = vshll.u32 %v4281_v62, 16 }
 0x1e1   :  { %6502 = vst [vmem:[#allocation157_spill] sm:$0xff] %v4464_v23  ;;  %v4472_v47 = vsel %vm2580_vm8, %v2583_v59, %v2585_v11  ;;  %v4474_v43 = vsel %vm2580_vm8, %v2591_v36, %v2593_v60  ;;  %v2316_v42 = vshll.u32 %v4293_v61, 16  ;;  %v4480_v30 = vor.u32 %v2109_v13, %v2108_v21 }
 0x1e2   :  { %6503 = vst [vmem:[#allocation158_spill] sm:$0xff] %v4470_v2  ;;  %vm2302_vm9 = vc.u32 %v4313_v32, %v6505_v28  ;;  %v4484_v3 = vsel %vm6323_vm5, %v2113_v29, 1326507024  ;;  %v4486_v5 = vshrl.u32 %v2714_v34, 5  ;;  %v4489_v16 = vand.u32 65535, %v4460_v26 }
 0x1e3   :  { %6504 = vst [vmem:[#allocation159_spill] sm:$0xff] %v4472_v47  ;;  %v4491_v6 = vsel %vm2580_vm8, %v2587_v56, %v2589_v63  ;;  %v4495_v36 = vshrl.u32 %v6380_v44, %v4468_v31  ;;  %v2719_v32 = vshll.u32 %v6380_v44, %v4453_v10  ;;  %v2720_v21 = vshrl.u32 %v6378_v41, %v4468_v31 }
 0x1e4   :  { %6506 = vst [vmem:[#allocation160_spill] sm:$0xff] %v4480_v30  ;;  %v2598_v0 = vand.u32 65535, %v4474_v43  ;;  %v4506_v39 = vshll.u32 %v6378_v41, %v4453_v10  ;;  %v2303_v46 = vsel %vm2302_vm9, 1, %v6481_v24  ;;  %v2599_v4 = vshrl.u32 %v4474_v43, 16 }
 0x1e5   :  { %6507 = vst [vmem:[#allocation161_spill] sm:$0xff] %v4484_v3  ;;  %v2295_v40 = vshrl.u32 %v4208_v48, 16  ;;  %v2305_v50 = vadd.s32 %v2303_v46, %v4315_v27  ;;  %vm2320_vm8 = vc.u32 %v4290_v37, %v2316_v42  ;;  %v2620_v13 = vand.u32 65535, %v4491_v6 }
 0x1e6   :  { %v2318_v29 = vshll.u32 %v4304_v54, 16  ;;  %v2321_v45 = vsel %vm2320_vm8, 1, %v6481_v24  ;;  %v2322_v59 = vadd.s32 %v2316_v42, %v4290_v37  ;;  %v2621_v41 = vshrl.u32 %v4491_v6, 16 }
 0x1e7   :  { %v4518_v11 = vor.u32 %v2720_v21, %v2719_v32  ;;  %v2306_v60 = vadd.s32 %v2305_v50, %v2295_v40  ;;  %v2323_v56 = vadd.s32 %v2321_v45, %v4306_v19  ;;  %v4523_v48 = vshrl.u32 %v6381_v8, %v4468_v31 }
 0x1e8   :  { %v4527_v27 = vshll.u32 %v6381_v8, %v4453_v10  ;;  %v4531_v63 = vshrl.u32 %v6397_v18, %v4468_v31  ;;  %vm2324_vm6 = vc.u32 %v2322_v59, %v2318_v29  ;;  %v2297_v37 = vshrl.u32 %v4281_v62, 16 }
 0x1e9   :  { %v2325_v43 = vsel %vm2324_vm6, 1, %v6481_v24  ;;  %v6508_v28 = vshll.u32 %v4322_v22, 16  ;;  %v2471_v19 = vshll.u32 %v4333_v15, 16  ;;  %v4540_v42 = vmul.u32 %v2598_v0, %v4429_v14 }
 0x1ea   :  { %v2317_v8 = vshrl.u32 %v4293_v61, 16  ;;  %v2327_v32 = vadd.s32 %v2325_v43, %v2323_v56  ;;  %v4544_v46 = vadd.s32 %v2306_v60, %v2297_v37  ;;  %v2319_v62 = vshrl.u32 %v4304_v54, 16 }
 0x1eb   :  { %vm2457_vm7 = vc.u32 %v4381_v51, %v6508_v28  ;;  %v2450_v40 = vshrl.u32 %v4320_v35, 16  ;;  %v2473_v51 = vshll.u32 %v4336_v52, 16  ;;  %vm2475_vm9 = vc.u32 %v4331_v49, %v2471_v19 }
 0x1ec   :  { %v2458_v21 = vsel %vm2457_vm7, 1, %v6481_v24  ;;  %v2328_v45 = vadd.s32 %v2327_v32, %v2317_v8  ;;  %v2477_v28 = vadd.s32 %v2471_v19, %v4331_v49  ;;  %v4552_v34 = vadd.s32 %v2322_v59, %v2318_v29 }
 0x1ed   :  { %v2460_v50 = vadd.s32 %v2458_v21, %v4392_v33  ;;  %v2476_v56 = vsel %vm2475_vm9, 1, %v6481_v24  ;;  %vm1650_vm8 = vcmp.lt.s32.totalorder %v3897_v53, 2  ;;  %v4557_v54 = vmul.u32 %v2599_v4, %v4429_v14 }
 0x1ee   :  { %v2329_v35 = vadd.s32 %v2328_v45, %v2319_v62  ;;  %v2478_v33 = vadd.s32 %v2476_v56, %v4338_v17  ;;  %vm2479_vm6 = vc.u32 %v2477_v28, %v2473_v51  ;;  %v4561_v60 = vmul.u32 %v2598_v0, %v4432_v20  ;;  %v6511_v56 = vld [vmem:[#allocation90_spill] sm:$0xff] }
 0x1ef   :  { %v2461_v61 = vadd.s32 %v2460_v50, %v2450_v40  ;;  %vm2332_vm7 = vc.u32 %v4544_v46, %v4552_v34  ;;  %v2452_v49 = vshrl.u32 %v4322_v22, 16  ;;  %v2480_v29 = vsel %vm2479_vm6, 1, %v6481_v24  ;;  %v6509_v40 = vld [vmem:[#allocation133_spill] sm:$0xff] }
 0x1f0   :  { %v2333_v59 = vadd.s32 1, %v2329_v35  ;;  %v2472_v37 = vshrl.u32 %v4333_v15, 16  ;;  %v2482_v43 = vadd.s32 %v2480_v29, %v2478_v33  ;;  %v1660_v17 = vsel %vm1650_vm8, %v3994_v38, %v3999_v55 }
 0x1f1   :  { %v4573_v19 = vmul.u32 %v2599_v4, %v4432_v20  ;;  %v4575_v0 = vadd.s32 %v2461_v61, %v2452_v49  ;;  %v2474_v8 = vshrl.u32 %v4336_v52, 16  ;;  %v1664_v22 = vsel %vm1650_vm8, %v4005_v25, %v4009_v57  ;;  %v6512_v49 = vld [vmem:[#allocation91_spill] sm:$0xff] }
 0x1f2   :  { %v2334_v32 = vsel %vm2332_vm7, %v2333_v59, %v2329_v35  ;;  %v2483_v15 = vadd.s32 %v2482_v43, %v2472_v37  ;;  %v1668_v21 = vand.u32 65535, %v1664_v22  ;;  %v1669_v62 = vshrl.u32 %v1664_v22, 16 }
 0x1f3   :  { %v6510_v50 = vmul.u32 %v4162_v9, %v6509_v40  ;;  %v4585_v55 = vadd.s32 %v2477_v28, %v2473_v51  ;;  %v1690_v4 = vand.u32 65535, %v1660_v17  ;;  %v1691_v45 = vshrl.u32 %v1660_v17, 16  ;;  %v6513_v40 = vld [vmem:[#allocation134_spill] sm:$0xff] }
 0x1f4   :  { %v2484_v61 = vadd.s32 %v2483_v15, %v2474_v8  ;;  %v1670_v52 = vmul.u32 %v1668_v21, %v6511_v56  ;;  %v1671_v33 = vmul.u32 %v1669_v62, %v6511_v56  ;;  %v4590_v29 = vmul.u32 %v1668_v21, %v6512_v49 }
 0x1f5   :  { %v2335_v38 = vadd.s32 %v2334_v32, %v6510_v50  ;;  %v4595_v25 = vmul.u32 %v2620_v13, %v4429_v14  ;;  %vm2487_vm9 = vc.u32 %v4575_v0, %v4585_v55  ;;  %v4600_v9 = vmul.u32 %v1691_v45, %v6511_v56  ;;  %v6514_v50 = vld [vmem:[#allocation137_spill] sm:$0xff] }
 0x1f6   :  { %v4605_v51 = vmul.u32 %v2621_v41, %v4429_v14  ;;  %v2488_v28 = vadd.s32 1, %v2484_v61  ;;  %v1674_v35 = vshll.u32 %v1671_v33, 16  ;;  %v1676_v59 = vshll.u32 %v4590_v29, 16 }
 0x1f7   :  { %v2336_v57 = vadd.s32 536870912, %v2335_v38  ;;  %v1673_v43 = vmul.u32 %v1669_v62, %v6512_v49  ;;  %v1692_v17 = vmul.u32 %v1690_v4, %v6511_v56  ;;  %v4613_v8 = vmul.u32 %v1690_v4, %v6512_v49 }
 0x1f8   :  { %v2489_v22 = vsel %vm2487_vm9, %v2488_v28, %v2484_v61  ;;  %vm1678_vm6 = vc.u32 %v1670_v52, %v1674_v35  ;;  %v1680_v32 = vadd.s32 %v1674_v35, %v1670_v52  ;;  %v1696_v15 = vshll.u32 %v4600_v9, 16 }
 0x1f9   :  { %v4608_v37 = vshrl.u32 %v2336_v57, 30  ;;  %v4619_v14 = vmul.u32 %v2620_v13, %v4432_v20  ;;  %v6515_v62 = vmul.u32 %v6513_v40, %v6514_v50  ;;  %v1679_v56 = vsel %vm1678_vm6, 1, %v6481_v24  ;;  %v6516_v40 = vld [vmem:[#allocation83_spill] sm:$0xff] }
 0x1fa   :  { %v4630_v61 = vmul.u32 %v2621_v41, %v4432_v20  ;;  %v1681_v52 = vadd.s32 %v1679_v56, %v1673_v43  ;;  %vm1682_vm7 = vc.u32 %v1680_v32, %v1676_v59  ;;  %v4634_v13 = vor.u32 %v4523_v48, %v4506_v39  ;;  %v6517_v41 = vld [vmem:[#allocation84_spill] sm:$0xff] }
 0x1fb   :  { %v2338_v21 = vshll.u32 %v4608_v37, 30  ;;  %v2490_v57 = vadd.s32 %v2489_v22, %v6515_v62  ;;  %v1683_v22 = vsel %vm1682_vm7, 1, %v6481_v24  ;;  %v1633_v50 = vshrl.u32 %v6380_v44, %v6516_v40  ;;  %v6518_v48 = vld [vmem:[#allocation100_spill] sm:$0xff] }
 0x1fc   :  { %v1685_v62 = vadd.s32 %v1683_v22, %v1681_v52  ;;  %v1698_v4 = vshll.u32 %v4613_v8, 16  ;;  %vm1700_vm9 = vc.u32 %v1692_v17, %v1696_v15  ;;  %v1675_v39 = vshrl.u32 %v1671_v33, 16 }
 0x1fd   :  { %v4636_v28 = vsub.s32 %v2335_v38, %v2338_v21  ;;  %v2491_v35 = vadd.s32 536870912, %v2490_v57  ;;  %vm2239_vm5 = vcmp.lt.s32.totalorder %v6517_v41, 0  ;;  %v1654_v38 = vsel %vm1652_vm13, %v6518_v48, 2102212464 }
 0x1fe   :  { %v1695_v59 = vmul.u32 %v1691_v45, %v6512_v49  ;;  %v1701_v43 = vsel %vm1700_vm9, 1, %v6481_v24  ;;  %v1702_v32 = vadd.s32 %v1696_v15, %v1692_v17  ;;  %v4654_v21 = vor.u32 %v4531_v63, %v4527_v27  ;;  %v6519_v49 = vld [vmem:[#allocation97_spill] sm:$0xff]  ;;  %v6520_v27 = vld [vmem:[#allocation98_spill] sm:$0xff] }
 0x1ff   :  { %vm2340_vm6 = vcmp.lt.s32.totalorder %v4636_v28, 0  ;;  %v2341_v20 = vsub.s32 0, %v4636_v28  ;;  %v4644_v6 = vshrl.u32 %v2491_v35, 30  ;;  %v1686_v33 = vadd.s32 %v1685_v62, %v1675_v39 }
 0x200   :  { %v4660_v35 = vshll.u32 %v6397_v18, %v4453_v10  ;;  %v1703_v40 = vadd.s32 %v1701_v43, %v1695_v59  ;;  %vm1704_vm13 = vc.u32 %v1702_v32, %v1698_v4  ;;  %v1653_v17 = vsel %vm1649_vm2, %v1633_v50, %v6519_v49  ;;  %v6524_v50 = vld [vmem:[#allocation95_spill] sm:$0xff] }
 0x201   :  { %v2342_v56 = vsel %vm2340_vm6, %v2341_v20, %v4636_v28  ;;  %v2493_v52 = vshll.u32 %v4644_v6, 30  ;;  %v1655_v63 = vsel %vm1651_vm3, %v6520_v27, %v1654_v38  ;;  %v1677_v15 = vshrl.u32 %v4590_v29, 16 }
 0x202   :  { %v2343_v22 = vclz %v2342_v56  ;;  %v6521_v62 = vand.u32 2147483647, %v6517_v41  ;;  %v1697_v39 = vshrl.u32 %v4600_v9, 16  ;;  %v1705_v48 = vsel %vm1704_vm13, 1, %v6481_v24 }
 0x203   :  { %v4662_v45 = vsub.s32 %v2490_v57, %v2493_v52  ;;  %v2361_v57 = vsub.s32 4, %v4608_v37  ;;  %vm2394_vm2 = vcmp.lt.s32.totalorder %v6524_v50, 0  ;;  %v4683_v29 = vadd.s32 %v1686_v33, %v1677_v15 }
 0x204   :  { %vm4673_vm7 = vcmp.le.f32.partialorder %v6521_v62, 0.7853982  ;;  %v3223_v20 = vadd.s32 4294967294, %v2343_v22  ;;  %v1707_v59 = vadd.s32 %v1705_v48, %v1703_v40  ;;  %v2729_v43 = vshrl.u32 %v6390_v1, %v4468_v31 }
 0x205   :  { %vm2495_vm9 = vcmp.lt.s32.totalorder %v4662_v45, 0  ;;  %v2496_v38 = vsub.s32 0, %v4662_v45  ;;  %v2331_v56 = vadd.s32 %v4552_v34, %v4544_v46  ;;  %v1699_v9 = vshrl.u32 %v4613_v8, 16 }
 0x206   :  { %vm3224_vm3 = vcmp.lt.s32.totalorder %v3223_v20, 0  ;;  %v1706_v49 = vadd.s32 %v1702_v32, %v1698_v4  ;;  %v1708_v27 = vadd.s32 %v1707_v59, %v1697_v39  ;;  %v6525_v33 = vand.u32 2147483647, %v6524_v50 }
 0x207   :  { %v2346_v52 = vsel %vm3224_vm3, 0, %v3223_v20  ;;  %v2497_v22 = vsel %vm2495_vm9, %v2496_v38, %v4662_v45  ;;  %v1656_v34 = vsel %vm1650_vm8, %v1653_v17, %v1655_v63  ;;  %v2362_v46 = vsel %vm2239_vm5, %v2361_v57, %v4608_v37 }
 0x208   :  { %v2347_v62 = vsub.s32 32, %v2346_v52  ;;  %v2351_v12 = vsub.s32 4294967266, %v2346_v52  ;;  %vm4693_vm6 = vcmp.le.f32.partialorder %v6525_v33, 0.7853982  ;;  %v2498_v15 = vclz %v2497_v22  ;;  %v6531_v33 = vld [vmem:[#allocation109_spill] sm:$0xff] }
 0x209   :  { %v2516_v8 = vsub.s32 4, %v4644_v6  ;;  %v1709_v4 = vadd.s32 %v1708_v27, %v1699_v9  ;;  %vm1712_vm13 = vc.u32 %v4683_v29, %v1706_v49  ;;  %v2348_v32 = vshll.u32 %v4636_v28, %v2346_v52  ;;  %v6529_v9 = vld [vmem:[#allocation99_spill] sm:$0xff] }
 0x20a   :  { %v2349_v20 = vshrl.u32 %v2331_v56, %v2347_v62  ;;  %v2352_v39 = vadd.s32 127, %v2351_v12  ;;  %v3226_v48 = vadd.s32 4294967294, %v2498_v15  ;;  %v4707_v38 = vshll.u32 %v6390_v1, %v4453_v10  ;;  %v6530_v56 = vld [vmem:[#allocation81_spill] sm:$0xff]  ;;  %v6532_v15 = vld [vmem:[#allocation108_spill] sm:$0xff] }
 0x20b   :  { %v6528_v53 = vmov 1326507024   ;;  %v2486_v37 = vadd.s32 %v4585_v55, %v4575_v0  ;;  %v1713_v63 = vadd.s32 1, %v1709_v4  ;;  %vm1805_vm9 = vcmp.lt.s32.totalorder %v6529_v9, 2  ;;  %v6545_v9 = vld [vmem:[#allocation40_spill] sm:$0xff] }
 0x20c   :  { %v4711_v17 = vshrl.u32 %v6528_v53, %v4468_v31  ;;  %v2350_v57 = vor.u32 %v2349_v20, %v2348_v32  ;;  %v2353_v59 = vshll.u32 %v2352_v39, 23  ;;  %vm3227_vm8 = vcmp.lt.s32.totalorder %v3226_v48, 0 }
 0x20d   :  { %v2364_v12 = vsel %vm4673_vm7, 0, %v2362_v46  ;;  %v2501_v28 = vsel %vm3227_vm8, 0, %v3226_v48  ;;  %v1710_v1 = vmul.u32 %v6530_v56, %v1656_v34  ;;  %v1714_v10 = vsel %vm1712_vm13, %v1713_v63, %v1709_v4 }
 0x20e   :  { %v2354_v31 = vor.u32 4788187, %v2353_v59  ;;  %v2357_v52 = vcvt.s32.f32 %v2350_v57  ;;  %v2502_v22 = vsub.s32 32, %v2501_v28  ;;  %v2517_v0 = vsel %vm2394_vm2, %v2516_v8, %v4644_v6 }
 0x20f   :  { %v2503_v55 = vshll.u32 %v4662_v45, %v2501_v28  ;;  %v2506_v27 = vsub.s32 4294967266, %v2501_v28  ;;  %v1715_v62 = vadd.s32 %v1714_v10, %v1710_v1  ;;  %v1819_v46 = vsel %vm1805_vm9, %v6532_v15, %v6531_v33  ;;  %v6533_v45 = vld [vmem:[#allocation94_spill] sm:$0xff]  ;;  %v6534_v1 = vld [vmem:[#allocation96_spill] sm:$0xff] }
 0x210   :  { %v2355_v34 = vand.u32 2147483647, %v2354_v31  ;;  %v2504_v32 = vshrl.u32 %v2486_v37, %v2502_v22  ;;  %v1823_v20 = vand.u32 65535, %v1819_v46  ;;  %v1824_v4 = vshrl.u32 %v1819_v46, 16 }
 0x211   :  { %v2381_v39 = vadd.s32 3, %v2364_v12  ;;  %v2507_v48 = vadd.s32 127, %v2506_v27  ;;  %v2519_v53 = vsel %vm4693_vm6, 0, %v2517_v0  ;;  %v1716_v63 = vadd.s32 536870912, %v1715_v62 }
 0x212   :  { %v2358_v6 = vmul.f32 %v2357_v52, %v2355_v34  ;;  %v2505_v8 = vor.u32 %v2504_v32, %v2503_v55  ;;  %v1825_v57 = vmul.u32 %v1823_v20, %v6533_v45  ;;  %v4733_v59 = vmul.u32 %v1824_v4, %v6533_v45 }
 0x213   :  { %v4736_v28 = vor.u32 %v2729_v43, %v4660_v35  ;;  %v2508_v56 = vshll.u32 %v2507_v48, 23  ;;  %v4738_v37 = vshrl.u32 %v1716_v63, 30  ;;  %v4741_v12 = vmul.u32 %v1823_v20, %v6534_v1  ;;  %v6537_v63 = vld [vmem:[#allocation106_spill] sm:$0xff] }
 0x214   :  { %v2359_v31 = vxor.u32 2147483648, %v2358_v6  ;;  %v2536_v52 = vadd.s32 3, %v2519_v53  ;;  %v1829_v22 = vshll.u32 %v4733_v59, 16  ;;  %v4746_v0 = vand.u32 3, %v2381_v39  ;;  %v6535_v39 = vld [vmem:[#allocation93_spill] sm:$0xff]  ;;  %v6536_v53 = vld [vmem:[#allocation107_spill] sm:$0xff] }
 0x215   :  { %v2509_v55 = vor.u32 4788187, %v2508_v56  ;;  %v4749_v27 = vadd.s32 %v1706_v49, %v4683_v29  ;;  %v1718_v35 = vshll.u32 %v4738_v37, 30  ;;  %v2512_v33 = vcvt.s32.f32 %v2505_v8  ;;  %v6538_v8 = vld [vmem:[#allocation103_spill] sm:$0xff] }
 0x216   :  { %v2360_v43 = vsel %vm2239_vm5, %v2359_v31, %v2358_v6  ;;  %v1831_v15 = vshll.u32 %v4741_v12, 16  ;;  %v1835_v46 = vadd.s32 %v1829_v22, %v1825_v57  ;;  %vm1833_vm3 = vc.u32 %v1825_v57, %v1829_v22 }
 0x217   :  { %v4758_v34 = vsel %vm4673_vm7, %v6517_v41, %v2360_v43  ;;  %v2510_v32 = vand.u32 2147483647, %v2509_v55  ;;  %v4760_v20 = vsub.s32 %v1715_v62, %v1718_v35  ;;  %v4764_v49 = vand.u32 3, %v2536_v52 }
 0x218   :  { %v2365_v29 = vmul.f32 %v4758_v34, %v4758_v34  ;;  %v1788_v48 = vshrl.u32 %v6380_v44, %v6535_v39  ;;  %v4772_v6 = vsel %vm1805_vm9, %v6537_v63, %v6536_v53  ;;  %v1809_v57 = vsel %vm1807_vm12, %v6538_v8, 2102212464  ;;  %v6539_v8 = vld [vmem:[#allocation101_spill] sm:$0xff] }
 0x219   :  { %v2513_v18 = vmul.f32 %v2512_v33, %v2510_v32  ;;  %vm1720_vm5 = vcmp.lt.s32.totalorder %v4760_v20, 0  ;;  %v1721_v62 = vsub.s32 0, %v4760_v20  ;;  %v1834_v52 = vsel %vm1833_vm3, 1, %v6481_v24 }
 0x21a   :  { %v2366_v56 = vmul.f32 -0.001358992, %v2365_v29  ;;  %v2373_v31 = vmul.f32 -0.00019511016, %v2365_v29  ;;  %vm1837_vm7 = vc.u32 %v1835_v46, %v1831_v15  ;;  %v1828_v35 = vmul.u32 %v1824_v4, %v6534_v1 }
 0x21b   :  { %v2514_v22 = vxor.u32 2147483648, %v2513_v18  ;;  %v1722_v55 = vsel %vm1720_vm5, %v1721_v62, %v4760_v20  ;;  %v1846_v43 = vshrl.u32 %v4772_v6, 16  ;;  %v1845_v53 = vand.u32 65535, %v4772_v6 }
 0x21c   :  { %v2367_v33 = vadd.f32 0.041655596, %v2366_v56  ;;  %v2374_v32 = vadd.f32 0.008332121, %v2373_v31  ;;  %v1723_v39 = vclz %v1722_v55  ;;  %v4789_v10 = vsel %vm1804_vm11, %v1788_v48, %v6539_v8 }
 0x21d   :  { %v2515_v63 = vsel %vm2394_vm2, %v2514_v22, %v2513_v18  ;;  %v1836_v15 = vadd.s32 %v1834_v52, %v1828_v35  ;;  %v1838_v46 = vsel %vm1837_vm7, 1, %v6481_v24  ;;  %v6540_v18 = vld [vmem:[#allocation102_spill] sm:$0xff]  ;;  %v1830_v48 = vshrl.u32 %v4733_v59, 16 }
 0x21e   :  { %v2368_v62 = vmul.f32 %v2367_v33, %v2365_v29  ;;  %v2375_v4 = vmul.f32 %v2374_v32, %v2365_v29  ;;  %v4795_v56 = vsel %vm4693_vm6, %v6524_v50, %v2515_v63  ;;  %v3211_v31 = vadd.s32 4294967294, %v1723_v39 }
 0x21f   :  { %v2520_v6 = vmul.f32 %v4795_v56, %v4795_v56  ;;  %v4802_v22 = vsel %vm1806_vm10, %v6540_v18, %v1809_v57  ;;  %v4806_v52 = vmul.u32 %v1846_v43, %v6533_v45  ;;  %v1847_v40 = vmul.u32 %v1845_v53, %v6533_v45 }
 0x220   :  { %v2369_v55 = vadd.f32 -0.4999988, %v2368_v62  ;;  %v2376_v35 = vadd.f32 -0.16666654, %v2375_v4  ;;  %vm3212_vm11 = vcmp.lt.s32.totalorder %v3211_v31, 0  ;;  %vm2384_vm12 = vcmp.eq.s32.totalorder %v4746_v0, 0 }
 0x221   :  { %vm2387_vm2 = vcmp.eq.s32.totalorder %v4746_v0, 2  ;;  %v2521_v33 = vmul.f32 -0.001358992, %v2520_v6  ;;  %v2528_v32 = vmul.f32 -0.00019511016, %v2520_v6  ;;  %v1726_v39 = vsel %vm3212_vm11, 0, %v3211_v31 }
 0x222   :  { %v1840_v63 = vadd.s32 %v1838_v46, %v1836_v15  ;;  %v2370_v57 = vmul.f32 %v2369_v55, %v2365_v29  ;;  %v2377_v8 = vmul.f32 %v2376_v35, %v2365_v29  ;;  %vm2383_vm10 = vcmp.lt.s32.totalorder %v4746_v0, 2  ;;  %v6541_v62 = vld [vmem:[#allocation46_spill] sm:$0xff] }
 0x223   :  { %v1727_v59 = vsub.s32 32, %v1726_v39  ;;  %v4813_v18 = vmul.u32 %v1845_v53, %v6534_v1  ;;  %vm1619_vm6 = vcmp.lt.s32.totalorder %v6541_v62, 0  ;;  %vm2380_vm13 = vweird.f32 %v6517_v41 }
 0x224   :  { %v2522_v45 = vadd.f32 0.041655596, %v2521_v33  ;;  %v2529_v4 = vadd.f32 0.008332121, %v2528_v32  ;;  %v1731_v3 = vsub.s32 4294967266, %v1726_v39  ;;  %v1851_v23 = vshll.u32 %v4806_v52, 16 }
 0x225   :  { %v2371_v2 = vadd.f32 1.0, %v2370_v57  ;;  %v2378_v31 = vadd.f32 1.0, %v2377_v8  ;;  %v1728_v15 = vshll.u32 %v4760_v20, %v1726_v39  ;;  %v1729_v29 = vshrl.u32 %v4749_v27, %v1727_v59 }
 0x226   :  { %v2523_v46 = vmul.f32 %v2522_v45, %v2520_v6  ;;  %v2530_v55 = vmul.f32 %v2529_v4, %v2520_v6  ;;  %v1732_v35 = vadd.s32 127, %v1731_v3  ;;  %v1741_v53 = vsub.s32 4, %v4738_v37 }
 0x227   :  { %v2379_v30 = vmul.f32 %v2378_v31, %v4758_v34  ;;  %v2388_v58 = vxor.u32 2147483648, %v2371_v2  ;;  %v6542_v33 = vand.u32 2147483647, %v6541_v62  ;;  %v1730_v57 = vor.u32 %v1729_v29, %v1728_v15 }
 0x228   :  { %v1841_v8 = vadd.s32 %v1840_v63, %v1830_v48  ;;  %v2524_v47 = vadd.f32 -0.4999988, %v2523_v46  ;;  %v2531_v20 = vadd.f32 -0.16666654, %v2530_v55  ;;  %vm2542_vm3 = vcmp.eq.s32.totalorder %v4764_v49, 2 }
 0x229   :  { %vm4824_vm8 = vcmp.le.f32.partialorder %v6542_v33, 0.7853982  ;;  %v1733_v27 = vshll.u32 %v1732_v35, 23  ;;  %vm1855_vm5 = vc.u32 %v1847_v40, %v1851_v23  ;;  %v2385_v3 = vxor.u32 2147483648, %v2379_v30 }
 0x22a   :  { %vm2539_vm7 = vcmp.eq.s32.totalorder %v4764_v49, 0  ;;  %v1850_v34 = vmul.u32 %v1846_v43, %v6534_v1  ;;  %v1853_v39 = vshll.u32 %v4813_v18, 16  ;;  %v1856_v59 = vsel %vm1855_vm5, 1, %v6481_v24 }
 0x22b   :  { %v2525_v45 = vmul.f32 %v2524_v47, %v2520_v6  ;;  %v2532_v4 = vmul.f32 %v2531_v20, %v2520_v6  ;;  %vm2538_vm11 = vcmp.lt.s32.totalorder %v4764_v49, 2  ;;  %v1734_v48 = vor.u32 4788187, %v1733_v27 }
 0x22c   :  { %v1857_v63 = vadd.s32 %v1851_v23, %v1847_v40  ;;  %v2386_v31 = vsel %vm2384_vm12, %v2371_v2, %v2385_v3  ;;  %v2389_v15 = vsel %vm2387_vm2, %v2388_v58, %v2379_v30  ;;  %vm2535_vm4 = vweird.f32 %v6524_v50 }
 0x22d   :  { %v1737_v29 = vcvt.s32.f32 %v1730_v57  ;;  %v1858_v1 = vadd.s32 %v1856_v59, %v1850_v34  ;;  %vm2734_vm1 = vcmp.lt.s32.totalorder %v4486_v5, 1  ;;  %v2390_v47 = vsel %vm2383_vm10, %v2386_v31, %v2389_v15  ;;  %v6549_v59 = vld [vmem:[#allocation50_spill] sm:$0xff] }
 0x22e   :  { %v2526_v43 = vadd.f32 1.0, %v2525_v45  ;;  %v2533_v6 = vadd.f32 1.0, %v2532_v4  ;;  %v1735_v46 = vand.u32 2147483647, %v1734_v48  ;;  %v2391_v23 = vsel %vm2380_vm13, nan, %v2390_v47 }
 0x22f   :  { %v1742_v2 = vsel %vm1619_vm6, %v1741_v53, %v4738_v37  ;;  %v1832_v58 = vshrl.u32 %v4741_v12, 16  ;;  %vm1859_vm12 = vc.u32 %v1857_v63, %v1853_v39  ;;  %2911 = vmatpush.msra.mxu0 %v2391_v23  ;;  %v1811_v41 = vsel %vm1805_vm9, %v4789_v10, %v4802_v22 }
 0x230   :  { %v2534_v30 = vmul.f32 %v2533_v6, %v4795_v56  ;;  %v2543_v40 = vxor.u32 2147483648, %v2526_v43  ;;  %v1738_v55 = vmul.f32 %v1737_v29, %v1735_v46  ;;  %v1860_v0 = vsel %vm1859_vm12, 1, %v6481_v24  ;;  %v6550_v46 = vld [vmem:[#allocation89_spill] sm:$0xff] }
 0x231   :  { %v4854_v35 = vadd.s32 %v1841_v8, %v1832_v58  ;;  %v1852_v33 = vshrl.u32 %v4806_v52, 16  ;;  %v1862_v37 = vadd.s32 %v1860_v0, %v1858_v1  ;;  %v1744_v57 = vsel %vm4824_vm8, 0, %v1742_v2  ;;  %v6546_v52 = vld [vmem:[#allocation57_spill] sm:$0xff]  ;;  %v6547_v8 = vld [vmem:[#allocation48_spill] sm:$0xff] }
 0x232   :  { %v2540_v53 = vxor.u32 2147483648, %v2534_v30  ;;  %v1739_v12 = vxor.u32 2147483648, %v1738_v55  ;;  %v1854_v56 = vshrl.u32 %v4813_v18, 16  ;;  %v2544_v20 = vsel %vm2542_vm3, %v2543_v40, %v2534_v30  ;;  %v6548_v18 = vld [vmem:[#allocation58_spill] sm:$0xff]  ;;  %v6551_v2 = vld [vmem:[#allocation37_spill] sm:$0xff]  ;;  %v6552_v40 = vld [vmem:[#allocation39_spill] sm:$0xff] }
 0x233   :  { %v4862_v27 = vadd.s32 %v1857_v63, %v1853_v39  ;;  %v1863_v3 = vadd.s32 %v1862_v37, %v1852_v33  ;;  %vm1030_vm9 = vcmp.lt.s32.totalorder %v6545_v9, 2  ;;  %v4890_v49 = vsel %vm2734_vm1, %v4495_v36, %v4518_v11 }
 0x234   :  { %v2541_v10 = vsel %vm2539_vm7, %v2526_v43, %v2540_v53  ;;  %v1740_v22 = vsel %vm1619_vm6, %v1739_v12, %v1738_v55  ;;  %v1040_v34 = vsel %vm1030_vm9, %v6547_v8, %v6546_v52  ;;  %v1044_v39 = vsel %vm1030_vm9, %v6549_v59, %v6548_v18 }
 0x235   :  { %v2545_v45 = vsel %vm2538_vm11, %v2541_v10, %v2544_v20  ;;  %v1743_v4 = vsel %vm4824_vm8, %v6541_v62, %v1740_v22  ;;  %v1864_v48 = vadd.s32 %v1863_v3, %v1854_v56  ;;  %vm1867_vm2 = vc.u32 %v4854_v35, %v4862_v27 }
 0x236   :  { %v2546_v63 = vsel %vm2535_vm4, nan, %v2545_v45  ;;  %v1745_v31 = vmul.f32 %v1743_v4, %v1743_v4  ;;  %v1048_v15 = vand.u32 65535, %v1044_v39  ;;  %v1049_v29 = vshrl.u32 %v1044_v39, 16  ;;  %v6553_v39 = vld [vmem:[#allocation31_spill] sm:$0xff] }
 0x237   :  { %2940 = vmatpush.msra.mxu1 %v2546_v63  ;;  %v1761_v1 = vadd.s32 3, %v1744_v57  ;;  %v1868_v32 = vadd.s32 1, %v1864_v48  ;;  %v1071_v47 = vshrl.u32 %v1040_v34, 16  ;;  %v1865_v23 = vmul.u32 %v6550_v46, %v1811_v41 }
 0x238   :  { %v1746_v43 = vmul.f32 -0.001358992, %v1745_v31  ;;  %v1753_v6 = vmul.f32 -0.00019511016, %v1745_v31  ;;  %v1051_v50 = vmul.u32 %v1049_v29, %v6551_v2  ;;  %v1050_v30 = vmul.u32 %v1048_v15, %v6551_v2 }
 0x239   :  { %v1869_v58 = vsel %vm1867_vm2, %v1868_v32, %v1864_v48  ;;  %v4896_v55 = vmul.u32 %v1048_v15, %v6552_v40  ;;  %v1070_v0 = vand.u32 65535, %v1040_v34  ;;  %v4902_v12 = vsel %vm2734_vm1, %v4518_v11, %v4634_v13 }
 0x23a   :  { %v1747_v33 = vadd.f32 0.041655596, %v1746_v43  ;;  %v1754_v36 = vadd.f32 0.008332121, %v1753_v6  ;;  %v1870_v37 = vadd.s32 %v1869_v58, %v1865_v23  ;;  %v1054_v53 = vshll.u32 %v1051_v50, 16  ;;  %v6554_v43 = vld [vmem:[#allocation47_spill] sm:$0xff] }
 0x23b   :  { %v1762_v41 = vand.u32 3, %v1761_v1  ;;  %v1053_v57 = vmul.u32 %v1049_v29, %v6552_v40  ;;  %v4906_v56 = vmul.u32 %v1071_v47, %v6551_v2  ;;  %v1056_v22 = vshll.u32 %v4896_v55, 16 }
 0x23c   :  { %v1748_v20 = vmul.f32 %v1747_v33, %v1745_v31  ;;  %v1755_v3 = vmul.f32 %v1754_v36, %v1745_v31  ;;  %v1871_v10 = vadd.s32 536870912, %v1870_v37  ;;  %vm1058_vm4 = vc.u32 %v1050_v30, %v1054_v53 }
 0x23d   :  { %v1059_v52 = vsel %vm1058_vm4, 1, %v6481_v24  ;;  %v1060_v8 = vadd.s32 %v1054_v53, %v1050_v30  ;;  %v4911_v34 = vmul.u32 %v1070_v0, %v6552_v40  ;;  %v1013_v45 = vshrl.u32 %v6380_v44, %v6553_v39 }
 0x23e   :  { %v1749_v11 = vadd.f32 -0.4999988, %v1748_v20  ;;  %v1756_v18 = vadd.f32 -0.16666654, %v1755_v3  ;;  %v4913_v59 = vshrl.u32 %v1871_v10, 30  ;;  %v1061_v48 = vadd.s32 %v1059_v52, %v1053_v57 }
 0x23f   :  { %vm1062_vm10 = vc.u32 %v1060_v8, %v1056_v22  ;;  %v1072_v63 = vmul.u32 %v1070_v0, %v6551_v2  ;;  %v1076_v15 = vshll.u32 %v4906_v56, 16  ;;  %v1034_v6 = vsel %vm1032_vm0, %v6554_v43, 2102212464  ;;  %v6555_v8 = vld [vmem:[#allocation44_spill] sm:$0xff] }
 0x240   :  { %v1750_v29 = vmul.f32 %v1749_v11, %v1745_v31  ;;  %v1757_v1 = vmul.f32 %v1756_v18, %v1745_v31  ;;  %v1873_v32 = vshll.u32 %v4913_v59, 30  ;;  %v1063_v46 = vsel %vm1062_vm10, 1, %v6481_v24  ;;  %v6557_v11 = vld [vmem:[#allocation45_spill] sm:$0xff] }
 0x241   :  { %v1078_v23 = vshll.u32 %v4911_v34, 16  ;;  %vm1080_vm6 = vc.u32 %v1072_v63, %v1076_v15  ;;  %v1082_v58 = vadd.s32 %v1076_v15, %v1072_v63  ;;  %v1055_v2 = vshrl.u32 %v1051_v50, 16 }
 0x242   :  { %v1751_v30 = vadd.f32 1.0, %v1750_v29  ;;  %v1758_v33 = vadd.f32 1.0, %v1757_v1  ;;  %v4925_v36 = vsub.s32 %v1870_v37, %v1873_v32  ;;  %v1065_v0 = vadd.s32 %v1063_v46, %v1061_v48 }
 0x243   :  { %v1075_v31 = vmul.u32 %v1071_v47, %v6552_v40  ;;  %v1081_v53 = vsel %vm1080_vm6, 1, %v6481_v24  ;;  %vm1084_vm13 = vc.u32 %v1082_v58, %v1078_v23  ;;  %vm1764_vm8 = vcmp.eq.s32.totalorder %v1762_v41, 0  ;;  %v6556_v40 = vld [vmem:[#allocation51_spill] sm:$0xff] }
 0x244   :  { %v1759_v57 = vmul.f32 %v1758_v33, %v1743_v4  ;;  %v1768_v20 = vxor.u32 2147483648, %v1751_v30  ;;  %vm1875_vm0 = vcmp.lt.s32.totalorder %v4925_v36, 0  ;;  %v1876_v3 = vsub.s32 0, %v4925_v36 }
 0x245   :  { %v1066_v10 = vadd.s32 %v1065_v0, %v1055_v2  ;;  %v1083_v22 = vadd.s32 %v1081_v53, %v1075_v31  ;;  %v1085_v52 = vsel %vm1084_vm13, 1, %v6481_v24  ;;  %vm1767_vm3 = vcmp.eq.s32.totalorder %v1762_v41, 2  ;;  %v6559_v0 = vld [vmem:[#allocation62_spill] sm:$0xff]  ;;  %v6560_v31 = vld [vmem:[#allocation60_spill] sm:$0xff] }
 0x246   :  { %v1765_v37 = vxor.u32 2147483648, %v1759_v57  ;;  %v1877_v50 = vsel %vm1875_vm0, %v1876_v3, %v4925_v36  ;;  %v1033_v47 = vsel %vm1029_vm14, %v1013_v45, %v6555_v8  ;;  %vm1774_vm5 = vcmp.lt.s32.totalorder %v6556_v40, 0 }
 0x247   :  { %vm2737_vm7 = vcmp.lt.s32.totalorder %v4486_v5, 4  ;;  %v1878_v4 = vclz %v1877_v50  ;;  %v1035_v18 = vsel %vm1031_vm15, %v6557_v11, %v1034_v6  ;;  %v1057_v39 = vshrl.u32 %v4896_v55, 16 }
 0x248   :  { %v1087_v48 = vadd.s32 %v1085_v52, %v1083_v22  ;;  %vm1763_vm11 = vcmp.lt.s32.totalorder %v1762_v41, 2  ;;  %v1766_v63 = vsel %vm1764_vm8, %v1751_v30, %v1765_v37  ;;  %v1769_v15 = vsel %vm1767_vm3, %v1768_v20, %v1759_v57  ;;  %v6561_v57 = vld [vmem:[#allocation30_spill] sm:$0xff] }
 0x249   :  { %v1077_v29 = vshrl.u32 %v4906_v56, 16  ;;  %vm1760_vm12 = vweird.f32 %v6541_v62  ;;  %v1770_v45 = vsel %vm1763_vm11, %v1766_v63, %v1769_v15  ;;  %v3214_v1 = vadd.s32 4294967294, %v1878_v4  ;;  %v6558_v56 = vld [vmem:[#allocation49_spill] sm:$0xff]  ;;  %v6575_v15 = vld [vmem:[#allocation55_spill] sm:$0xff] }
 0x24a   :  { %v4944_v32 = vadd.s32 %v1066_v10, %v1057_v39  ;;  %v1771_v43 = vsel %vm1760_vm12, nan, %v1770_v45  ;;  %v1036_v46 = vsel %vm1030_vm9, %v1033_v47, %v1035_v18  ;;  %v1079_v6 = vshrl.u32 %v4911_v34, 16 }
 0x24b   :  { %v1088_v33 = vadd.s32 %v1087_v48, %v1077_v29  ;;  %2912 = vmatpush.msra.mxu0 %v1771_v43  ;;  %v1866_v55 = vadd.s32 %v4862_v27, %v4854_v35  ;;  %vm3215_vm14 = vcmp.lt.s32.totalorder %v3214_v1, 0  ;;  %v4951_v41 = vadd.s32 %v1082_v58, %v1078_v23  ;;  %v6562_v23 = vld [vmem:[#allocation67_spill] sm:$0xff]  ;;  %v6563_v58 = vld [vmem:[#allocation61_spill] sm:$0xff]  ;;  %v6567_v29 = vld [vmem:[#allocation42_spill] sm:$0xff] }
 0x24c   :  { %vm1185_vm15 = vcmp.lt.s32.totalorder %v6558_v56, 2  ;;  %v1881_v62 = vsel %vm3215_vm14, 0, %v3214_v1  ;;  %v1896_v30 = vsub.s32 4, %v4913_v59  ;;  %v1090_v20 = vmul.u32 %v6561_v57, %v1036_v46 }
 0x24d   :  { %v1089_v2 = vadd.s32 %v1088_v33, %v1079_v6  ;;  %v1195_v9 = vsel %vm1185_vm15, %v6560_v31, %v6559_v0  ;;  %v1882_v34 = vsub.s32 32, %v1881_v62  ;;  %v1886_v53 = vsub.s32 4294967266, %v1881_v62 }
 0x24e   :  { %vm1092_vm9 = vc.u32 %v4944_v32, %v4951_v41  ;;  %v1883_v35 = vshll.u32 %v4925_v36, %v1881_v62  ;;  %v1199_v3 = vsel %vm1185_vm15, %v6563_v58, %v6562_v23  ;;  %v1225_v10 = vand.u32 65535, %v1195_v9  ;;  %v6569_v62 = vld [vmem:[#allocation41_spill] sm:$0xff] }
 0x24f   :  { %v1093_v27 = vadd.s32 1, %v1089_v2  ;;  %v1884_v22 = vshrl.u32 %v1866_v55, %v1882_v34  ;;  %v1887_v52 = vadd.s32 127, %v1886_v53  ;;  %v1203_v37 = vand.u32 65535, %v1199_v3 }
 0x250   :  { %v1204_v50 = vshrl.u32 %v1199_v3, 16  ;;  %v4970_v8 = vsel %vm2737_vm7, %v4654_v21, 2102212464  ;;  %v1897_v36 = vsel %vm1774_vm5, %v1896_v30, %v4913_v59  ;;  %v1226_v4 = vshrl.u32 %v1195_v9, 16  ;;  %v6568_v59 = vld [vmem:[#allocation43_spill] sm:$0xff] }
 0x251   :  { %v1094_v47 = vsel %vm1092_vm9, %v1093_v27, %v1089_v2  ;;  %v4979_v11 = vsel %vm2734_vm1, %v4634_v13, %v4654_v21  ;;  %v1885_v18 = vor.u32 %v1884_v22, %v1883_v35  ;;  %v1888_v39 = vshll.u32 %v1887_v52, 23 }
 0x252   :  { %v1095_v48 = vadd.s32 %v1094_v47, %v1090_v20  ;;  %v6564_v63 = vand.u32 2147483647, %v6556_v40  ;;  %v1206_v45 = vmul.u32 %v1204_v50, %v6567_v29  ;;  %v1207_v1 = vmul.u32 %v1203_v37, %v6568_v59 }
 0x253   :  { %v1228_v43 = vmul.u32 %v1226_v4, %v6567_v29  ;;  %v1889_v46 = vor.u32 4788187, %v1888_v39  ;;  %v1229_v55 = vmul.u32 %v1225_v10, %v6568_v59  ;;  %v1168_v30 = vshrl.u32 %v6380_v44, %v6569_v62  ;;  %v6572_v62 = vld [vmem:[#allocation7_spill] sm:$0xff] }
 0x254   :  { %vm4983_vm2 = vcmp.le.f32.partialorder %v6564_v63, 0.7853982  ;;  %v1096_v33 = vadd.s32 536870912, %v1095_v48  ;;  %v1205_v2 = vmul.u32 %v1203_v37, %v6567_v29  ;;  %v1209_v0 = vshll.u32 %v1206_v45, 16 }
 0x255   :  { %v1899_v6 = vsel %vm4983_vm2, 0, %v1897_v36  ;;  %v1227_v31 = vmul.u32 %v1225_v10, %v6567_v29  ;;  %v1890_v9 = vand.u32 2147483647, %v1889_v46  ;;  %v1892_v34 = vcvt.s32.f32 %v1885_v18 }
 0x256   :  { %v4997_v53 = vshrl.u32 %v1096_v33, 30  ;;  %v1231_v57 = vshll.u32 %v1228_v43, 16  ;;  %v1208_v20 = vmul.u32 %v1204_v50, %v6568_v59  ;;  %v1211_v35 = vshll.u32 %v1207_v1, 16  ;;  %v6570_v33 = vld [vmem:[#allocation56_spill] sm:$0xff] }
 0x257   :  { %vm1213_vm1 = vc.u32 %v1205_v2, %v1209_v0  ;;  %v1215_v27 = vadd.s32 %v1209_v0, %v1205_v2  ;;  %v1893_v23 = vmul.f32 %v1892_v34, %v1890_v9  ;;  %v1233_v22 = vshll.u32 %v1229_v55, 16 }
 0x258   :  { %v1098_v58 = vshll.u32 %v4997_v53, 30  ;;  %v1214_v3 = vsel %vm1213_vm1, 1, %v6481_v24  ;;  %vm1235_vm10 = vc.u32 %v1227_v31, %v1231_v57  ;;  %v1237_v10 = vadd.s32 %v1231_v57, %v1227_v31 }
 0x259   :  { %v1216_v52 = vadd.s32 %v1214_v3, %v1208_v20  ;;  %vm1217_vm4 = vc.u32 %v1215_v27, %v1211_v35  ;;  %v1894_v37 = vxor.u32 2147483648, %v1893_v23  ;;  %v1230_v50 = vmul.u32 %v1226_v4, %v6568_v59  ;;  %v6573_v20 = vld [vmem:[#allocation54_spill] sm:$0xff] }
 0x25a   :  { %v5002_v36 = vsub.s32 %v1095_v48, %v1098_v58  ;;  %v1218_v47 = vsel %vm1217_vm4, 1, %v6481_v24  ;;  %v1210_v18 = vshrl.u32 %v1206_v45, 16  ;;  %v1236_v63 = vsel %vm1235_vm10, 1, %v6481_v24 }
 0x25b   :  { %v1220_v39 = vadd.s32 %v1218_v47, %v1216_v52  ;;  %vm1239_vm6 = vc.u32 %v1237_v10, %v1233_v22  ;;  %v1895_v29 = vsel %vm1774_vm5, %v1894_v37, %v1893_v23  ;;  %vm6571_vm0 = vcmp.lt.s32.totalorder %v6558_v56, 4 }
 0x25c   :  { %vm1100_vm13 = vcmp.lt.s32.totalorder %v5002_v36, 0  ;;  %v1101_v46 = vsub.s32 0, %v5002_v36  ;;  %v1189_v48 = vsel %vm6571_vm0, %v6570_v33, 2102212464  ;;  %vm999_vm8 = vcmp.lt.s32.totalorder %v6572_v62, 0 }
 0x25d   :  { %v1898_v4 = vsel %vm4983_vm2, %v6556_v40, %v1895_v29  ;;  %v1221_v45 = vadd.s32 %v1220_v39, %v1210_v18  ;;  %v1238_v59 = vadd.s32 %v1236_v63, %v1230_v50  ;;  %v1240_v2 = vsel %vm1239_vm6, 1, %v6481_v24 }
 0x25e   :  { %v1900_v0 = vmul.f32 %v1898_v4, %v1898_v4  ;;  %v1916_v31 = vadd.s32 3, %v1899_v6  ;;  %v1102_v9 = vsel %vm1100_vm13, %v1101_v46, %v5002_v36  ;;  %v1212_v34 = vshrl.u32 %v1207_v1, 16 }
 0x25f   :  { %v1103_v57 = vclz %v1102_v9  ;;  %vm6574_vm3 = vcmp.lt.s32.totalorder %v6558_v56, 1  ;;  %v1232_v27 = vshrl.u32 %v1228_v43, 16  ;;  %v1242_v23 = vadd.s32 %v1240_v2, %v1238_v59 }
 0x260   :  { %v1188_v35 = vsel %vm6574_vm3, %v1168_v30, %v6573_v20  ;;  %v1901_v58 = vmul.f32 -0.001358992, %v1900_v0  ;;  %v1908_v3 = vmul.f32 -0.00019511016, %v1900_v0  ;;  %vm6576_vm5 = vcmp.lt.s32.totalorder %v6558_v56, 3 }
 0x261   :  { %v1190_v52 = vsel %vm6576_vm5, %v6575_v15, %v1189_v48  ;;  %v5026_v37 = vadd.s32 %v1221_v45, %v1212_v34  ;;  %v6577_v6 = vor.u32 %v4711_v17, %v4707_v38  ;;  %v3199_v47 = vadd.s32 4294967294, %v1103_v57 }
 0x262   :  { %v1234_v50 = vshrl.u32 %v1229_v55, 16  ;;  %v1243_v30 = vadd.s32 %v1242_v23, %v1232_v27  ;;  %v1902_v43 = vadd.f32 0.041655596, %v1901_v58  ;;  %v1909_v18 = vadd.f32 0.008332121, %v1908_v3 }
 0x263   :  { %v5033_v1 = vsel %vm2737_vm7, %v6577_v6, 1326507024  ;;  %v1121_v39 = vsub.s32 4, %v4997_v53  ;;  %v5036_v63 = vadd.s32 %v1237_v10, %v1233_v22  ;;  %v1917_v29 = vand.u32 3, %v1916_v31  ;;  %v6578_v31 = vld [vmem:[#allocation38_spill] sm:$0xff] }
 0x264   :  { %vm3200_vm11 = vcmp.lt.s32.totalorder %v3199_v47, 0  ;;  %v1191_v46 = vsel %vm1185_vm15, %v1188_v35, %v1190_v52  ;;  %v1244_v33 = vadd.s32 %v1243_v30, %v1234_v50  ;;  %v1903_v38 = vmul.f32 %v1902_v43, %v1900_v0  ;;  %v6583_v52 = vld [vmem:[#allocation32_spill] sm:$0xff] }
 0x265   :  { %v1910_v17 = vmul.f32 %v1909_v18, %v1900_v0  ;;  %v1106_v48 = vsel %vm3200_vm11, 0, %v3199_v47  ;;  %vm1247_vm12 = vc.u32 %v5026_v37, %v5036_v63  ;;  %v1091_v55 = vadd.s32 %v4951_v41, %v4944_v32  ;;  %v6579_v32 = vld [vmem:[#allocation13_spill] sm:$0xff] }
 0x266   :  { %v1107_v45 = vsub.s32 32, %v1106_v48  ;;  %v1111_v59 = vsub.s32 4294967266, %v1106_v48  ;;  %v1248_v2 = vadd.s32 1, %v1244_v33  ;;  %v1904_v22 = vadd.f32 -0.4999988, %v1903_v38 }
 0x267   :  { %v1911_v10 = vadd.f32 -0.16666654, %v1910_v17  ;;  %v1122_v56 = vsel %vm999_vm8, %v1121_v39, %v4997_v53  ;;  %v1245_v9 = vmul.u32 %v6578_v31, %v1191_v46  ;;  %v1108_v34 = vshll.u32 %v5002_v36, %v1106_v48  ;;  %v6584_v36 = vld [vmem:[#allocation24_spill] sm:$0xff] }
 0x268   :  { %v1109_v57 = vshrl.u32 %v1091_v55, %v1107_v45  ;;  %v1112_v20 = vadd.s32 127, %v1111_v59  ;;  %v1249_v35 = vsel %vm1247_vm12, %v1248_v2, %v1244_v33  ;;  %v1905_v27 = vmul.f32 %v1904_v22, %v1900_v0  ;;  %v6585_v55 = vld [vmem:[#allocation12_spill] sm:$0xff]  ;;  %v6586_v59 = vld [vmem:[#allocation14_spill] sm:$0xff] }
 0x269   :  { %v1912_v23 = vmul.f32 %v1911_v10, %v1900_v0  ;;  %v1250_v58 = vadd.s32 %v1249_v35, %v1245_v9  ;;  %vm410_vm14 = vcmp.lt.s32.totalorder %v6579_v32, 2  ;;  %vm1915_vm15 = vweird.f32 %v6556_v40 }
 0x26a   :  { %v6580_v41 = vand.u32 2147483647, %v6572_v62  ;;  %v1110_v53 = vor.u32 %v1109_v57, %v1108_v34  ;;  %v1113_v15 = vshll.u32 %v1112_v20, 23  ;;  %v424_v6 = vsel %vm410_vm14, %v6584_v36, %v6583_v52  ;;  %v6588_v34 = vld [vmem:[#allocation23_spill] sm:$0xff] }
 0x26b   :  { %v1906_v47 = vadd.f32 1.0, %v1905_v27  ;;  %v1913_v0 = vadd.f32 1.0, %v1912_v23  ;;  %v1251_v50 = vadd.s32 536870912, %v1250_v58  ;;  %v428_v30 = vand.u32 65535, %v424_v6 }
 0x26c   :  { %vm5053_vm9 = vcmp.le.f32.partialorder %v6580_v41, 0.7853982  ;;  %vm2736_vm2 = vcmp.lt.s32.totalorder %v4486_v5, 3  ;;  %vm1918_vm1 = vcmp.lt.s32.totalorder %v1917_v29, 2  ;;  %v1114_v43 = vor.u32 4788187, %v1113_v15 }
 0x26d   :  { %v1124_v18 = vsel %vm5053_vm9, 0, %v1122_v56  ;;  %v429_v39 = vshrl.u32 %v424_v6, 16  ;;  %v1914_v46 = vmul.f32 %v1913_v0, %v1898_v4  ;;  %vm1919_vm4 = vcmp.eq.s32.totalorder %v1917_v29, 0  ;;  %v6587_v56 = vld [vmem:[#allocation29_spill] sm:$0xff] }
 0x26e   :  { %v1923_v33 = vxor.u32 2147483648, %v1906_v47  ;;  %v5064_v38 = vshrl.u32 %v1251_v50, 30  ;;  %v1115_v17 = vand.u32 2147483647, %v1114_v43  ;;  %v1117_v48 = vcvt.s32.f32 %v1110_v53 }
 0x26f   :  { %v431_v45 = vmul.u32 %v429_v39, %v6585_v55  ;;  %v5068_v2 = vmul.u32 %v428_v30, %v6586_v59  ;;  %v1920_v22 = vxor.u32 2147483648, %v1914_v46  ;;  %vm1922_vm10 = vcmp.eq.s32.totalorder %v1917_v29, 2 }
 0x270   :  { %v1141_v10 = vadd.s32 3, %v1124_v18  ;;  %v1253_v31 = vshll.u32 %v5064_v38, 30  ;;  %v1118_v9 = vmul.f32 %v1117_v48, %v1115_v17  ;;  %v420_v4 = vsel %vm410_vm14, %v6588_v34, %v6587_v56  ;;  %v6589_v48 = vld [vmem:[#allocation11_spill] sm:$0xff] }
 0x271   :  { %v430_v57 = vmul.u32 %v428_v30, %v6585_v55  ;;  %v434_v20 = vshll.u32 %v431_v45, 16  ;;  %v1921_v35 = vsel %vm1919_vm4, %v1906_v47, %v1920_v22  ;;  %v1924_v27 = vsel %vm1922_vm10, %v1923_v33, %v1914_v46  ;;  %v6590_v22 = vld [vmem:[#allocation22_spill] sm:$0xff] }
 0x272   :  { %v5076_v23 = vsub.s32 %v1250_v58, %v1253_v31  ;;  %v433_v41 = vmul.u32 %v429_v39, %v6586_v59  ;;  %v1925_v53 = vsel %vm1918_vm1, %v1921_v35, %v1924_v27  ;;  %v1119_v15 = vxor.u32 2147483648, %v1118_v9 }
 0x273   :  { %v436_v52 = vshll.u32 %v5068_v2, 16  ;;  %vm438_vm6 = vc.u32 %v430_v57, %v434_v20  ;;  %v1926_v36 = vsel %vm1915_vm15, nan, %v1925_v53  ;;  %v440_v0 = vadd.s32 %v434_v20, %v430_v57  ;;  %v6592_v20 = vld [vmem:[#allocation20_spill] sm:$0xff] }
 0x274   :  { %vm1255_vm13 = vcmp.lt.s32.totalorder %v5076_v23, 0  ;;  %v1256_v6 = vsub.s32 0, %v5076_v23  ;;  %v439_v47 = vsel %vm438_vm6, 1, %v6481_v24  ;;  %2941 = vmatpush.msra.mxu1 %v1926_v36  ;;  %v1120_v58 = vsel %vm999_vm8, %v1119_v15, %v1118_v9  ;;  %v6594_v36 = vld [vmem:[#allocation21_spill] sm:$0xff] }
 0x275   :  { %v441_v29 = vadd.s32 %v439_v47, %v433_v41  ;;  %v451_v50 = vshrl.u32 %v420_v4, 16  ;;  %v5092_v30 = vsel %vm2736_vm2, %v4736_v28, %v5033_v1  ;;  %v5097_v40 = vsel %vm5053_vm9, %v6572_v62, %v1120_v58 }
 0x276   :  { %v1257_v43 = vsel %vm1255_vm13, %v1256_v6, %v5076_v23  ;;  %v450_v18 = vand.u32 65535, %v420_v4  ;;  %v1125_v39 = vmul.f32 %v5097_v40, %v5097_v40  ;;  %vm442_vm0 = vc.u32 %v440_v0, %v436_v52 }
 0x277   :  { %v1258_v46 = vclz %v1257_v43  ;;  %v453_v33 = vmul.u32 %v451_v50, %v6585_v55  ;;  %v5103_v17 = vand.u32 3, %v1141_v10  ;;  %v393_v1 = vshrl.u32 %v6380_v44, %v6589_v48  ;;  %v6596_v43 = vld [vmem:[#allocation8_spill] sm:$0xff] }
 0x278   :  { %vm6591_vm8 = vcmp.lt.s32.totalorder %v6579_v32, 4  ;;  %v443_v31 = vsel %vm442_vm0, 1, %v6481_v24  ;;  %v1126_v9 = vmul.f32 -0.001358992, %v1125_v39  ;;  %v1133_v56 = vmul.f32 -0.00019511016, %v1125_v39 }
 0x279   :  { %v414_v3 = vsel %vm6591_vm8, %v6590_v22, 2102212464  ;;  %v3202_v34 = vadd.s32 4294967294, %v1258_v46  ;;  %v445_v4 = vadd.s32 %v443_v31, %v441_v29  ;;  %v1246_v57 = vadd.s32 %v5036_v63, %v5026_v37 }
 0x27a   :  { %vm6593_vm3 = vcmp.lt.s32.totalorder %v6579_v32, 1  ;;  %v454_v35 = vmul.u32 %v450_v18, %v6586_v59  ;;  %v456_v27 = vshll.u32 %v453_v33, 16  ;;  %v1127_v41 = vadd.f32 0.041655596, %v1126_v9 }
 0x27b   :  { %v413_v10 = vsel %vm6593_vm3, %v393_v1, %v6592_v20  ;;  %v1134_v53 = vadd.f32 0.008332121, %v1133_v56  ;;  %vm3203_vm5 = vcmp.lt.s32.totalorder %v3202_v34, 0  ;;  %v435_v15 = vshrl.u32 %v431_v45, 16 }
 0x27c   :  { %v1261_v52 = vsel %vm3203_vm5, 0, %v3202_v34  ;;  %vm6595_vm11 = vcmp.lt.s32.totalorder %v6579_v32, 3  ;;  %v452_v47 = vmul.u32 %v450_v18, %v6585_v55  ;;  %v455_v37 = vmul.u32 %v451_v50, %v6586_v59 }
 0x27d   :  { %v415_v6 = vsel %vm6595_vm11, %v6594_v36, %v414_v3  ;;  %v1128_v63 = vmul.f32 %v1127_v41, %v1125_v39  ;;  %v1135_v58 = vmul.f32 %v1134_v53, %v1125_v39  ;;  %v1262_v0 = vsub.s32 32, %v1261_v52 }
 0x27e   :  { %v446_v29 = vadd.s32 %v445_v4, %v435_v15  ;;  %vm1154_vm12 = vcmp.lt.s32.totalorder %v6596_v43, 0  ;;  %v1266_v46 = vsub.s32 4294967266, %v1261_v52  ;;  %v458_v48 = vshll.u32 %v454_v35, 16 }
 0x27f   :  { %vm460_vm15 = vc.u32 %v452_v47, %v456_v27  ;;  %v462_v1 = vadd.s32 %v456_v27, %v452_v47  ;;  %v1129_v45 = vadd.f32 -0.4999988, %v1128_v63  ;;  %v1136_v22 = vadd.f32 -0.16666654, %v1135_v58 }
 0x280   :  { %v1264_v31 = vshrl.u32 %v1246_v57, %v1262_v0  ;;  %v461_v9 = vsel %vm460_vm15, 1, %v6481_v24  ;;  %vm1144_vm9 = vcmp.eq.s32.totalorder %v5103_v17, 0  ;;  %v1263_v55 = vshll.u32 %v5076_v23, %v1261_v52 }
 0x281   :  { %v1267_v59 = vadd.s32 127, %v1266_v46  ;;  %v463_v50 = vadd.s32 %v461_v9, %v455_v37  ;;  %vm464_vm1 = vc.u32 %v462_v1, %v458_v48  ;;  %v1130_v18 = vmul.f32 %v1129_v45, %v1125_v39  ;;  %v6604_v9 = vld [vmem:[#allocation36_spill] sm:$0xff] }
 0x282   :  { %v1137_v3 = vmul.f32 %v1136_v22, %v1125_v39  ;;  %vm1143_vm4 = vcmp.lt.s32.totalorder %v5103_v17, 2  ;;  %v437_v56 = vshrl.u32 %v5068_v2, 16  ;;  %v465_v34 = vsel %vm464_vm1, 1, %v6481_v24  ;;  %v6600_v22 = vld [vmem:[#allocation17_spill] sm:$0xff] }
 0x283   :  { %vm1140_vm10 = vweird.f32 %v6572_v62  ;;  %v6597_v4 = vand.u32 2147483647, %v6596_v43  ;;  %v1265_v23 = vor.u32 %v1264_v31, %v1263_v55  ;;  %v1268_v20 = vshll.u32 %v1267_v59, 23  ;;  %v6605_v55 = vld [vmem:[#allocation35_spill] sm:$0xff] }
 0x284   :  { %v457_v27 = vshrl.u32 %v453_v33, 16  ;;  %v467_v41 = vadd.s32 %v465_v34, %v463_v50  ;;  %vm2735_vm13 = vcmp.lt.s32.totalorder %v4486_v5, 2  ;;  %v1131_v39 = vadd.f32 1.0, %v1130_v18 }
 0x285   :  { %vm5132_vm6 = vcmp.le.f32.partialorder %v6597_v4, 0.7853982  ;;  %v1138_v53 = vadd.f32 1.0, %v1137_v3  ;;  %v1276_v2 = vsub.s32 4, %v5064_v38  ;;  %v5138_v15 = vadd.s32 %v446_v29, %v437_v56 }
 0x286   :  { %vm1147_vm0 = vcmp.eq.s32.totalorder %v5103_v17, 2  ;;  %v1269_v52 = vor.u32 4788187, %v1268_v20  ;;  %v459_v36 = vshrl.u32 %v454_v35, 16  ;;  %v468_v47 = vadd.s32 %v467_v41, %v457_v27  ;;  %v6602_v35 = vld [vmem:[#allocation33_spill] sm:$0xff] }
 0x287   :  { %v1139_v37 = vmul.f32 %v1138_v53, %v5097_v40  ;;  %v1148_v63 = vxor.u32 2147483648, %v1131_v39  ;;  %v416_v33 = vsel %vm410_vm14, %v413_v10, %v415_v6  ;;  %v5144_v58 = vadd.s32 %v462_v1, %v458_v48  ;;  %v6601_v40 = vld [vmem:[#allocation34_spill] sm:$0xff]  ;;  %v6603_v6 = vld [vmem:[#allocation9_spill] sm:$0xff]  ;;  %v6606_v53 = vld [vmem:[#allocation15_spill] sm:$0xff] }
 0x288   :  { %v1270_v0 = vand.u32 2147483647, %v1269_v52  ;;  %v1272_v46 = vcvt.s32.f32 %v1265_v23  ;;  %v469_v45 = vadd.s32 %v468_v47, %v459_v36  ;;  %vm565_vm8 = vcmp.lt.s32.totalorder %v6600_v22, 2  ;;  %v6607_v52 = vld [vmem:[#allocation16_spill] sm:$0xff] }
 0x289   :  { %v1145_v29 = vxor.u32 2147483648, %v1139_v37  ;;  %v1277_v31 = vsel %vm1154_vm12, %v1276_v2, %v5064_v38  ;;  %vm472_vm3 = vc.u32 %v5138_v15, %v5144_v58  ;;  %v575_v32 = vsel %vm565_vm8, %v6602_v35, %v6601_v40 }
 0x28a   :  { %v1273_v10 = vmul.f32 %v1272_v46, %v1270_v0  ;;  %v470_v48 = vmul.u32 %v6603_v6, %v416_v33  ;;  %v473_v1 = vadd.s32 1, %v469_v45  ;;  %v579_v59 = vsel %vm565_vm8, %v6605_v55, %v6604_v9 }
 0x28b   :  { %v1146_v38 = vsel %vm1144_vm9, %v1131_v39, %v1145_v29  ;;  %v1149_v50 = vsel %vm1147_vm0, %v1148_v63, %v1139_v37  ;;  %v583_v18 = vand.u32 65535, %v579_v59  ;;  %v584_v3 = vshrl.u32 %v579_v59, 16 }
 0x28c   :  { %v1150_v56 = vsel %vm1143_vm4, %v1146_v38, %v1149_v50  ;;  %v1274_v34 = vxor.u32 2147483648, %v1273_v10  ;;  %v474_v4 = vsel %vm472_vm3, %v473_v1, %v469_v45  ;;  %v606_v23 = vshrl.u32 %v575_v32, 16 }
 0x28d   :  { %v1151_v20 = vsel %vm1140_vm10, nan, %v1150_v56  ;;  %v1279_v27 = vsel %vm5132_vm6, 0, %v1277_v31  ;;  %v475_v41 = vadd.s32 %v474_v4, %v470_v48  ;;  %v5172_v39 = vmul.u32 %v584_v3, %v6606_v53 }
 0x28e   :  { %v2743_v2 = vsel %vm2737_vm7, %v4736_v28, 920167782  ;;  %v5181_v17 = vsel %vm2735_vm13, %v4979_v11, %v5092_v30  ;;  %2913 = vmatpush.msra.mxu0 %v1151_v20  ;;  %v1275_v62 = vsel %vm1154_vm12, %v1274_v34, %v1273_v10  ;;  %v5186_v36 = vmul.u32 %v583_v18, %v6607_v52  ;;  %v6608_v34 = vld [vmem:[#allocation27_spill] sm:$0xff] }
 0x28f   :  { %v1278_v47 = vsel %vm5132_vm6, %v6596_v43, %v1275_v62  ;;  %v476_v37 = vadd.s32 536870912, %v475_v41  ;;  %v585_v28 = vmul.u32 %v583_v18, %v6606_v53  ;;  %v589_v63 = vshll.u32 %v5172_v39, 16 }
 0x290   :  { %v1280_v33 = vmul.f32 %v1278_v47, %v1278_v47  ;;  %v1296_v0 = vadd.s32 3, %v1279_v27  ;;  %v605_v11 = vand.u32 65535, %v575_v32  ;;  %v5194_v30 = vmul.u32 %v606_v23, %v6606_v53 }
 0x291   :  { %v5196_v46 = vshrl.u32 %v476_v37, 30  ;;  %v591_v45 = vshll.u32 %v5186_v36, 16  ;;  %vm593_vm7 = vc.u32 %v585_v28, %v589_v63  ;;  %v595_v29 = vadd.s32 %v589_v63, %v585_v28 }
 0x292   :  { %v1281_v31 = vmul.f32 -0.001358992, %v1280_v33  ;;  %v1288_v57 = vmul.f32 -0.00019511016, %v1280_v33  ;;  %v588_v40 = vmul.u32 %v584_v3, %v6607_v52  ;;  %v594_v35 = vsel %vm593_vm7, 1, %v6481_v24 }
 0x293   :  { %v5205_v32 = vsel %vm2736_vm2, %v4634_v13, %v4970_v8  ;;  %v5210_v10 = vsel %vm2736_vm2, %v4654_v21, %v2743_v2  ;;  %v478_v6 = vshll.u32 %v5196_v46, 30  ;;  %vm597_vm14 = vc.u32 %v595_v29, %v591_v45 }
 0x294   :  { %v1282_v48 = vadd.f32 0.041655596, %v1281_v31  ;;  %v1289_v1 = vadd.f32 0.008332121, %v1288_v57  ;;  %v596_v9 = vadd.s32 %v594_v35, %v588_v40  ;;  %v611_v55 = vshll.u32 %v5194_v30, 16 }
 0x295   :  { %v2754_v59 = vshrl.u32 %v5181_v17, 16  ;;  %v5215_v38 = vsub.s32 %v475_v41, %v478_v6  ;;  %v598_v13 = vsel %vm597_vm14, 1, %v6481_v24  ;;  %v609_v8 = vmul.u32 %v605_v11, %v6607_v52 }
 0x296   :  { %v1283_v50 = vmul.f32 %v1282_v48, %v1280_v33  ;;  %v1290_v18 = vmul.f32 %v1289_v1, %v1280_v33  ;;  %v1297_v21 = vand.u32 3, %v1296_v0  ;;  %v607_v3 = vmul.u32 %v605_v11, %v6606_v53  ;;  %v6616_v1 = vld [vmem:[#allocation26_spill] sm:$0xff] }
 0x297   :  { %vm480_vm2 = vcmp.lt.s32.totalorder %v5215_v38, 0  ;;  %v481_v56 = vsub.s32 0, %v5215_v38  ;;  %vm6609_vm5 = vcmp.lt.s32.totalorder %v6600_v22, 4  ;;  %v610_v20 = vmul.u32 %v606_v23, %v6607_v52  ;;  %v6613_v52 = vld [vmem:[#allocation19_spill] sm:$0xff] }
 0x298   :  { %v569_v4 = vsel %vm6609_vm5, %v6608_v34, 2102212464  ;;  %v1284_v27 = vadd.f32 -0.4999988, %v1283_v50  ;;  %v1291_v41 = vadd.f32 -0.16666654, %v1290_v18  ;;  %v600_v2 = vadd.s32 %v598_v13, %v596_v9 }
 0x299   :  { %vm615_vm11 = vc.u32 %v607_v3, %v611_v55  ;;  %v482_v62 = vsel %vm480_vm2, %v481_v56, %v5215_v38  ;;  %v613_v37 = vshll.u32 %v609_v8, 16  ;;  %v617_v53 = vadd.s32 %v611_v55, %v607_v3 }
 0x29a   :  { %v616_v28 = vsel %vm615_vm11, 1, %v6481_v24  ;;  %v1285_v63 = vmul.f32 %v1284_v27, %v1280_v33  ;;  %v1292_v0 = vmul.f32 %v1291_v41, %v1280_v33  ;;  %v483_v11 = vclz %v482_v62 }
 0x29b   :  { %v590_v45 = vshrl.u32 %v5172_v39, 16  ;;  %v6610_v29 = vshll.u32 %v4557_v54, 16  ;;  %vm1295_vm15 = vweird.f32 %v6596_v43  ;;  %vm1298_vm9 = vcmp.lt.s32.totalorder %v1297_v21, 2  ;;  %v6614_v39 = vld [vmem:[#allocation25_spill] sm:$0xff] }
 0x29c   :  { %v548_v31 = vshrl.u32 %v6380_v44, %v6613_v52  ;;  %v618_v57 = vadd.s32 %v616_v28, %v610_v20  ;;  %vm619_vm1 = vc.u32 %v617_v53, %v613_v37  ;;  %v1286_v40 = vadd.f32 1.0, %v1285_v63 }
 0x29d   :  { %vm5232_vm12 = vc.u32 %v4540_v42, %v6610_v29  ;;  %v1293_v33 = vadd.f32 1.0, %v1292_v0  ;;  %v3187_v35 = vadd.s32 4294967294, %v483_v11  ;;  %v601_v6 = vadd.s32 %v600_v2, %v590_v45  ;;  %v6618_v45 = vld [vmem:[#allocation5_spill] sm:$0xff] }
 0x29e   :  { %vm6615_vm4 = vcmp.lt.s32.totalorder %v6600_v22, 1  ;;  %vm6617_vm10 = vcmp.lt.s32.totalorder %v6600_v22, 3  ;;  %v592_v55 = vshrl.u32 %v5186_v36, 16  ;;  %v620_v13 = vsel %vm619_vm1, 1, %v6481_v24 }
 0x29f   :  { %v568_v48 = vsel %vm6615_vm4, %v548_v31, %v6614_v39  ;;  %v570_v9 = vsel %vm6617_vm10, %v6616_v1, %v569_v4  ;;  %v1294_v50 = vmul.f32 %v1293_v33, %v1278_v47  ;;  %v1303_v18 = vxor.u32 2147483648, %v1286_v40  ;;  %v6619_v31 = vld [vmem:[#allocation10_spill] sm:$0xff] }
 0x2a0   :  { %vm3188_vm6 = vcmp.lt.s32.totalorder %v3187_v35, 0  ;;  %v622_v3 = vadd.s32 %v620_v13, %v618_v57  ;;  %vm1299_vm0 = vcmp.eq.s32.totalorder %v1297_v21, 0  ;;  %vm1302_vm3 = vcmp.eq.s32.totalorder %v1297_v21, 2  ;;  %v6620_v39 = vld [vmem:[#allocation6_spill] sm:$0xff] }
 0x2a1   :  { %v486_v56 = vsel %vm3188_vm6, 0, %v3187_v35  ;;  %v612_v34 = vshrl.u32 %v5194_v30, 16  ;;  %v1300_v20 = vxor.u32 2147483648, %v1294_v50  ;;  %v471_v27 = vadd.s32 %v5144_v58, %v5138_v15 }
 0x2a2   :  { %v487_v41 = vsub.s32 32, %v486_v56  ;;  %v5250_v2 = vadd.s32 %v601_v6, %v592_v55  ;;  %v491_v4 = vsub.s32 4294967266, %v486_v56  ;;  %v571_v36 = vsel %vm565_vm8, %v568_v48, %v570_v9 }
 0x2a3   :  { %v614_v47 = vshrl.u32 %v609_v8, 16  ;;  %v623_v62 = vadd.s32 %v622_v3, %v612_v34  ;;  %v1301_v28 = vsel %vm1299_vm0, %v1286_v40, %v1300_v20  ;;  %v1304_v63 = vsel %vm1302_vm3, %v1303_v18, %v1294_v50 }
 0x2a4   :  { %v489_v0 = vshrl.u32 %v471_v27, %v487_v41  ;;  %v5254_v11 = vadd.s32 %v617_v53, %v613_v37  ;;  %vm379_vm7 = vcmp.lt.s32.totalorder %v6618_v45, 0  ;;  %v1305_v30 = vsel %vm1298_vm9, %v1301_v28, %v1304_v63 }
 0x2a5   :  { %v488_v15 = vshll.u32 %v5215_v38, %v486_v56  ;;  %v492_v58 = vadd.s32 127, %v491_v4  ;;  %v624_v29 = vadd.s32 %v623_v62, %v614_v47  ;;  %v2745_v22 = vsel %vm2735_vm13, %v4902_v12, %v5210_v10 }
 0x2a6   :  { %v2753_v8 = vand.u32 65535, %v5181_v17  ;;  %v1306_v52 = vsel %vm1295_vm15, nan, %v1305_v30  ;;  %vm627_vm8 = vc.u32 %v5250_v2, %v5254_v11  ;;  %v5271_v21 = vmul.u32 %v2754_v59, %v4489_v16 }
 0x2a7   :  { %2942 = vmatpush.msra.mxu1 %v1306_v52  ;;  %v490_v38 = vor.u32 %v489_v0, %v488_v15  ;;  %v493_v37 = vshll.u32 %v492_v58, 23  ;;  %v628_v53 = vadd.s32 1, %v624_v29  ;;  %v2609_v12 = vsel %vm5232_vm12, 1, %v6481_v24  ;;  %v6625_v0 = vld [vmem:[#allocation141_spill] sm:$0xff]  ;;  %v6626_v15 = vld [vmem:[#allocation139_spill] sm:$0xff] }
 0x2a8   :  { %v5280_v43 = vsel %vm2735_vm13, %v4890_v49, %v5205_v32  ;;  %v2752_v10 = vshrl.u32 %v4460_v26, 16  ;;  %v625_v57 = vmul.u32 %v6619_v31, %v571_v36  ;;  %v2775_v40 = vand.u32 65535, %v2745_v22 }
 0x2a9   :  { %v2776_v33 = vshrl.u32 %v2745_v22, 16  ;;  %v494_v35 = vor.u32 4788187, %v493_v37  ;;  %v629_v6 = vsel %vm627_vm8, %v628_v53, %v624_v29  ;;  %vm534_vm14 = vcmp.lt.s32.totalorder %v6620_v39, 0  ;;  %v6627_v29 = vld [vmem:[#allocation151_spill] sm:$0xff]  ;;  %v6628_v22 = vld [vmem:[#allocation150_spill] sm:$0xff] }
 0x2aa   :  { %v2606_v48 = vshll.u32 %v4561_v60, 16  ;;  %v6621_v23 = vshll.u32 %v4557_v54, 16  ;;  %v501_v5 = vsub.s32 4, %v5196_v46  ;;  %v630_v49 = vadd.s32 %v629_v6, %v625_v57  ;;  %v6632_v57 = vld [vmem:[#allocation146_spill] sm:$0xff] }
 0x2ab   :  { %v5292_v32 = vmul.u32 %v2753_v8, %v2752_v10  ;;  %v2759_v9 = vshll.u32 %v5271_v21, 16  ;;  %v495_v55 = vand.u32 2147483647, %v494_v35  ;;  %v497_v13 = vcvt.s32.f32 %v490_v38 }
 0x2ac   :  { %v5289_v1 = vadd.s32 %v6621_v23, %v4540_v42  ;;  %v5296_v50 = vadd.s32 %v2609_v12, %v4573_v19  ;;  %v2755_v18 = vmul.u32 %v2753_v8, %v4489_v16  ;;  %v2795_v3 = vmul.u32 %v4460_v26, %v5280_v43 }
 0x2ad   :  { %v631_v56 = vadd.s32 536870912, %v630_v49  ;;  %v2758_v42 = vmul.u32 %v2754_v59, %v2752_v10  ;;  %v5304_v34 = vmul.u32 %v2775_v40, %v4489_v16  ;;  %v5307_v20 = vmul.u32 %v2776_v33, %v4489_v16 }
 0x2ae   :  { %v498_v27 = vmul.f32 %v497_v13, %v495_v55  ;;  %v5309_v41 = vmul.u32 %v2775_v40, %v2752_v10  ;;  %v5311_v19 = vmul.u32 %v2776_v33, %v2752_v10  ;;  %v502_v4 = vsel %vm379_vm7, %v501_v5, %v5196_v46  ;;  %v6636_v13 = vld [vmem:[#allocation142_spill] sm:$0xff] }
 0x2af   :  { %v632_v36 = vshrl.u32 %v631_v56, 30  ;;  %v2761_v47 = vshll.u32 %v5292_v32, 16  ;;  %vm2763_vm13 = vc.u32 %v2755_v18, %v2759_v9  ;;  %v5317_v17 = vadd.s32 %v2759_v9, %v2755_v18  ;;  %v6634_v9 = vld [vmem:[#allocation144_spill] sm:$0xff] }
 0x2b0   :  { %v499_v59 = vxor.u32 2147483648, %v498_v27  ;;  %v6622_v62 = vand.u32 2147483647, %v6618_v45  ;;  %vm1960_vm5 = vcmp.lt.s32.totalorder %v6625_v0, 2  ;;  %v1943_v58 = vshrl.u32 %v6380_v44, %v6626_v15 }
 0x2b1   :  { %v633_v28 = vshll.u32 %v632_v36, 30  ;;  %v656_v63 = vsub.s32 4, %v632_v36  ;;  %v1974_v8 = vsel %vm1960_vm5, %v6628_v22, %v6627_v29  ;;  %v2764_v52 = vsel %vm2763_vm13, 1, %v6481_v24  ;;  %v6641_v22 = vld [vmem:[#allocation143_spill] sm:$0xff] }
 0x2b2   :  { %vm5321_vm2 = vcmp.le.f32.partialorder %v6622_v62, 0.7853982  ;;  %v500_v46 = vsel %vm379_vm7, %v499_v59, %v498_v27  ;;  %v6629_v37 = vand.u32 2147483647, %v6620_v39  ;;  %vm6633_vm12 = vcmp.lt.s32.totalorder %v6625_v0, 4  ;;  %v6639_v59 = vld [vmem:[#allocation149_spill] sm:$0xff] }
 0x2b3   :  { %v504_v30 = vsel %vm5321_vm2, 0, %v502_v4  ;;  %v5340_v38 = vsel %vm5321_vm2, %v6618_v45, %v500_v46  ;;  %v5348_v12 = vsub.s32 %v630_v49, %v633_v28  ;;  %v657_v31 = vsel %vm534_vm14, %v656_v63, %v632_v36  ;;  %v6637_v4 = vld [vmem:[#allocation145_spill] sm:$0xff]  ;;  %v6640_v62 = vld [vmem:[#allocation148_spill] sm:$0xff] }
 0x2b4   :  { %vm5344_vm11 = vcmp.le.f32.partialorder %v6629_v37, 0.7853982  ;;  %v505_v10 = vmul.f32 %v5340_v38, %v5340_v38  ;;  %v1964_v40 = vsel %vm6633_vm12, %v6632_v57, 2102212464  ;;  %v1979_v33 = vshrl.u32 %v1974_v8, 16 }
 0x2b5   :  { %v521_v35 = vadd.s32 3, %v504_v30  ;;  %vm635_vm15 = vcmp.lt.s32.totalorder %v5348_v12, 0  ;;  %v636_v6 = vsub.s32 0, %v5348_v12  ;;  %v1978_v23 = vand.u32 65535, %v1974_v8 }
 0x2b6   :  { %v506_v5 = vmul.f32 -0.001358992, %v505_v10  ;;  %v513_v49 = vmul.f32 -0.00019511016, %v505_v10  ;;  %vm6635_vm9 = vcmp.lt.s32.totalorder %v6625_v0, 1  ;;  %v5363_v18 = vmul.u32 %v1979_v33, %v6636_v13 }
 0x2b7   :  { %v1963_v55 = vsel %vm6635_vm9, %v1943_v58, %v6634_v9  ;;  %v637_v56 = vsel %vm635_vm15, %v636_v6, %v5348_v12  ;;  %v659_v27 = vsel %vm5344_vm11, 0, %v657_v31  ;;  %vm6638_vm1 = vcmp.lt.s32.totalorder %v6625_v0, 3 }
 0x2b8   :  { %v1965_v36 = vsel %vm6638_vm1, %v6637_v4, %v1964_v40  ;;  %v5375_v16 = vsel %vm1960_vm5, %v6640_v62, %v6639_v59  ;;  %v507_v28 = vadd.f32 0.041655596, %v506_v5  ;;  %v514_v63 = vadd.f32 0.008332121, %v513_v49 }
 0x2b9   :  { %v638_v46 = vclz %v637_v56  ;;  %v1984_v30 = vshll.u32 %v5363_v18, 16  ;;  %v5378_v15 = vadd.s32 %v2764_v52, %v2758_v42  ;;  %v522_v58 = vand.u32 3, %v521_v35 }
 0x2ba   :  { %v1980_v29 = vmul.u32 %v1978_v23, %v6636_v13  ;;  %v5382_v8 = vmul.u32 %v1978_v23, %v6641_v22  ;;  %v508_v37 = vmul.f32 %v507_v28, %v505_v10  ;;  %v515_v31 = vmul.f32 %v514_v63, %v505_v10 }
 0x2bb   :  { %v626_v57 = vadd.s32 %v5254_v11, %v5250_v2  ;;  %v3190_v40 = vadd.s32 4294967294, %v638_v46  ;;  %v5386_v6 = vadd.s32 3, %v659_v27  ;;  %v5390_v5 = vsel %vm1960_vm5, %v1963_v55, %v1965_v36 }
 0x2bc   :  { %vm5392_vm4 = vc.u32 %v1980_v29, %v1984_v30  ;;  %v2000_v52 = vand.u32 65535, %v5375_v16  ;;  %v509_v35 = vadd.f32 -0.4999988, %v508_v37  ;;  %v516_v23 = vadd.f32 -0.16666654, %v515_v31 }
 0x2bd   :  { %vm3191_vm10 = vcmp.lt.s32.totalorder %v3190_v40, 0  ;;  %v1983_v49 = vmul.u32 %v1979_v33, %v6641_v22  ;;  %vm524_vm6 = vcmp.eq.s32.totalorder %v522_v58, 0  ;;  %vm527_vm0 = vcmp.eq.s32.totalorder %v522_v58, 2 }
 0x2be   :  { %v641_v2 = vsel %vm3191_vm10, 0, %v3190_v40  ;;  %v1985_v11 = vshrl.u32 %v5363_v18, 16  ;;  %v1986_v0 = vshll.u32 %v5382_v8, 16  ;;  %v2001_v9 = vshrl.u32 %v5375_v16, 16 }
 0x2bf   :  { %v510_v55 = vmul.f32 %v509_v35, %v505_v10  ;;  %v517_v56 = vmul.f32 %v516_v23, %v505_v10  ;;  %vm523_vm3 = vcmp.lt.s32.totalorder %v522_v58, 2  ;;  %v642_v27 = vsub.s32 32, %v641_v2 }
 0x2c0   :  { %v1989_v4 = vsel %vm5392_vm4, 1, %v6481_v24  ;;  %vm520_vm7 = vweird.f32 %v6618_v45  ;;  %v646_v33 = vsub.s32 4294967266, %v641_v2  ;;  %v2626_v36 = vshll.u32 %v4605_v51, 16 }
 0x2c1   :  { %v1990_v59 = vadd.s32 %v1984_v30, %v1980_v29  ;;  %v5409_v62 = vmul.u32 %v2000_v52, %v6636_v13  ;;  %v511_v28 = vadd.f32 1.0, %v510_v55  ;;  %v518_v63 = vadd.f32 1.0, %v517_v56 }
 0x2c2   :  { %v643_v10 = vshll.u32 %v5348_v12, %v641_v2  ;;  %v644_v46 = vshrl.u32 %v626_v57, %v642_v27  ;;  %v647_v37 = vadd.s32 127, %v646_v33  ;;  %v2628_v31 = vshll.u32 %v4619_v14, 16 }
 0x2c3   :  { %vm2630_vm8 = vc.u32 %v4595_v25, %v2626_v36  ;;  %v5414_v40 = vadd.s32 %v1989_v4, %v1983_v49  ;;  %v519_v42 = vmul.f32 %v518_v63, %v5340_v38  ;;  %v528_v30 = vxor.u32 2147483648, %v511_v28 }
 0x2c4   :  { %v645_v29 = vor.u32 %v644_v46, %v643_v10  ;;  %v2631_v35 = vsel %vm2630_vm8, 1, %v6481_v24  ;;  %v648_v23 = vshll.u32 %v647_v37, 23  ;;  %vm2612_vm13 = vc.u32 %v5289_v1, %v2606_v48 }
 0x2c5   :  { %v2632_v12 = vadd.s32 %v2626_v36, %v4595_v25  ;;  %v2633_v57 = vadd.s32 %v2631_v35, %v4630_v61  ;;  %v525_v2 = vxor.u32 2147483648, %v519_v42  ;;  %v2605_v55 = vshrl.u32 %v4557_v54, 16 }
 0x2c6   :  { %v2607_v49 = vshrl.u32 %v4561_v60, 16  ;;  %v2613_v38 = vsel %vm2612_vm13, 1, %v6481_v24  ;;  %v649_v56 = vor.u32 4788187, %v648_v23  ;;  %v2627_v4 = vshrl.u32 %v4605_v51, 16  ;;  %v5435_v60 = vld [vmem:[%s6131_s3 + $0x20] sm:$0xff] }
 0x2c7   :  { %v2615_v27 = vadd.s32 %v2613_v38, %v5296_v50  ;;  %vm2634_vm2 = vc.u32 %v2632_v12, %v2628_v31  ;;  %v526_v33 = vsel %vm524_vm6, %v511_v28, %v525_v2  ;;  %v529_v48 = vsel %vm527_vm0, %v528_v30, %v519_v42 }
 0x2c8   :  { %v652_v25 = vcvt.s32.f32 %v645_v29  ;;  %v2635_v61 = vsel %vm2634_vm2, 1, %v6481_v24  ;;  %v530_v1 = vsel %vm523_vm3, %v526_v33, %v529_v48  ;;  %v650_v54 = vand.u32 2147483647, %v649_v56 }
 0x2c9   :  { %v2616_v36 = vadd.s32 %v2615_v27, %v2605_v55  ;;  %v2637_v50 = vadd.s32 %v2635_v61, %v2633_v57  ;;  %v531_v51 = vsel %vm520_vm7, nan, %v530_v1  ;;  %v2629_v28 = vshrl.u32 %v4619_v14, 16 }
 0x2ca   :  { %vm2767_vm5 = vc.u32 %v5317_v17, %v2761_v47  ;;  %v2781_v58 = vshll.u32 %v5307_v20, 16  ;;  %2914 = vmatpush.msra.mxu0 %v531_v51  ;;  %v653_v63 = vmul.f32 %v652_v25, %v650_v54  ;;  %vm6644_vm12 = vcmask 261120  }
 0x2cb   :  { %v5444_v10 = vadd.s32 %v2616_v36, %v2607_v49  ;;  %v2638_v46 = vadd.s32 %v2637_v50, %v2627_v4  ;;  %v2768_v37 = vsel %vm2767_vm5, 1, %v6481_v24  ;;  %3242 = vmatmul.msk.f32.vlgmr.msra.gmra.mxu0 %vm6644_vm12, %v5435_v60  ;;  %v5449_v45 = vadd.s32 %v2632_v12, %v2628_v31 }
 0x2cc   :  { %v2760_v14 = vshrl.u32 %v5271_v21, 16  ;;  %v2770_v42 = vadd.s32 %v2768_v37, %v5378_v15  ;;  %vm2785_vm15 = vc.u32 %v5304_v34, %v2781_v58  ;;  %v654_v47 = vxor.u32 2147483648, %v653_v63 }
 0x2cd   :  { %v2639_v17 = vadd.s32 %v2638_v46, %v2629_v28  ;;  %v2783_v30 = vshll.u32 %v5309_v41, 16  ;;  %vm1992_vm9 = vc.u32 %v1990_v59, %v1986_v0  ;;  %vm2642_vm1 = vc.u32 %v5444_v10, %v5449_v45 }
 0x2ce   :  { %v2771_v29 = vadd.s32 %v2770_v42, %v2760_v14  ;;  %v2786_v35 = vsel %vm2785_vm15, 1, %v6481_v24  ;;  %v2787_v31 = vadd.s32 %v2781_v58, %v5304_v34  ;;  %v655_v21 = vsel %vm534_vm14, %v654_v47, %v653_v63 }
 0x2cf   :  { %v2643_v23 = vadd.s32 1, %v2639_v17  ;;  %v2762_v15 = vshrl.u32 %v5292_v32, 16  ;;  %v2788_v12 = vadd.s32 %v2786_v35, %v5311_v19  ;;  %v5466_v0 = vsel %vm5344_vm11, %v6620_v39, %v655_v21  ;;  %v6645_v19 = vld [vmem:[#allocation159_spill] sm:$0xff] }
 0x2d0   :  { %vm2789_vm4 = vc.u32 %v2787_v31, %v2783_v30  ;;  %v1993_v59 = vsel %vm1992_vm9, 1, %v6481_v24  ;;  %v2003_v34 = vmul.u32 %v2001_v9, %v6636_v13  ;;  %v660_v57 = vmul.f32 %v5466_v0, %v5466_v0 }
 0x2d1   :  { %v2644_v2 = vsel %vm2642_vm1, %v2643_v23, %v2639_v17  ;;  %v5474_v55 = vadd.s32 %v2771_v29, %v2762_v15  ;;  %v2790_v32 = vsel %vm2789_vm4, 1, %v6481_v24  ;;  %v6646_v53 = vmul.u32 %v4388_v7, %v6645_v19  ;;  %v6647_v7 = vld [vmem:[#allocation136_spill] sm:$0xff] }
 0x2d2   :  { %v2782_v38 = vshrl.u32 %v5307_v20, 16  ;;  %v2784_v56 = vshrl.u32 %v5309_v41, 16  ;;  %v2792_v27 = vadd.s32 %v2790_v32, %v2788_v12  ;;  %v661_v4 = vmul.f32 -0.001358992, %v660_v57 }
 0x2d3   :  { %v2645_v49 = vadd.s32 %v2644_v2, %v6646_v53  ;;  %v668_v33 = vmul.f32 -0.00019511016, %v660_v57  ;;  %v5482_v13 = vadd.s32 %v2787_v31, %v2783_v30  ;;  %v2004_v48 = vmul.u32 %v2000_v52, %v6641_v22 }
 0x2d4   :  { %v2793_v61 = vadd.s32 %v2792_v27, %v2782_v38  ;;  %v1995_v1 = vadd.s32 %v1993_v59, %v5414_v40  ;;  %v2006_v54 = vshll.u32 %v2003_v34, 16  ;;  %vm2549_vm14 = vcmp.lt.s32.totalorder %v6647_v7, 0  ;;  %v6652_v38 = vld [vmem:[#allocation138_spill] sm:$0xff] }
 0x2d5   :  { %v2646_v25 = vadd.s32 536870912, %v2645_v49  ;;  %v662_v36 = vadd.f32 0.041655596, %v661_v4  ;;  %v669_v20 = vadd.f32 0.008332121, %v668_v33  ;;  %vm2797_vm11 = vc.u32 %v5474_v55, %v5482_v13 }
 0x2d6   :  { %v2005_v41 = vmul.u32 %v2001_v9, %v6641_v22  ;;  %v2794_v51 = vadd.s32 %v2793_v61, %v2784_v56  ;;  %v2008_v28 = vshll.u32 %v2004_v48, 16  ;;  %vm2010_vm10 = vc.u32 %v5409_v62, %v2006_v54 }
 0x2d7   :  { %v2647_v50 = vshrl.u32 %v2646_v25, 30  ;;  %v663_v52 = vmul.f32 %v662_v36, %v660_v57  ;;  %v670_v58 = vmul.f32 %v669_v20, %v660_v57  ;;  %v2011_v40 = vsel %vm2010_vm10, 1, %v6481_v24 }
 0x2d8   :  { %v2012_v63 = vadd.s32 %v2006_v54, %v5409_v62  ;;  %v677_v46 = vand.u32 3, %v5386_v6  ;;  %v2798_v14 = vadd.s32 1, %v2794_v51  ;;  %v2013_v42 = vadd.s32 %v2011_v40, %v2005_v41  ;;  %v6654_v40 = vld [vmem:[#allocation160_spill] sm:$0xff] }
 0x2d9   :  { %v2648_v37 = vshll.u32 %v2647_v50, 30  ;;  %v664_v47 = vadd.f32 -0.4999988, %v663_v52  ;;  %v671_v17 = vadd.f32 -0.16666654, %v670_v58  ;;  %v1996_v9 = vadd.s32 %v1995_v1, %v1985_v11 }
 0x2da   :  { %v6648_v16 = vand.u32 2147483647, %v6647_v7  ;;  %vm2014_vm0 = vc.u32 %v2012_v63, %v2008_v28  ;;  %v2671_v62 = vsub.s32 4, %v2647_v50  ;;  %v2799_v6 = vsel %vm2797_vm11, %v2798_v14, %v2794_v51  ;;  %v6656_v14 = vld [vmem:[#allocation158_spill] sm:$0xff] }
 0x2db   :  { %v5506_v30 = vsub.s32 %v2645_v49, %v2648_v37  ;;  %v2015_v29 = vsel %vm2014_vm0, 1, %v6481_v24  ;;  %v665_v35 = vmul.f32 %v664_v47, %v660_v57  ;;  %v672_v31 = vmul.f32 %v671_v17, %v660_v57  ;;  %v6651_v57 = vld [vmem:[#allocation153_spill] sm:$0xff] }
 0x2dc   :  { %vm5500_vm6 = vcmp.le.f32.partialorder %v6648_v16, 0.7853982  ;;  %v2800_v21 = vadd.s32 %v2799_v6, %v2795_v3  ;;  %v1987_v23 = vshrl.u32 %v5382_v8, 16  ;;  %vm675_vm3 = vweird.f32 %v6620_v39  ;;  %v6659_v16 = vld [vmem:[#allocation161_spill] sm:$0xff] }
 0x2dd   :  { %vm2650_vm7 = vcmp.lt.s32.totalorder %v5506_v30, 0  ;;  %v2651_v18 = vsub.s32 0, %v5506_v30  ;;  %v2007_v11 = vshrl.u32 %v2003_v34, 16  ;;  %v2017_v15 = vadd.s32 %v2015_v29, %v2013_v42  ;;  %v6657_v42 = vld [vmem:[#allocation157_spill] sm:$0xff] }
 0x2de   :  { %v666_v12 = vadd.f32 1.0, %v665_v35  ;;  %v673_v59 = vadd.f32 1.0, %v672_v31  ;;  %v2801_v2 = vadd.s32 536870912, %v2800_v21  ;;  %v5519_v32 = vadd.s32 %v1996_v9, %v1987_v23 }
 0x2df   :  { %vm2114_vm8 = vcmp.lt.s32.totalorder %v6651_v57, 1  ;;  %v2652_v26 = vsel %vm2650_vm7, %v2651_v18, %v5506_v30  ;;  %v2672_v43 = vsel %vm2549_vm14, %v2671_v62, %v2647_v50  ;;  %v2009_v3 = vshrl.u32 %v2004_v48, 16  ;;  %v6653_v50 = vld [vmem:[#allocation140_spill] sm:$0xff] }
 0x2e0   :  { %v2018_v8 = vadd.s32 %v2017_v15, %v2007_v11  ;;  %vm2116_vm13 = vcmp.lt.s32.totalorder %v6651_v57, 3  ;;  %v674_v19 = vmul.f32 %v673_v59, %v5466_v0  ;;  %v683_v34 = vxor.u32 2147483648, %v666_v12 }
 0x2e1   :  { %v2653_v53 = vclz %v2652_v26  ;;  %v2802_v49 = vshrl.u32 %v2801_v2, 30  ;;  %vm2704_vm2 = vcmp.lt.s32.totalorder %v6652_v38, 0  ;;  %vm678_vm5 = vcmp.lt.s32.totalorder %v677_v46, 2 }
 0x2e2   :  { %vm679_vm12 = vcmp.eq.s32.totalorder %v677_v46, 0  ;;  %v2016_v56 = vadd.s32 %v2012_v63, %v2008_v28  ;;  %v2019_v27 = vadd.s32 %v2018_v8, %v2009_v3  ;;  %v680_v4 = vxor.u32 2147483648, %v674_v19 }
 0x2e3   :  { %vm682_vm15 = vcmp.eq.s32.totalorder %v677_v46, 2  ;;  %v3229_v33 = vadd.s32 4294967294, %v2653_v53  ;;  %v2803_v25 = vshll.u32 %v2802_v49, 30  ;;  %v2641_v48 = vadd.s32 %v5449_v45, %v5444_v10 }
 0x2e4   :  { %v2674_v61 = vsel %vm5500_vm6, 0, %v2672_v43  ;;  %vm2022_vm9 = vc.u32 %v5519_v32, %v2016_v56  ;;  %v2023_v0 = vadd.s32 1, %v2019_v27  ;;  %v681_v1 = vsel %vm679_vm12, %v666_v12, %v680_v4 }
 0x2e5   :  { %v684_v54 = vsel %vm682_vm15, %v683_v34, %v674_v19  ;;  %vm3230_vm1 = vcmp.lt.s32.totalorder %v3229_v33, 0  ;;  %v5533_v36 = vsub.s32 %v2800_v21, %v2803_v25  ;;  %v2020_v51 = vmul.u32 %v6653_v50, %v5390_v5  ;;  %v6664_v34 = vld [vmem:[#allocation125_spill] sm:$0xff]  ;;  %v6665_v25 = vld [vmem:[#allocation155_spill] sm:$0xff] }
 0x2e6   :  { %v685_v20 = vsel %vm678_vm5, %v681_v1, %v684_v54  ;;  %v2656_v41 = vsel %vm3230_vm1, 0, %v3229_v33  ;;  %v2024_v28 = vsel %vm2022_vm9, %v2023_v0, %v2019_v27  ;;  %v2826_v58 = vsub.s32 4, %v2802_v49 }
 0x2e7   :  { %v686_v10 = vsel %vm675_vm3, nan, %v685_v20  ;;  %v2657_v45 = vsub.s32 32, %v2656_v41  ;;  %v2661_v52 = vsub.s32 4294967266, %v2656_v41  ;;  %vm6655_vm4 = vcmp.lt.s32.totalorder %v6651_v57, 4 }
 0x2e8   :  { %v2123_v63 = vsel %vm6655_vm4, %v6654_v40, 920167782  ;;  %2943 = vmatpush.msra.mxu1 %v686_v10  ;;  %vm2805_vm11 = vcmp.lt.s32.totalorder %v5533_v36, 0  ;;  %v2806_v46 = vsub.s32 0, %v5533_v36  ;;  %v2025_v37 = vadd.s32 %v2024_v28, %v2020_v51 }
 0x2e9   :  { %v2126_v5 = vsel %vm2114_vm8, %v6657_v42, %v6656_v14  ;;  %vm6658_vm10 = vcmask 261120   ;;  %v2658_v39 = vshll.u32 %v5506_v30, %v2656_v41  ;;  %v2659_v47 = vshrl.u32 %v2641_v48, %v2657_v45 }
 0x2ea   :  { %3246 = vmatmul.msk.f32.vlgmr.msra.gmra.mxu1 %vm6658_vm10, %v5435_v60  ;;  %v2662_v17 = vadd.s32 127, %v2661_v52  ;;  %v2128_v9 = vsel %vm2116_vm13, %v6654_v40, %v6659_v16  ;;  %v2691_v62 = vadd.s32 3, %v2674_v61  ;;  %v2807_v6 = vsel %vm2805_vm11, %v2806_v46, %v5533_v36  ;;  %v6660_v60 = vld [vmem:[#allocation156_spill] sm:$0xff] }
 0x2eb   :  { %v2026_v29 = vadd.s32 536870912, %v2025_v37  ;;  %v2660_v35 = vor.u32 %v2659_v47, %v2658_v39  ;;  %v2808_v21 = vclz %v2807_v6  ;;  %v2827_v23 = vsel %vm2704_vm2, %v2826_v58, %v2802_v49  ;;  %v6666_v52 = vld [vmem:[#allocation152_spill] sm:$0xff]  ;;  %v6668_v39 = vld [vmem:[#allocation154_spill] sm:$0xff] }
 0x2ec   :  { %v2663_v31 = vshll.u32 %v2662_v17, 23  ;;  %v2122_v30 = vsel %vm2114_vm8, %v6660_v60, %v6657_v42  ;;  %v2124_v18 = vsel %vm2116_vm13, %v6656_v14, %v2123_v63  ;;  %vm2115_vm0 = vcmp.lt.s32.totalorder %v6651_v57, 2 }
 0x2ed   :  { %v2027_v11 = vshrl.u32 %v2026_v29, 30  ;;  %v6661_v12 = vand.u32 2147483647, %v6652_v38  ;;  %v3232_v2 = vadd.s32 4294967294, %v2808_v21  ;;  %v5575_v26 = vsel %vm2115_vm0, %v2126_v5, %v2128_v9 }
 0x2ee   :  { %v2664_v15 = vor.u32 4788187, %v2663_v31  ;;  %v5577_v43 = vand.u32 3, %v2691_v62  ;;  %v2796_v3 = vadd.s32 %v5482_v13, %v5474_v55  ;;  %vm1929_vm7 = vcmp.lt.s32.totalorder %v6664_v34, 0 }
 0x2ef   :  { %vm5569_vm3 = vcmp.le.f32.partialorder %v6661_v12, 0.7853982  ;;  %v2028_v19 = vshll.u32 %v2027_v11, 30  ;;  %v2667_v49 = vcvt.s32.f32 %v2660_v35  ;;  %vm3233_vm5 = vcmp.lt.s32.totalorder %v3232_v2, 0 }
 0x2f0   :  { %v2829_v8 = vsel %vm5569_vm3, 0, %v2827_v23  ;;  %v2665_v53 = vand.u32 2147483647, %v2664_v15  ;;  %v2021_v27 = vadd.s32 %v2016_v56, %v5519_v32  ;;  %v2811_v4 = vsel %vm3233_vm5, 0, %v3232_v2 }
 0x2f1   :  { %v5585_v33 = vsub.s32 %v2025_v37, %v2028_v19  ;;  %v2098_v48 = vshrl.u32 %v6380_v44, %v6665_v25  ;;  %v2134_v61 = vshrl.u32 %v5575_v26, 16  ;;  %v2812_v13 = vsub.s32 32, %v2811_v4 }
 0x2f2   :  { %v2668_v55 = vmul.f32 %v2667_v49, %v2665_v53  ;;  %v2816_v0 = vsub.s32 4294967266, %v2811_v4  ;;  %v2846_v1 = vadd.s32 3, %v2829_v8  ;;  %v2133_v56 = vand.u32 65535, %v5575_v26 }
 0x2f3   :  { %vm2030_vm12 = vcmp.lt.s32.totalorder %v5585_v33, 0  ;;  %v2031_v54 = vsub.s32 0, %v5585_v33  ;;  %v5595_v32 = vsel %vm2114_vm8, %v2098_v48, %v6660_v60  ;;  %v2813_v41 = vshll.u32 %v5533_v36, %v2811_v4  ;;  %vm6667_vm8 = vmmov %vm6655_vm4 }
 0x2f4   :  { %v2669_v20 = vxor.u32 2147483648, %v2668_v55  ;;  %v2814_v50 = vshrl.u32 %v2796_v3, %v2812_v13  ;;  %v2817_v51 = vadd.s32 127, %v2816_v0  ;;  %v2051_v10 = vsub.s32 4, %v2027_v11 }
 0x2f5   :  { %v2032_v28 = vsel %vm2030_vm12, %v2031_v54, %v5585_v33  ;;  %v5602_v45 = vsel %vm2115_vm0, %v2122_v30, %v2124_v18  ;;  %v5605_v58 = vmul.u32 %v2134_v61, %v6666_v52  ;;  %v2119_v5 = vsel %vm6667_vm8, %v6656_v14, 2102212464 }
 0x2f6   :  { %v2670_v40 = vsel %vm2549_vm14, %v2669_v20, %v2668_v55  ;;  %v2815_v63 = vor.u32 %v2814_v50, %v2813_v41  ;;  %v2818_v46 = vshll.u32 %v2817_v51, 23  ;;  %v2033_v37 = vclz %v2032_v28 }
 0x2f7   :  { %v5612_v36 = vsel %vm5500_vm6, %v6647_v7, %v2670_v40  ;;  %v5618_v47 = vmul.u32 %v2133_v56, %v6668_v39  ;;  %v2139_v17 = vshll.u32 %v5605_v58, 16  ;;  %v2135_v6 = vmul.u32 %v2133_v56, %v6666_v52 }
 0x2f8   :  { %v2675_v16 = vmul.f32 %v5612_v36, %v5612_v36  ;;  %v2819_v9 = vor.u32 4788187, %v2818_v46  ;;  %v3217_v62 = vadd.s32 4294967294, %v2033_v37  ;;  %v2822_v29 = vcvt.s32.f32 %v2815_v63 }
 0x2f9   :  { %v5624_v22 = vand.u32 3, %v2846_v1  ;;  %v6669_v35 = vand.u32 2147483647, %v6664_v34  ;;  %v5634_v14 = vsel %vm1929_vm7, %v2051_v10, %v2027_v11  ;;  %v2155_v21 = vand.u32 65535, %v5602_v45 }
 0x2fa   :  { %v2676_v23 = vmul.f32 -0.001358992, %v2675_v16  ;;  %v2683_v60 = vmul.f32 -0.00019511016, %v2675_v16  ;;  %v2820_v30 = vand.u32 2147483647, %v2819_v9  ;;  %vm2143_vm6 = vc.u32 %v2135_v6, %v2139_v17 }
 0x2fb   :  { %vm5628_vm14 = vcmp.le.f32.partialorder %v6669_v35, 0.7853982  ;;  %vm3218_vm15 = vcmp.lt.s32.totalorder %v3217_v62, 0  ;;  %v2141_v18 = vshll.u32 %v5618_v47, 16  ;;  %v2144_v15 = vsel %vm2143_vm6, 1, %v6481_v24 }
 0x2fc   :  { %v2145_v12 = vadd.s32 %v2139_v17, %v2135_v6  ;;  %v2677_v2 = vadd.f32 0.041655596, %v2676_v23  ;;  %v2684_v26 = vadd.f32 0.008332121, %v2683_v60  ;;  %v2823_v3 = vmul.f32 %v2822_v29, %v2820_v30 }
 0x2fd   :  { %v2036_v8 = vsel %vm3218_vm15, 0, %v3217_v62  ;;  %v2138_v49 = vmul.u32 %v2134_v61, %v6668_v39  ;;  %v2156_v1 = vshrl.u32 %v5602_v45, 16  ;;  %vm2697_vm1 = vcmp.eq.s32.totalorder %v5577_v43, 2 }
 0x2fe   :  { %v2037_v19 = vsub.s32 32, %v2036_v8  ;;  %v2038_v11 = vshll.u32 %v5585_v33, %v2036_v8  ;;  %v2041_v53 = vsub.s32 4294967266, %v2036_v8  ;;  %v2678_v4 = vmul.f32 %v2677_v2, %v2675_v16 }
 0x2ff   :  { %v2685_v25 = vmul.f32 %v2684_v26, %v2675_v16  ;;  %v2824_v48 = vxor.u32 2147483648, %v2823_v3  ;;  %vm2147_vm9 = vc.u32 %v2145_v12, %v2141_v18  ;;  %v2146_v0 = vadd.s32 %v2144_v15, %v2138_v49 }
 0x300   :  { %v2039_v55 = vshrl.u32 %v2021_v27, %v2037_v19  ;;  %v2042_v13 = vadd.s32 127, %v2041_v53  ;;  %v2679_v54 = vadd.f32 -0.4999988, %v2678_v4  ;;  %v2148_v33 = vsel %vm2147_vm9, 1, %v6481_v24 }
 0x301   :  { %v2686_v56 = vadd.f32 -0.16666654, %v2685_v25  ;;  %v2825_v20 = vsel %vm2704_vm2, %v2824_v48, %v2823_v3  ;;  %vm2694_vm4 = vcmp.eq.s32.totalorder %v5577_v43, 0  ;;  %v5655_v50 = vsel %vm2116_vm13, %v6657_v42, %v2119_v5 }
 0x302   :  { %v5650_v61 = vsel %vm5569_vm3, %v6652_v38, %v2825_v20  ;;  %v2040_v27 = vor.u32 %v2039_v55, %v2038_v11  ;;  %v2043_v41 = vshll.u32 %v2042_v13, 23  ;;  %v2680_v51 = vmul.f32 %v2679_v54, %v2675_v16  ;;  %v6672_v54 = vld [vmem:[#allocation124_spill] sm:$0xff] }
 0x303   :  { %v2687_v28 = vmul.f32 %v2686_v56, %v2675_v16  ;;  %vm2693_vm2 = vcmp.lt.s32.totalorder %v5577_v43, 2  ;;  %v2830_v10 = vmul.f32 %v5650_v61, %v5650_v61  ;;  %v2054_v59 = vsel %vm5628_vm14, 0, %v5634_v14 }
 0x304   :  { %vm2690_vm11 = vweird.f32 %v6647_v7  ;;  %v2044_v45 = vor.u32 4788187, %v2043_v41  ;;  %v2150_v40 = vadd.s32 %v2148_v33, %v2146_v0  ;;  %v2158_v63 = vmul.u32 %v2156_v1, %v6666_v52 }
 0x305   :  { %v5666_v42 = vmul.u32 %v2155_v21, %v6668_v39  ;;  %v2681_v46 = vadd.f32 1.0, %v2680_v51  ;;  %v2688_v37 = vadd.f32 1.0, %v2687_v28  ;;  %v2831_v5 = vmul.f32 -0.001358992, %v2830_v10 }
 0x306   :  { %v2838_v17 = vmul.f32 -0.00019511016, %v2830_v10  ;;  %v2045_v16 = vand.u32 2147483647, %v2044_v45  ;;  %v2047_v9 = vcvt.s32.f32 %v2040_v27  ;;  %v2140_v62 = vshrl.u32 %v5605_v58, 16 }
 0x307   :  { %v2161_v6 = vshll.u32 %v2158_v63, 16  ;;  %v2689_v29 = vmul.f32 %v2688_v37, %v5612_v36  ;;  %v2698_v35 = vxor.u32 2147483648, %v2681_v46  ;;  %v2832_v14 = vadd.f32 0.041655596, %v2831_v5 }
 0x308   :  { %v2839_v23 = vadd.f32 0.008332121, %v2838_v17  ;;  %v2048_v60 = vmul.f32 %v2047_v9, %v2045_v16  ;;  %v2151_v30 = vadd.s32 %v2150_v40, %v2140_v62  ;;  %v2157_v18 = vmul.u32 %v2155_v21, %v6666_v52  ;;  %v6673_v17 = vld [vmem:[#allocation147_spill] sm:$0xff]  ;;  %v6675_v62 = vld [vmem:[#allocation122_spill] sm:$0xff] }
 0x309   :  { %v2160_v15 = vmul.u32 %v2156_v1, %v6668_v39  ;;  %v2695_v12 = vxor.u32 2147483648, %v2689_v29  ;;  %v2833_v2 = vmul.f32 %v2832_v14, %v2830_v10  ;;  %v2163_v3 = vshll.u32 %v5666_v42, 16 }
 0x30a   :  { %v2840_v26 = vmul.f32 %v2839_v23, %v2830_v10  ;;  %v2699_v58 = vsel %vm2697_vm1, %v2698_v35, %v2689_v29  ;;  %v2049_v8 = vxor.u32 2147483648, %v2048_v60  ;;  %vm2165_vm13 = vc.u32 %v2157_v18, %v2161_v6 }
 0x30b   :  { %v2167_v36 = vadd.s32 %v2161_v6, %v2157_v18  ;;  %v2696_v19 = vsel %vm2694_vm4, %v2681_v46, %v2695_v12  ;;  %v2834_v11 = vadd.f32 -0.4999988, %v2833_v2  ;;  %v2166_v52 = vsel %vm2165_vm13, 1, %v6481_v24  ;;  %v6676_v6 = vld [vmem:[#allocation118_spill] sm:$0xff] }
 0x30c   :  { %v2841_v53 = vadd.f32 -0.16666654, %v2840_v26  ;;  %v2700_v39 = vsel %vm2693_vm2, %v2696_v19, %v2699_v58  ;;  %vm2849_vm10 = vcmp.eq.s32.totalorder %v5624_v22, 0  ;;  %v2050_v21 = vsel %vm1929_vm7, %v2049_v8, %v2048_v60  ;;  %v6677_v60 = vld [vmem:[#allocation119_spill] sm:$0xff]  ;;  %v6680_v19 = vld [vmem:[#allocation128_spill] sm:$0xff] }
 0x30d   :  { %v2168_v49 = vadd.s32 %v2166_v52, %v2160_v15  ;;  %vm2169_vm3 = vc.u32 %v2167_v36, %v2163_v3  ;;  %v2701_v4 = vsel %vm2690_vm11, nan, %v2700_v39  ;;  %v2835_v25 = vmul.f32 %v2834_v11, %v2830_v10  ;;  %v6681_v11 = vld [vmem:[#allocation126_spill] sm:$0xff] }
 0x30e   :  { %v2842_v48 = vmul.f32 %v2841_v53, %v2830_v10  ;;  %vm2848_vm5 = vcmp.lt.s32.totalorder %v5624_v22, 2  ;;  %v2053_v55 = vsel %vm5628_vm14, %v6664_v34, %v2050_v21  ;;  %2969 = vmatpush.msra.mxu2 %v2701_v4  ;;  %vm2845_vm12 = vweird.f32 %v6652_v38  ;;  %v6683_v38 = vld [vmem:[#allocation111_spill] sm:$0xff]  ;;  %v6684_v21 = vld [vmem:[#allocation112_spill] sm:$0xff] }
 0x30f   :  { %v2055_v43 = vmul.f32 %v2053_v55, %v2053_v55  ;;  %v2071_v13 = vadd.s32 3, %v2054_v59  ;;  %v2142_v0 = vshrl.u32 %v5618_v47, 16  ;;  %v2170_v1 = vsel %vm2169_vm3, 1, %v6481_v24 }
 0x310   :  { %vm1497_vm7 = vcmp.lt.s32.totalorder %v6672_v54, 4  ;;  %v2836_v7 = vadd.f32 1.0, %v2835_v25  ;;  %v2843_v56 = vadd.f32 1.0, %v2842_v48  ;;  %v2162_v20 = vshrl.u32 %v2158_v63, 16 }
 0x311   :  { %v2172_v33 = vadd.s32 %v2170_v1, %v2168_v49  ;;  %v2056_v27 = vmul.f32 -0.001358992, %v2055_v43  ;;  %v2063_v41 = vmul.f32 -0.00019511016, %v2055_v43  ;;  %v2121_v31 = vsel %vm2115_vm0, %v5595_v32, %v5655_v50 }
 0x312   :  { %v5697_v51 = vadd.s32 %v2151_v30, %v2142_v0  ;;  %v2844_v28 = vmul.f32 %v2843_v56, %v5650_v61  ;;  %v2853_v47 = vxor.u32 2147483648, %v2836_v7  ;;  %v2164_v10 = vshrl.u32 %v5666_v42, 16  ;;  %v6674_v61 = vld [vmem:[#allocation110_spill] sm:$0xff]  ;;  %v6678_v30 = vld [vmem:[#allocation117_spill] sm:$0xff] }
 0x313   :  { %v2173_v59 = vadd.s32 %v2172_v33, %v2162_v20  ;;  %vm2852_vm8 = vcmp.eq.s32.totalorder %v5624_v22, 2  ;;  %v2057_v45 = vadd.f32 0.041655596, %v2056_v27  ;;  %v2064_v40 = vadd.f32 0.008332121, %v2063_v41 }
 0x314   :  { %v5702_v63 = vadd.s32 %v2167_v36, %v2163_v3  ;;  %v2850_v46 = vxor.u32 2147483648, %v2844_v28  ;;  %v2072_v37 = vand.u32 3, %v2071_v13  ;;  %v2175_v57 = vmul.u32 %v6673_v17, %v2121_v31  ;;  %v6679_v3 = vld [vmem:[#allocation131_spill] sm:$0xff] }
 0x315   :  { %v2174_v5 = vadd.s32 %v2173_v59, %v2164_v10  ;;  %v2058_v32 = vmul.f32 %v2057_v45, %v2055_v43  ;;  %v2065_v50 = vmul.f32 %v2064_v40, %v2055_v43  ;;  %vm1340_vm14 = vcmp.lt.s32.totalorder %v6674_v61, 2 }
 0x316   :  { %vm2177_vm0 = vc.u32 %v5697_v51, %v5702_v63  ;;  %v2851_v42 = vsel %vm2849_vm10, %v2836_v7, %v2850_v46  ;;  %v2854_v16 = vsel %vm2852_vm8, %v2853_v47, %v2844_v28  ;;  %v1354_v29 = vsel %vm1340_vm14, %v6676_v6, %v6675_v62  ;;  %v6686_v62 = vld [vmem:[#allocation115_spill] sm:$0xff] }
 0x317   :  { %v2178_v9 = vadd.s32 1, %v2174_v5  ;;  %v2855_v35 = vsel %vm2848_vm5, %v2851_v42, %v2854_v16  ;;  %v2059_v14 = vadd.f32 -0.4999988, %v2058_v32  ;;  %v2066_v23 = vadd.f32 -0.16666654, %v2065_v50 }
 0x318   :  { %v1350_v18 = vsel %vm1340_vm14, %v6678_v30, %v6677_v60  ;;  %v2856_v15 = vsel %vm2845_vm12, nan, %v2855_v35  ;;  %v1358_v2 = vand.u32 65535, %v1354_v29  ;;  %v1359_v26 = vshrl.u32 %v1354_v29, 16 }
 0x319   :  { %v2179_v12 = vsel %vm2177_vm0, %v2178_v9, %v2174_v5  ;;  %v5725_v58 = vsel %vm1497_vm7, %v6679_v3, 920167782  ;;  %2998 = vmatpush.msra.mxu3 %v2856_v15  ;;  %v2060_v22 = vmul.f32 %v2059_v14, %v2055_v43  ;;  %v2067_v8 = vmul.f32 %v2066_v23, %v2055_v43 }
 0x31a   :  { %v2180_v36 = vadd.s32 %v2179_v12, %v2175_v57  ;;  %v6682_v53 = vor.u32 %v6680_v19, %v6681_v11  ;;  %vm2070_vm6 = vweird.f32 %v6664_v34  ;;  %v1361_v39 = vmul.u32 %v1359_v26, %v6683_v38  ;;  %v6685_v57 = vld [vmem:[#allocation105_spill] sm:$0xff]  ;;  %v6693_v19 = vld [vmem:[#allocation114_spill] sm:$0xff] }
 0x31b   :  { %v1362_v49 = vmul.u32 %v1358_v2, %v6684_v21  ;;  %v2061_v4 = vadd.f32 1.0, %v2060_v22  ;;  %v2068_v25 = vadd.f32 1.0, %v2067_v8  ;;  %v1381_v13 = vshrl.u32 %v1350_v18, 16  ;;  %v6691_v8 = vld [vmem:[#allocation113_spill] sm:$0xff] }
 0x31c   :  { %v5732_v52 = vsel %vm1497_vm7, %v6682_v53, 1326507024  ;;  %v2181_v48 = vadd.s32 536870912, %v2180_v36  ;;  %vm2073_vm15 = vcmp.lt.s32.totalorder %v2072_v37, 2  ;;  %v1360_v43 = vmul.u32 %v1358_v2, %v6683_v38  ;;  %v6688_v2 = vld [vmem:[#allocation130_spill] sm:$0xff] }
 0x31d   :  { %v1364_v0 = vshll.u32 %v1361_v39, 16  ;;  %v1380_v1 = vand.u32 65535, %v1350_v18  ;;  %v2069_v7 = vmul.f32 %v2068_v25, %v2053_v55  ;;  %vm2074_vm9 = vcmp.eq.s32.totalorder %v2072_v37, 0 }
 0x31e   :  { %v2078_v56 = vxor.u32 2147483648, %v2061_v4  ;;  %v5738_v20 = vshrl.u32 %v2181_v48, 30  ;;  %v1366_v33 = vshll.u32 %v1362_v49, 16  ;;  %v1383_v41 = vmul.u32 %v1381_v13, %v6683_v38 }
 0x31f   :  { %vm1368_vm1 = vc.u32 %v1360_v43, %v1364_v0  ;;  %v1370_v27 = vadd.s32 %v1364_v0, %v1360_v43  ;;  %vm1496_vm4 = vcmp.lt.s32.totalorder %v6672_v54, 3  ;;  %v2075_v31 = vxor.u32 2147483648, %v2069_v7 }
 0x320   :  { %vm2077_vm2 = vcmp.eq.s32.totalorder %v2072_v37, 2  ;;  %v2183_v28 = vshll.u32 %v5738_v20, 30  ;;  %v1363_v47 = vmul.u32 %v1359_v26, %v6684_v21  ;;  %v1369_v10 = vsel %vm1368_vm1, 1, %v6481_v24  ;;  %v6689_v26 = vld [vmem:[#allocation129_spill] sm:$0xff] }
 0x321   :  { %vm1372_vm11 = vc.u32 %v1370_v27, %v1366_v33  ;;  %v1384_v55 = vmul.u32 %v1380_v1, %v6684_v21  ;;  %v1386_v59 = vshll.u32 %v1383_v41, 16  ;;  %v2076_v45 = vsel %vm2074_vm9, %v2061_v4, %v2075_v31  ;;  %v6695_v4 = vld [vmem:[#allocation135_spill] sm:$0xff] }
 0x322   :  { %v2079_v40 = vsel %vm2077_vm2, %v2078_v56, %v2069_v7  ;;  %v2184_v46 = vsub.s32 %v2180_v36, %v2183_v28  ;;  %v1371_v5 = vadd.s32 %v1369_v10, %v1363_v47  ;;  %v1323_v32 = vshrl.u32 %v6380_v44, %v6685_v57 }
 0x323   :  { %v2080_v17 = vsel %vm2073_vm15, %v2076_v45, %v2079_v40  ;;  %v1373_v50 = vsel %vm1372_vm11, 1, %v6481_v24  ;;  %v1382_v42 = vmul.u32 %v1380_v1, %v6683_v38  ;;  %vm6687_vm10 = vcmp.lt.s32.totalorder %v6674_v61, 4 }
 0x324   :  { %v2081_v16 = vsel %vm2070_vm6, nan, %v2080_v17  ;;  %vm2185_vm13 = vcmp.lt.s32.totalorder %v2184_v46, 0  ;;  %v2186_v9 = vsub.s32 0, %v2184_v46  ;;  %v1344_v6 = vsel %vm6687_vm10, %v6686_v62, 2102212464  ;;  %v6700_v17 = vld [vmem:[#allocation104_spill] sm:$0xff] }
 0x325   :  { %2970 = vmatpush.msra.mxu2 %v2081_v16  ;;  %v1365_v29 = vshrl.u32 %v1361_v39, 16  ;;  %v1375_v37 = vadd.s32 %v1373_v50, %v1371_v5  ;;  %v1385_v35 = vmul.u32 %v1381_v13, %v6684_v21  ;;  %vm1390_vm3 = vc.u32 %v1382_v42, %v1386_v59  ;;  %v6703_v62 = vld [vmem:[#allocation123_spill] sm:$0xff] }
 0x326   :  { %v2187_v14 = vsel %vm2185_vm13, %v2186_v9, %v2184_v46  ;;  %v1388_v23 = vshll.u32 %v1384_v55, 16  ;;  %v1391_v60 = vsel %vm1390_vm3, 1, %v6481_v24  ;;  %v1392_v30 = vadd.s32 %v1386_v59, %v1382_v42  ;;  %v5810_v42 = vld [vmem:[%s6131_s3 + $0x28] sm:$0xff]  ;;  %v6702_v9 = vld [vmem:[#allocation120_spill] sm:$0xff] }
 0x327   :  { %v2188_v18 = vclz %v2187_v14  ;;  %v1367_v34 = vshrl.u32 %v1362_v49, 16  ;;  %v1376_v15 = vadd.s32 %v1375_v37, %v1365_v29  ;;  %v1393_v12 = vadd.s32 %v1391_v60, %v1385_v35 }
 0x328   :  { %vm6690_vm5 = vcmp.lt.s32.totalorder %v6672_v54, 1  ;;  %vm6692_vm12 = vcmp.lt.s32.totalorder %v6674_v61, 1  ;;  %vm6694_vm8 = vcmp.lt.s32.totalorder %v6674_v61, 3  ;;  %vm1394_vm0 = vc.u32 %v1392_v30, %v1388_v23 }
 0x329   :  { %v1506_v22 = vsel %vm6690_vm5, %v6689_v26, %v6688_v2  ;;  %v1343_v36 = vsel %vm6692_vm12, %v1323_v32, %v6691_v8  ;;  %v1345_v11 = vsel %vm6694_vm8, %v6693_v19, %v1344_v6  ;;  %v1504_v53 = vsel %vm1496_vm4, %v6688_v2, %v5725_v58  ;;  %v6701_v32 = vld [vmem:[#allocation121_spill] sm:$0xff] }
 0x32a   :  { %v3220_v38 = vadd.s32 4294967294, %v2188_v18  ;;  %v5773_v39 = vadd.s32 %v1376_v15, %v1367_v34  ;;  %v1395_v21 = vsel %vm1394_vm0, 1, %v6481_v24  ;;  %v1508_v49 = vsel %vm1496_vm4, %v6679_v3, %v5732_v52 }
 0x32b   :  { %vm2084_vm6 = vcmp.lt.s32.totalorder %v6695_v4, 0  ;;  %v1387_v25 = vshrl.u32 %v1383_v41, 16  ;;  %v1397_v48 = vadd.s32 %v1395_v21, %v1393_v12  ;;  %v2176_v13 = vadd.s32 %v5702_v63, %v5697_v51  ;;  %v6696_v63 = vld [vmem:[#allocation132_spill] sm:$0xff] }
 0x32c   :  { %vm3221_vm15 = vcmp.lt.s32.totalorder %v3220_v38, 0  ;;  %v1346_v58 = vsel %vm1340_vm14, %v1343_v36, %v1345_v11  ;;  %v5785_v43 = vadd.s32 %v1392_v30, %v1388_v23  ;;  %v2206_v1 = vsub.s32 4, %v5738_v20 }
 0x32d   :  { %v2191_v0 = vsel %vm3221_vm15, 0, %v3220_v38  ;;  %v1389_v7 = vshrl.u32 %v1384_v55, 16  ;;  %v1398_v56 = vadd.s32 %v1397_v48, %v1387_v25  ;;  %vm1495_vm1 = vcmp.lt.s32.totalorder %v6672_v54, 2 }
 0x32e   :  { %v2192_v33 = vsub.s32 32, %v2191_v0  ;;  %v2196_v3 = vsub.s32 4294967266, %v2191_v0  ;;  %vm1402_vm9 = vc.u32 %v5773_v39, %v5785_v43  ;;  %v2193_v52 = vshll.u32 %v2184_v46, %v2191_v0  ;;  %v6707_v0 = vld [vmem:[#allocation127_spill] sm:$0xff] }
 0x32f   :  { %v1399_v51 = vadd.s32 %v1398_v56, %v1389_v7  ;;  %v1505_v61 = vsel %vm1495_vm1, %v6696_v63, %v1504_v53  ;;  %v1509_v27 = vsel %vm1495_vm1, %v1506_v22, %v1508_v49  ;;  %v6697_v10 = vand.u32 2147483647, %v6695_v4  ;;  %v6706_v49 = vld [vmem:[#allocation69_spill] sm:$0xff] }
 0x330   :  { %v2194_v41 = vshrl.u32 %v2176_v13, %v2192_v33  ;;  %v2197_v31 = vadd.s32 127, %v2196_v3  ;;  %v1513_v28 = vand.u32 65535, %v1509_v27  ;;  %v1514_v47 = vshrl.u32 %v1509_v27, 16 }
 0x331   :  { %vm5798_vm14 = vcmp.le.f32.partialorder %v6697_v10, 0.7853982  ;;  %v2207_v59 = vsel %vm2084_vm6, %v2206_v1, %v5738_v20  ;;  %v1403_v45 = vadd.s32 1, %v1399_v51  ;;  %v1536_v40 = vshrl.u32 %v1505_v61, 16 }
 0x332   :  { %v2195_v46 = vor.u32 %v2194_v41, %v2193_v52  ;;  %v2198_v5 = vshll.u32 %v2197_v31, 23  ;;  %v1400_v57 = vmul.u32 %v6700_v17, %v1346_v58  ;;  %v1516_v50 = vmul.u32 %v1514_v47, %v6701_v32 }
 0x333   :  { %v1404_v16 = vsel %vm1402_vm9, %v1403_v45, %v1399_v51  ;;  %v1478_v20 = vshrl.u32 %v6380_v44, %v6702_v9  ;;  %v5818_v6 = vmul.u32 %v1513_v28, %v6703_v62  ;;  %v1535_v29 = vand.u32 65535, %v1505_v61 }
 0x334   :  { %v2199_v37 = vor.u32 4788187, %v2198_v5  ;;  %vm6704_vm2 = vcmask 261120   ;;  %v1405_v35 = vadd.s32 %v1404_v16, %v1400_v57  ;;  %v1515_v14 = vmul.u32 %v1513_v28, %v6701_v32 }
 0x335   :  { %3243 = vmatmul.msk.f32.gmra.mxu0 %vm6704_vm2, %v5810_v42  ;;  %vm6705_vm11 = vmmov %vm6704_vm2  ;;  %v1519_v23 = vshll.u32 %v1516_v50, 16  ;;  %v2202_v60 = vcvt.s32.f32 %v2195_v46  ;;  %v1518_v30 = vmul.u32 %v1514_v47, %v6703_v62  ;;  %v1521_v18 = vshll.u32 %v5818_v6, 16 }
 0x336   :  { %3247 = vmatmul.msk.f32.gmra.mxu1 %vm6705_vm11, %v5810_v42  ;;  %v1538_v34 = vmul.u32 %v1536_v40, %v6701_v32  ;;  %v2200_v15 = vand.u32 2147483647, %v2199_v37  ;;  %v1406_v12 = vadd.s32 536870912, %v1405_v35  ;;  %v1499_v8 = vsel %vm1497_vm7, %v6688_v2, 2102212464  ;;  %vm6708_vm7 = vmmov %vm6690_vm5 }
 0x337   :  { %vm1523_vm13 = vc.u32 %v1515_v14, %v1519_v23  ;;  %v1525_v22 = vadd.s32 %v1519_v23, %v1515_v14  ;;  %v1539_v19 = vmul.u32 %v1535_v29, %v6703_v62  ;;  %vm1309_vm3 = vcmp.lt.s32.totalorder %v6706_v49, 0 }
 0x338   :  { %v1524_v36 = vsel %vm1523_vm13, 1, %v6481_v24  ;;  %v1541_v11 = vshll.u32 %v1538_v34, 16  ;;  %v2203_v53 = vmul.f32 %v2202_v60, %v2200_v15  ;;  %v1407_v38 = vshrl.u32 %v1406_v12, 30  ;;  %v6712_v12 = vld [vmem:[#allocation116_spill] sm:$0xff] }
 0x339   :  { %v1526_v21 = vadd.s32 %v1524_v36, %v1518_v30  ;;  %vm1527_vm10 = vc.u32 %v1525_v22, %v1521_v18  ;;  %v2209_v25 = vsel %vm5798_vm14, 0, %v2207_v59  ;;  %v1537_v13 = vmul.u32 %v1535_v29, %v6701_v32 }
 0x33a   :  { %v1528_v48 = vsel %vm1527_vm10, 1, %v6481_v24  ;;  %v2204_v58 = vxor.u32 2147483648, %v2203_v53  ;;  %v1408_v2 = vshll.u32 %v1407_v38, 30  ;;  %v1498_v1 = vsel %vm6708_vm7, %v1478_v20, %v6707_v0 }
 0x33b   :  { %v1530_v7 = vadd.s32 %v1528_v48, %v1526_v21  ;;  %v1500_v56 = vsel %vm1496_vm4, %v6689_v26, %v1499_v8  ;;  %v1543_v33 = vshll.u32 %v1539_v19, 16  ;;  %vm1545_vm5 = vc.u32 %v1537_v13, %v1541_v11  ;;  %v6713_v21 = vld [vmem:[#allocation63_spill] sm:$0xff]  ;;  %v6714_v48 = vld [vmem:[#allocation80_spill] sm:$0xff] }
 0x33c   :  { %v1547_v3 = vadd.s32 %v1541_v11, %v1537_v13  ;;  %v2205_v52 = vsel %vm2084_vm6, %v2204_v58, %v2203_v53  ;;  %v5846_v51 = vsub.s32 %v1405_v35, %v1408_v2  ;;  %v1520_v63 = vshrl.u32 %v1516_v50, 16  ;;  %v6715_v13 = vld [vmem:[#allocation74_spill] sm:$0xff] }
 0x33d   :  { %v1540_v61 = vmul.u32 %v1536_v40, %v6703_v62  ;;  %v5852_v27 = vsel %vm5798_vm14, %v6695_v4, %v2205_v52  ;;  %v1431_v41 = vsub.s32 4, %v1407_v38  ;;  %v1546_v31 = vsel %vm1545_vm5, 1, %v6481_v24 }
 0x33e   :  { %vm1549_vm4 = vc.u32 %v1547_v3, %v1543_v33  ;;  %v2210_v26 = vmul.f32 %v5852_v27, %v5852_v27  ;;  %vm1410_vm12 = vcmp.lt.s32.totalorder %v5846_v51, 0  ;;  %v1411_v28 = vsub.s32 0, %v5846_v51 }
 0x33f   :  { %v1531_v47 = vadd.s32 %v1530_v7, %v1520_v63  ;;  %v2226_v10 = vadd.s32 3, %v2209_v25  ;;  %v6709_v59 = vand.u32 2147483647, %v6706_v49  ;;  %v1548_v55 = vadd.s32 %v1546_v31, %v1540_v61 }
 0x340   :  { %v1550_v40 = vsel %vm1549_vm4, 1, %v6481_v24  ;;  %v2211_v46 = vmul.f32 -0.001358992, %v2210_v26  ;;  %v2218_v5 = vmul.f32 -0.00019511016, %v2210_v26  ;;  %v1412_v17 = vsel %vm1410_vm12, %v1411_v28, %v5846_v51 }
 0x341   :  { %vm5861_vm8 = vcmp.le.f32.partialorder %v6709_v59, 0.7853982  ;;  %v1522_v57 = vshrl.u32 %v5818_v6, 16  ;;  %v1413_v32 = vclz %v1412_v17  ;;  %v1501_v50 = vsel %vm1495_vm1, %v1498_v1, %v1500_v56  ;;  %v6716_v56 = vld [vmem:[#allocation75_spill] sm:$0xff] }
 0x342   :  { %v1542_v16 = vshrl.u32 %v1538_v34, 16  ;;  %v1552_v9 = vadd.s32 %v1550_v40, %v1548_v55  ;;  %v2212_v20 = vadd.f32 0.041655596, %v2211_v46  ;;  %v2219_v62 = vadd.f32 0.008332121, %v2218_v5  ;;  %v6719_v46 = vld [vmem:[#allocation73_spill] sm:$0xff] }
 0x343   :  { %v1432_v29 = vsel %vm1309_vm3, %v1431_v41, %v1407_v38  ;;  %v5872_v37 = vadd.s32 %v1531_v47, %v1522_v57  ;;  %v2227_v35 = vand.u32 3, %v2226_v10  ;;  %v3205_v14 = vadd.s32 4294967294, %v1413_v32  ;;  %v6717_v41 = vld [vmem:[#allocation70_spill] sm:$0xff]  ;;  %v6718_v10 = vld [vmem:[#allocation59_spill] sm:$0xff]  ;;  %v6720_v5 = vld [vmem:[#allocation72_spill] sm:$0xff] }
 0x344   :  { %v1544_v23 = vshrl.u32 %v1539_v19, 16  ;;  %v1553_v60 = vadd.s32 %v1552_v9, %v1542_v16  ;;  %v2213_v30 = vmul.f32 %v2212_v20, %v2210_v26  ;;  %v2220_v18 = vmul.f32 %v2219_v62, %v2210_v26 }
 0x345   :  { %v1401_v6 = vadd.s32 %v5785_v43, %v5773_v39  ;;  %v5876_v54 = vadd.s32 %v1547_v3, %v1543_v33  ;;  %vm3206_vm0 = vcmp.lt.s32.totalorder %v3205_v14, 0  ;;  %v1434_v34 = vsel %vm5861_vm8, 0, %v1432_v29 }
 0x346   :  { %v1554_v15 = vadd.s32 %v1553_v60, %v1544_v23  ;;  %v1555_v22 = vmul.u32 %v6712_v12, %v1501_v50  ;;  %v2214_v8 = vadd.f32 -0.4999988, %v2213_v30  ;;  %v2221_v36 = vadd.f32 -0.16666654, %v2220_v18 }
 0x347   :  { %v1416_v11 = vsel %vm3206_vm0, 0, %v3205_v14  ;;  %vm1557_vm6 = vc.u32 %v5872_v37, %v5876_v54  ;;  %vm720_vm15 = vcmp.lt.s32.totalorder %v6713_v21, 2  ;;  %vm2228_vm9 = vcmp.lt.s32.totalorder %v2227_v35, 2 }
 0x348   :  { %v1417_v19 = vsub.s32 32, %v1416_v11  ;;  %v1421_v53 = vsub.s32 4294967266, %v1416_v11  ;;  %v1558_v38 = vadd.s32 1, %v1554_v15  ;;  %v2215_v39 = vmul.f32 %v2214_v8, %v2210_v26  ;;  %v6721_v8 = vld [vmem:[#allocation87_spill] sm:$0xff] }
 0x349   :  { %v2222_v43 = vmul.f32 %v2221_v36, %v2210_v26  ;;  %v1418_v25 = vshll.u32 %v5846_v51, %v1416_v11  ;;  %v734_v58 = vsel %vm720_vm15, %v6715_v13, %v6714_v48  ;;  %vm2225_vm1 = vweird.f32 %v6695_v4  ;;  %v6722_v36 = vld [vmem:[#allocation85_spill] sm:$0xff]  ;;  %v6727_v13 = vld [vmem:[#allocation52_spill] sm:$0xff] }
 0x34a   :  { %v1419_v2 = vshrl.u32 %v1401_v6, %v1417_v19  ;;  %v1422_v0 = vadd.s32 127, %v1421_v53  ;;  %v1559_v1 = vsel %vm1557_vm6, %v1558_v38, %v1554_v15  ;;  %v738_v7 = vand.u32 65535, %v734_v58  ;;  %v6725_v53 = vld [vmem:[#allocation88_spill] sm:$0xff]  ;;  %v6726_v38 = vld [vmem:[#allocation78_spill] sm:$0xff] }
 0x34b   :  { %vm876_vm14 = vcmp.lt.s32.totalorder %v6716_v56, 3  ;;  %v2216_v33 = vadd.f32 1.0, %v2215_v39  ;;  %v2223_v3 = vadd.f32 1.0, %v2222_v43  ;;  %v1560_v52 = vadd.s32 %v1559_v1, %v1555_v22 }
 0x34c   :  { %v739_v63 = vshrl.u32 %v734_v58, 16  ;;  %vm2229_vm2 = vcmp.eq.s32.totalorder %v2227_v35, 0  ;;  %v1420_v61 = vor.u32 %v1419_v2, %v1418_v25  ;;  %v1423_v51 = vshll.u32 %v1422_v0, 23 }
 0x34d   :  { %v5892_v31 = vmul.u32 %v738_v7, %v6717_v41  ;;  %v2224_v26 = vmul.f32 %v2223_v3, %v5852_v27  ;;  %v2233_v28 = vxor.u32 2147483648, %v2216_v33  ;;  %v1561_v47 = vadd.s32 536870912, %v1560_v52 }
 0x34e   :  { %v5896_v59 = vmul.u32 %v739_v63, %v6718_v10  ;;  %vm2232_vm11 = vcmp.eq.s32.totalorder %v2227_v35, 2  ;;  %v1424_v55 = vor.u32 4788187, %v1423_v51  ;;  %v1451_v40 = vadd.s32 3, %v1434_v34  ;;  %v6723_v35 = vld [vmem:[#allocation77_spill] sm:$0xff] }
 0x34f   :  { %v730_v17 = vsel %vm720_vm15, %v6720_v5, %v6719_v46  ;;  %v2230_v57 = vxor.u32 2147483648, %v2224_v26  ;;  %v5902_v32 = vshrl.u32 %v1561_v47, 30  ;;  %v740_v50 = vmul.u32 %v738_v7, %v6718_v10 }
 0x350   :  { %v744_v27 = vshll.u32 %v5896_v59, 16  ;;  %v2234_v16 = vsel %vm2232_vm11, %v2233_v28, %v2224_v26  ;;  %v1425_v9 = vand.u32 2147483647, %v1424_v55  ;;  %v1427_v20 = vcvt.s32.f32 %v1420_v61  ;;  %v6728_v26 = vld [vmem:[#allocation64_spill] sm:$0xff]  ;;  %v6730_v28 = vld [vmem:[#allocation66_spill] sm:$0xff] }
 0x351   :  { %v746_v62 = vshll.u32 %v5892_v31, 16  ;;  %v2231_v29 = vsel %vm2229_vm2, %v2216_v33, %v2230_v57  ;;  %v1563_v14 = vshll.u32 %v5902_v32, 30  ;;  %v761_v23 = vshrl.u32 %v730_v17, 16 }
 0x352   :  { %vm748_vm13 = vc.u32 %v740_v50, %v744_v27  ;;  %v2235_v60 = vsel %vm2228_vm9, %v2231_v29, %v2234_v16  ;;  %v1428_v30 = vmul.f32 %v1427_v20, %v1425_v9  ;;  %v750_v6 = vadd.s32 %v744_v27, %v740_v50  ;;  %v6732_v20 = vld [vmem:[#allocation92_spill] sm:$0xff] }
 0x353   :  { %v749_v18 = vsel %vm748_vm13, 1, %v6481_v24  ;;  %v2236_v34 = vsel %vm2225_vm1, nan, %v2235_v60  ;;  %v5913_v15 = vsub.s32 %v1560_v52, %v1563_v14  ;;  %v743_v12 = vmul.u32 %v739_v63, %v6717_v41 }
 0x354   :  { %v760_v22 = vand.u32 65535, %v730_v17  ;;  %v5920_v11 = vsel %vm876_vm14, %v6722_v36, %v6721_v8  ;;  %vm6724_vm10 = vcmp.lt.s32.totalorder %v6716_v56, 1  ;;  %2999 = vmatpush.msra.mxu3 %v2236_v34  ;;  %v1429_v4 = vxor.u32 2147483648, %v1428_v30 }
 0x355   :  { %v5926_v19 = vsel %vm6724_vm10, %v6723_v35, %v6722_v36  ;;  %vm752_vm7 = vc.u32 %v750_v6, %v746_v62  ;;  %v5932_v39 = vsel %vm876_vm14, %v6726_v38, %v6725_v53  ;;  %vm1565_vm5 = vcmp.lt.s32.totalorder %v5913_v15, 0 }
 0x356   :  { %v1566_v43 = vsub.s32 0, %v5913_v15  ;;  %v751_v25 = vadd.s32 %v749_v18, %v743_v12  ;;  %v1430_v48 = vsel %vm1309_vm3, %v1429_v4, %v1428_v30  ;;  %v703_v58 = vshrl.u32 %v6380_v44, %v6727_v13 }
 0x357   :  { %v753_v2 = vsel %vm752_vm7, 1, %v6481_v24  ;;  %v763_v0 = vmul.u32 %v761_v23, %v6718_v10  ;;  %v5945_v1 = vsel %vm5861_vm8, %v6706_v49, %v1430_v48  ;;  %v5947_v7 = vand.u32 3, %v1451_v40 }
 0x358   :  { %v1567_v33 = vsel %vm1565_vm5, %v1566_v43, %v5913_v15  ;;  %v764_v3 = vmul.u32 %v760_v22, %v6717_v41  ;;  %v1435_v52 = vmul.f32 %v5945_v1, %v5945_v1  ;;  %v1556_v63 = vadd.s32 %v5876_v54, %v5872_v37 }
 0x359   :  { %v1568_v61 = vclz %v1567_v33  ;;  %v766_v51 = vshll.u32 %v763_v0, 16  ;;  %vm6729_vm3 = vcmp.lt.s32.totalorder %v6713_v21, 1  ;;  %vm6731_vm4 = vcmp.lt.s32.totalorder %v6713_v21, 4 }
 0x35a   :  { %v723_v45 = vsel %vm6729_vm3, %v703_v58, %v6728_v26  ;;  %v724_v47 = vsel %vm6731_vm4, %v6730_v28, 2102212464  ;;  %v755_v55 = vadd.s32 %v753_v2, %v751_v25  ;;  %v762_v40 = vmul.u32 %v760_v22, %v6718_v10 }
 0x35b   :  { %v1436_v46 = vmul.f32 -0.001358992, %v1435_v52  ;;  %v1443_v5 = vmul.f32 -0.00019511016, %v1435_v52  ;;  %v3208_v17 = vadd.s32 4294967294, %v1568_v61  ;;  %v745_v57 = vshrl.u32 %v5896_v59, 16 }
 0x35c   :  { %v765_v37 = vmul.u32 %v761_v23, %v6717_v41  ;;  %v768_v54 = vshll.u32 %v764_v3, 16  ;;  %vm770_vm12 = vc.u32 %v762_v40, %v766_v51  ;;  %v772_v50 = vadd.s32 %v766_v51, %v762_v40  ;;  %v6733_v59 = vld [vmem:[#allocation65_spill] sm:$0xff] }
 0x35d   :  { %v1437_v27 = vadd.f32 0.041655596, %v1436_v46  ;;  %v1444_v16 = vadd.f32 0.008332121, %v1443_v5  ;;  %vm3209_vm8 = vcmp.lt.s32.totalorder %v3208_v17, 0  ;;  %v771_v9 = vsel %vm770_vm12, 1, %v6481_v24 }
 0x35e   :  { %vm1464_vm0 = vcmp.lt.s32.totalorder %v6732_v20, 0  ;;  %v1571_v62 = vsel %vm3209_vm8, 0, %v3208_v17  ;;  %v756_v29 = vadd.s32 %v755_v55, %v745_v57  ;;  %v773_v10 = vadd.s32 %v771_v9, %v765_v37  ;;  %v6739_v17 = vld [vmem:[#allocation53_spill] sm:$0xff] }
 0x35f   :  { %vm774_vm6 = vc.u32 %v772_v50, %v768_v54  ;;  %v1438_v14 = vmul.f32 %v1437_v27, %v1435_v52  ;;  %v1445_v60 = vmul.f32 %v1444_v16, %v1435_v52  ;;  %v1572_v30 = vsub.s32 32, %v1571_v62 }
 0x360   :  { %vm6734_vm9 = vcmp.lt.s32.totalorder %v6713_v21, 3  ;;  %v1576_v23 = vsub.s32 4294967266, %v1571_v62  ;;  %v747_v18 = vshrl.u32 %v5892_v31, 16  ;;  %v767_v6 = vshrl.u32 %v763_v0, 16 }
 0x361   :  { %v725_v41 = vsel %vm6734_vm9, %v6733_v59, %v724_v47  ;;  %v775_v34 = vsel %vm774_vm6, 1, %v6481_v24  ;;  %v1439_v12 = vadd.f32 -0.4999988, %v1438_v14  ;;  %v1446_v22 = vadd.f32 -0.16666654, %v1445_v60 }
 0x362   :  { %v1574_v8 = vshrl.u32 %v1556_v63, %v1572_v30  ;;  %v777_v4 = vadd.s32 %v775_v34, %v773_v10  ;;  %v6735_v53 = vand.u32 2147483647, %v6732_v20  ;;  %v1573_v43 = vshll.u32 %v5913_v15, %v1571_v62  ;;  %v6740_v10 = vld [vmem:[#allocation82_spill] sm:$0xff]  ;;  %v6741_v30 = vld [vmem:[#allocation79_spill] sm:$0xff] }
 0x363   :  { %v1577_v25 = vadd.s32 127, %v1576_v23  ;;  %v1586_v48 = vsub.s32 4, %v5902_v32  ;;  %v5979_v13 = vadd.s32 %v756_v29, %v747_v18  ;;  %v1440_v31 = vmul.f32 %v1439_v12, %v1435_v52 }
 0x364   :  { %vm5973_vm1 = vcmp.le.f32.partialorder %v6735_v53, 0.7853982  ;;  %v1447_v58 = vmul.f32 %v1446_v22, %v1435_v52  ;;  %vm1453_vm2 = vcmp.lt.s32.totalorder %v5947_v7, 2  ;;  %v769_v2 = vshrl.u32 %v764_v3, 16  ;;  %v6738_v3 = vld [vmem:[#allocation86_spill] sm:$0xff] }
 0x365   :  { %v778_v0 = vadd.s32 %v777_v4, %v767_v6  ;;  %vm1450_vm11 = vweird.f32 %v6706_v49  ;;  %v1575_v33 = vor.u32 %v1574_v8, %v1573_v43  ;;  %v1578_v63 = vshll.u32 %v1577_v25, 23  ;;  %v6742_v49 = vld [vmem:[#allocation68_spill] sm:$0xff] }
 0x366   :  { %v726_v61 = vsel %vm720_vm15, %v723_v45, %v725_v41  ;;  %v5985_v51 = vadd.s32 %v772_v50, %v768_v54  ;;  %v1441_v15 = vadd.f32 1.0, %v1440_v31  ;;  %v1448_v26 = vadd.f32 1.0, %v1447_v58 }
 0x367   :  { %v779_v28 = vadd.s32 %v778_v0, %v769_v2  ;;  %vm875_vm13 = vcmp.lt.s32.totalorder %v6716_v56, 2  ;;  %vm1454_vm10 = vcmp.eq.s32.totalorder %v5947_v7, 0  ;;  %v1579_v52 = vor.u32 4788187, %v1578_v63 }
 0x368   :  { %vm782_vm7 = vc.u32 %v5979_v13, %v5985_v51  ;;  %v885_v47 = vsel %vm875_vm13, %v6738_v3, %v5920_v11  ;;  %v1449_v21 = vmul.f32 %v1448_v26, %v5945_v1  ;;  %v1458_v45 = vxor.u32 2147483648, %v1441_v15 }
 0x369   :  { %v1587_v55 = vsel %vm1464_vm0, %v1586_v48, %v5902_v32  ;;  %v783_v40 = vadd.s32 1, %v779_v28  ;;  %v1580_v46 = vand.u32 2147483647, %v1579_v52  ;;  %v1582_v5 = vcvt.s32.f32 %v1575_v33 }
 0x36a   :  { %v780_v57 = vmul.u32 %v6739_v17, %v726_v61  ;;  %v889_v37 = vsel %vm875_vm13, %v5926_v19, %v5932_v39  ;;  %v1455_v54 = vxor.u32 2147483648, %v1449_v21  ;;  %v916_v27 = vshrl.u32 %v885_v47, 16 }
 0x36b   :  { %v784_v50 = vsel %vm782_vm7, %v783_v40, %v779_v28  ;;  %v893_v11 = vand.u32 65535, %v889_v37  ;;  %vm1457_vm15 = vcmp.eq.s32.totalorder %v5947_v7, 2  ;;  %v1583_v1 = vmul.f32 %v1582_v5, %v1580_v46 }
 0x36c   :  { %v785_v16 = vadd.s32 %v784_v50, %v780_v57  ;;  %v894_v9 = vshrl.u32 %v889_v37, 16  ;;  %v1456_v32 = vsel %vm1454_vm10, %v1441_v15, %v1455_v54  ;;  %v1459_v62 = vsel %vm1457_vm15, %v1458_v45, %v1449_v21 }
 0x36d   :  { %v1589_v29 = vsel %vm5973_vm1, 0, %v1587_v55  ;;  %v6010_v14 = vmul.u32 %v893_v11, %v6740_v10  ;;  %v1460_v19 = vsel %vm1453_vm2, %v1456_v32, %v1459_v62  ;;  %v1584_v39 = vxor.u32 2147483648, %v1583_v1  ;;  %v6744_v32 = vld [vmem:[#allocation76_spill] sm:$0xff] }
 0x36e   :  { %v786_v60 = vadd.s32 536870912, %v785_v16  ;;  %v896_v59 = vmul.u32 %v894_v9, %v6741_v30  ;;  %v1461_v41 = vsel %vm1450_vm11, nan, %v1460_v19  ;;  %v915_v23 = vand.u32 65535, %v885_v47 }
 0x36f   :  { %v6018_v18 = vmul.u32 %v916_v27, %v6741_v30  ;;  %2971 = vmatpush.msra.mxu2 %v1461_v41  ;;  %v1585_v6 = vsel %vm1464_vm0, %v1584_v39, %v1583_v1  ;;  %v895_v7 = vmul.u32 %v893_v11, %v6741_v30  ;;  %v1606_v8 = vadd.s32 3, %v1589_v29 }
 0x370   :  { %v6022_v34 = vshrl.u32 %v786_v60, 30  ;;  %v899_v12 = vshll.u32 %v896_v59, 16  ;;  %v1588_v22 = vsel %vm5973_vm1, %v6732_v20, %v1585_v6  ;;  %v858_v4 = vshrl.u32 %v6380_v44, %v6742_v49 }
 0x371   :  { %v898_v53 = vmul.u32 %v894_v9, %v6740_v10  ;;  %v1590_v43 = vmul.f32 %v1588_v22, %v1588_v22  ;;  %v901_v48 = vshll.u32 %v6010_v14, 16  ;;  %v919_v2 = vmul.u32 %v915_v23, %v6740_v10 }
 0x372   :  { %v788_v25 = vshll.u32 %v6022_v34, 30  ;;  %vm903_vm5 = vc.u32 %v895_v7, %v899_v12  ;;  %v905_v58 = vadd.s32 %v899_v12, %v895_v7  ;;  %v921_v38 = vshll.u32 %v6018_v18, 16 }
 0x373   :  { %v904_v31 = vsel %vm903_vm5, 1, %v6481_v24  ;;  %v1591_v0 = vmul.f32 -0.001358992, %v1590_v43  ;;  %v1598_v33 = vmul.f32 -0.00019511016, %v1590_v43  ;;  %v917_v44 = vmul.u32 %v915_v23, %v6741_v30 }
 0x374   :  { %v789_v63 = vsub.s32 %v785_v16, %v788_v25  ;;  %v900_v61 = vshrl.u32 %v896_v59, 16  ;;  %v906_v15 = vadd.s32 %v904_v31, %v898_v53  ;;  %vm907_vm3 = vc.u32 %v905_v58, %v901_v48 }
 0x375   :  { %v920_v26 = vmul.u32 %v916_v27, %v6740_v10  ;;  %v1592_v28 = vadd.f32 0.041655596, %v1591_v0  ;;  %v1599_v52 = vadd.f32 0.008332121, %v1598_v33  ;;  %v908_v47 = vsel %vm907_vm3, 1, %v6481_v24 }
 0x376   :  { %vm790_vm4 = vcmp.lt.s32.totalorder %v789_v63, 0  ;;  %v791_v3 = vsub.s32 0, %v789_v63  ;;  %v923_v21 = vshll.u32 %v919_v2, 16  ;;  %vm925_vm12 = vc.u32 %v917_v44, %v921_v38 }
 0x377   :  { %v927_v45 = vadd.s32 %v921_v38, %v917_v44  ;;  %v1593_v55 = vmul.f32 %v1592_v28, %v1590_v43  ;;  %v1600_v40 = vmul.f32 %v1599_v52, %v1590_v43  ;;  %v910_v5 = vadd.s32 %v908_v47, %v906_v15  ;;  %v6747_v47 = vld [vmem:[#allocation18_spill] sm:$0xff] }
 0x378   :  { %v792_v46 = vsel %vm790_vm4, %v791_v3, %v789_v63  ;;  %vm6743_vm8 = vcmp.lt.s32.totalorder %v6716_v56, 4  ;;  %v926_v37 = vsel %vm925_vm12, 1, %v6481_v24  ;;  %v1607_v1 = vand.u32 3, %v1606_v8 }
 0x379   :  { %v793_v17 = vclz %v792_v46  ;;  %v879_v57 = vsel %vm6743_vm8, %v6722_v36, 2102212464  ;;  %vm929_vm0 = vc.u32 %v927_v45, %v923_v21  ;;  %v1594_v54 = vadd.f32 -0.4999988, %v1593_v55 }
 0x37a   :  { %v1601_v50 = vadd.f32 -0.16666654, %v1600_v40  ;;  %v911_v11 = vadd.s32 %v910_v5, %v900_v61  ;;  %v928_v27 = vadd.s32 %v926_v37, %v920_v26  ;;  %v781_v16 = vadd.s32 %v5985_v51, %v5979_v13 }
 0x37b   :  { %v3193_v9 = vadd.s32 4294967294, %v793_v17  ;;  %vm6745_vm6 = vcmp.lt.s32.totalorder %v6716_v56, 1  ;;  %v1595_v29 = vmul.f32 %v1594_v54, %v1590_v43  ;;  %v902_v36 = vshrl.u32 %v6010_v14, 16 }
 0x37c   :  { %v878_v62 = vsel %vm6745_vm6, %v858_v4, %v6744_v32  ;;  %v1602_v10 = vmul.f32 %v1601_v50, %v1590_v43  ;;  %v930_v19 = vsel %vm929_vm0, 1, %v6481_v24  ;;  %v880_v39 = vsel %vm876_vm14, %v6723_v35, %v879_v57 }
 0x37d   :  { %vm3194_vm9 = vcmp.lt.s32.totalorder %v3193_v9, 0  ;;  %v922_v60 = vshrl.u32 %v6018_v18, 16  ;;  %v932_v30 = vadd.s32 %v930_v19, %v928_v27  ;;  %v1596_v13 = vadd.f32 1.0, %v1595_v29 }
 0x37e   :  { %v1603_v51 = vadd.f32 1.0, %v1602_v10  ;;  %v796_v59 = vsel %vm3194_vm9, 0, %v3193_v9  ;;  %v6054_v41 = vadd.s32 %v911_v11, %v902_v36  ;;  %v924_v7 = vshrl.u32 %v919_v2, 16  ;;  %v6746_v2 = vld [vmem:[#allocation71_spill] sm:$0xff] }
 0x37f   :  { %v797_v23 = vsub.s32 32, %v796_v59  ;;  %v801_v6 = vsub.s32 4294967266, %v796_v59  ;;  %v933_v12 = vadd.s32 %v932_v30, %v922_v60  ;;  %v1613_v8 = vxor.u32 2147483648, %v1596_v13 }
 0x380   :  { %v1604_v14 = vmul.f32 %v1603_v51, %v1588_v22  ;;  %v881_v24 = vsel %vm875_vm13, %v878_v62, %v880_v39  ;;  %v931_v49 = vadd.s32 %v927_v45, %v923_v21  ;;  %v798_v4 = vshll.u32 %v789_v63, %v796_v59 }
 0x381   :  { %v799_v35 = vshrl.u32 %v781_v16, %v797_v23  ;;  %v802_v53 = vadd.s32 127, %v801_v6  ;;  %v934_v18 = vadd.s32 %v933_v12, %v924_v7  ;;  %vm1609_vm14 = vcmp.eq.s32.totalorder %v1607_v1, 0 }
 0x382   :  { %v1610_v43 = vxor.u32 2147483648, %v1604_v14  ;;  %vm937_vm1 = vc.u32 %v6054_v41, %v931_v49  ;;  %vm1612_vm2 = vcmp.eq.s32.totalorder %v1607_v1, 2  ;;  %vm1608_vm11 = vcmp.lt.s32.totalorder %v1607_v1, 2 }
 0x383   :  { %v800_v25 = vor.u32 %v799_v35, %v798_v4  ;;  %v803_v48 = vshll.u32 %v802_v53, 23  ;;  %v938_v31 = vadd.s32 1, %v934_v18  ;;  %v1614_v22 = vsel %vm1612_vm2, %v1613_v8, %v1604_v14 }
 0x384   :  { %v1611_v58 = vsel %vm1609_vm14, %v1596_v13, %v1610_v43  ;;  %v935_v38 = vmul.u32 %v6746_v2, %v881_v24  ;;  %vm1605_vm13 = vweird.f32 %v6732_v20  ;;  %vm689_vm10 = vcmp.lt.s32.totalorder %v6747_v47, 0  ;;  %v3273_v2 = vld [vmem:[%s6131_s3 + $0x20] sm:$0xff] }
 0x385   :  { %v1615_v56 = vsel %vm1608_vm11, %v1611_v58, %v1614_v22  ;;  %v804_v0 = vor.u32 4788187, %v803_v48  ;;  %v939_v33 = vsel %vm937_vm1, %v938_v31, %v934_v18  ;;  %v807_v15 = vcvt.s32.f32 %v800_v25 }
 0x386   :  { %v1616_v63 = vsel %vm1605_vm13, nan, %v1615_v56  ;;  %v940_v44 = vadd.s32 %v939_v33, %v935_v38  ;;  %v6748_v45 = vand.u32 2147483647, %v6747_v47  ;;  %v811_v40 = vsub.s32 4, %v6022_v34  ;;  %v6754_v56 = vld [vmem:[#allocation28_spill] sm:$0xff] }
 0x387   :  { %3000 = vmatpush.msra.mxu3 %v1616_v63  ;;  %v805_v61 = vand.u32 2147483647, %v804_v0  ;;  %v936_v13 = vadd.s32 %v931_v49, %v6054_v41  ;;  %v3236_v41 = vld [vmem:[%s6131_s3 + $0x30] sm:$0xff]  ;;  %vm6751_vm8 = vcmask 261120   ;;  %vm830_vm6 = vweird.f32 %v6747_v47 }
 0x388   :  { %v941_v26 = vadd.s32 536870912, %v940_v44  ;;  %vm6067_vm7 = vcmp.le.f32.partialorder %v6748_v45, 0.7853982  ;;  %v812_v50 = vsel %vm689_vm10, %v811_v40, %v6022_v34  ;;  %3244 = vmatmul.msk.f32.gmra.mxu0 %vm6751_vm8, %v3236_v41  ;;  %vm6752_vm0 = vmmov %vm6751_vm8  ;;  %vm844_vm14 = vcmp.lt.s32.totalorder %v6754_v56, 0 }
 0x389   :  { %v808_v28 = vmul.f32 %v807_v15, %v805_v61  ;;  %v814_v9 = vsel %vm6067_vm7, 0, %v812_v50  ;;  %3248 = vmatmul.msk.f32.gmra.mxu1 %vm6752_vm0, %v3236_v41  ;;  %vm6753_vm9 = vmmov %vm6752_vm0  ;;  %v6755_v0 = vand.u32 2147483647, %v6754_v56 }
 0x38a   :  { %v6061_v52 = vshrl.u32 %v941_v26, 30  ;;  %v831_v19 = vadd.s32 3, %v814_v9  ;;  %vm6758_vm2 = vmmov %vm6752_vm0 }
 0x38b   :  { %v809_v3 = vxor.u32 2147483648, %v808_v28  ;;  %vm6092_vm1 = vcmp.le.f32.partialorder %v6755_v0, 0.7853982  ;;  %vm6759_vm11 = vmmov %vm6752_vm0 }
 0x38c   :  { %v943_v21 = vshll.u32 %v6061_v52, 30  ;;  %v832_v7 = vand.u32 3, %v831_v19  ;;  %v966_v61 = vsub.s32 4, %v6061_v52  ;;  %vm6760_vm13 = vmmov %vm6752_vm0 }
 0x38d   :  { %v810_v55 = vsel %vm689_vm10, %v809_v3, %v808_v28  ;;  %vm6761_vm10 = vmmov %vm6752_vm0 }
 0x38e   :  { %v813_v46 = vsel %vm6067_vm7, %v6747_v47, %v810_v55  ;;  %v944_v5 = vsub.s32 %v940_v44, %v943_v21  ;;  %vm834_vm3 = vcmp.eq.s32.totalorder %v832_v7, 0  ;;  %vm837_vm4 = vcmp.eq.s32.totalorder %v832_v7, 2  ;;  %v3237_v44 = vld [vmem:[%s6131_s3 + $0x38] sm:$0xff]  ;;  %vm6764_vm8 = vmmov %vm6752_vm0 }
 0x38f   :  { %v815_v17 = vmul.f32 %v813_v46, %v813_v46  ;;  %vm833_vm12 = vcmp.lt.s32.totalorder %v832_v7, 2  ;;  %v967_v47 = vsel %vm844_vm14, %v966_v61, %v6061_v52 }
 0x390   :  { %vm945_vm15 = vcmp.lt.s32.totalorder %v944_v5, 0  ;;  %v946_v57 = vsub.s32 0, %v944_v5  ;;  %3245 = vmatmul.msk.f32.gmra.mxu0 %vm6758_vm2, %v3237_v44  ;;  %v969_v20 = vsel %vm6092_vm1, 0, %v967_v47  ;;  %vm6769_vm2 = vmmov %vm6752_vm0 }
 0x391   :  { %v816_v37 = vmul.f32 -0.001358992, %v815_v17  ;;  %v823_v54 = vmul.f32 -0.00019511016, %v815_v17  ;;  %3249 = vmatmul.msk.f32.gmra.mxu1 %vm6759_vm11, %v3237_v44  ;;  %vm3127_vm11 = vcmask 1043456  }
 0x392   :  { %v947_v11 = vsel %vm945_vm15, %v946_v57, %v944_v5 }
 0x393   :  { %v817_v27 = vadd.f32 0.041655596, %v816_v37  ;;  %v824_v1 = vadd.f32 0.008332121, %v823_v54  ;;  %v948_v16 = vclz %v947_v11 }
 0x395   :  { %v818_v32 = vmul.f32 %v817_v27, %v815_v17  ;;  %v825_v62 = vmul.f32 %v824_v1, %v815_v17  ;;  %v3196_v29 = vadd.s32 4294967294, %v948_v16 }
 0x397   :  { %v819_v10 = vadd.f32 -0.4999988, %v818_v32  ;;  %v826_v36 = vadd.f32 -0.16666654, %v825_v62  ;;  %vm3197_vm5 = vcmp.lt.s32.totalorder %v3196_v29, 0 }
 0x398   :  { %v951_v39 = vsel %vm3197_vm5, 0, %v3196_v29  ;;  %v2916_v29 = vpop.f32.mrf.mxu0 }
 0x399   :  { %v820_v60 = vmul.f32 %v819_v10, %v815_v17  ;;  %v827_v30 = vmul.f32 %v826_v36, %v815_v17  ;;  %v952_v34 = vsub.s32 32, %v951_v39  ;;  %v956_v51 = vsub.s32 4294967266, %v951_v39  ;;  %v2945_v10 = vpop.f32.mrf.mxu1 }
 0x39a   :  { %v953_v12 = vshll.u32 %v944_v5, %v951_v39  ;;  %v986_v17 = vadd.s32 3, %v969_v20 }
 0x39b   :  { %v821_v59 = vadd.f32 1.0, %v820_v60  ;;  %v828_v23 = vadd.f32 1.0, %v827_v30  ;;  %v954_v6 = vshrl.u32 %v936_v13, %v952_v34  ;;  %v957_v14 = vadd.s32 127, %v956_v51  ;;  %v2885_v30 = vpop.permute.xlu2 %2884  ;;  %v2880_v13 = vpop.permute.xlu0 %2879 }
 0x39c   :  { %v987_v52 = vand.u32 3, %v986_v17 }
 0x39d   :  { %v829_v8 = vmul.f32 %v828_v23, %v813_v46  ;;  %v838_v24 = vxor.u32 2147483648, %v821_v59  ;;  %v955_v4 = vor.u32 %v954_v6, %v953_v12  ;;  %v958_v35 = vshll.u32 %v957_v14, 23  ;;  %v2875_v12 = vpop.permute.xlu1 %2874 }
 0x39e   :  { %vm989_vm7 = vcmp.eq.s32.totalorder %v987_v52, 0  ;;  %vm992_vm15 = vcmp.eq.s32.totalorder %v987_v52, 2  ;;  %vm988_vm5 = vcmp.lt.s32.totalorder %v987_v52, 2 }
 0x39f   :  { %v835_v53 = vxor.u32 2147483648, %v829_v8  ;;  %v959_v18 = vor.u32 4788187, %v958_v35  ;;  %v839_v43 = vsel %vm837_vm4, %v838_v24, %v829_v8  ;;  %v962_v31 = vcvt.s32.f32 %v955_v4  ;;  %vm6762_vm4 = vmmov %vm6752_vm0 }
 0x3a1   :  { %v836_v49 = vsel %vm834_vm3, %v821_v59, %v835_v53  ;;  %v960_v48 = vand.u32 2147483647, %v959_v18  ;;  %vm985_vm3 = vweird.f32 %v6754_v56 }
 0x3a2   :  { %v840_v25 = vsel %vm833_vm12, %v836_v49, %v839_v43  ;;  %vm6763_vm12 = vmmov %vm6752_vm0 }
 0x3a3   :  { %v841_v58 = vsel %vm830_vm6, nan, %v840_v25  ;;  %v963_v22 = vmul.f32 %v962_v31, %v960_v48  ;;  %vm6765_vm6 = vmmov %vm6752_vm0  ;;  %v2870_v35 = vpop.permute.xlu2 %2869 }
 0x3a4   :  { %2972 = vmatpush.msra.mxu2 %v841_v58  ;;  %v2917_v53 = vadd.f32 %v2916_v29, %v2870_v35  ;;  %v2946_v18 = vadd.f32 %v2945_v10, %v2870_v35 }
 0x3a5   :  { %3250 = vmatmul.msk.f32.vlgmr.msra.gmra.mxu2 %vm6753_vm9, %v3273_v2  ;;  %v964_v38 = vxor.u32 2147483648, %v963_v22  ;;  %vm6766_vm9 = vmmov %vm6752_vm0 }
 0x3a6   :  { %v3015_v48 = vmax.f32 %v2917_v53, 0.0  ;;  %v3016_v31 = vmax.f32 %v2946_v18, 0.0 }
 0x3a7   :  { %v965_v63 = vsel %vm844_vm14, %v964_v38, %v963_v22  ;;  %v3031_v22 = vld [vmem:[%s6133_s5] sm:$0xf]  ;;  %vm6767_vm14 = vmmov %vm6752_vm0  ;;  %s3307_s5 = smov [#allocation2]  }
 0x3a8   :  { %v968_v15 = vsel %vm6092_vm1, %v6754_v56, %v965_v63  ;;  %vm6768_vm1 = vmmov %vm6752_vm0  ;;  %s3139_s28 = sshll.u32 %s3307_s5, 4  ;;  %s3140_s28 = int_to_ptr.vmem [resolvable:$true] %s3139_s28 }
 0x3a9   :  { %v970_v26 = vmul.f32 %v968_v15, %v968_v15 }
 0x3ab   :  { %v971_v28 = vmul.f32 -0.001358992, %v970_v26  ;;  %v978_v3 = vmul.f32 -0.00019511016, %v970_v26 }
 0x3ad   :  { %3251 = vmatmul.msk.f32.gmra.mxu2 %vm6760_vm13, %v5810_v42  ;;  %v972_v21 = vadd.f32 0.041655596, %v971_v28  ;;  %v979_v45 = vadd.f32 0.008332121, %v978_v3 }
 0x3af   :  { %v973_v55 = vmul.f32 %v972_v21, %v970_v26  ;;  %v980_v40 = vmul.f32 %v979_v45, %v970_v26 }
 0x3b1   :  { %v974_v46 = vadd.f32 -0.4999988, %v973_v55  ;;  %v981_v5 = vadd.f32 -0.16666654, %v980_v40 }
 0x3b2   :  { %v2919_v36 = vpop.f32.mrf.mxu0 }
 0x3b3   :  { %v975_v57 = vmul.f32 %v974_v46, %v970_v26  ;;  %v982_v37 = vmul.f32 %v981_v5, %v970_v26  ;;  %v2948_v19 = vpop.f32.mrf.mxu1  ;;  %v2920_v14 = vadd.f32 %v2919_v36, %v2875_v12 }
 0x3b4   :  { %v2949_v8 = vadd.f32 %v2948_v19, %v2875_v12 }
 0x3b5   :  { %3252 = vmatmul.msk.f32.gmra.mxu2 %vm6761_vm10, %v3236_v41  ;;  %v976_v54 = vadd.f32 1.0, %v975_v57  ;;  %v983_v50 = vadd.f32 1.0, %v982_v37  ;;  %v3019_v43 = vmax.f32 %v2920_v14, 0.0  ;;  %v3036_v37 = vpop.permute.xlu0 %3035 }
 0x3b6   :  { %v3020_v25 = vmax.f32 %v2949_v8, 0.0 }
 0x3b7   :  { %v984_v11 = vmul.f32 %v983_v50, %v968_v15  ;;  %v993_v27 = vxor.u32 2147483648, %v976_v54 }
 0x3b9   :  { %v990_v1 = vxor.u32 2147483648, %v984_v11  ;;  %v994_v9 = vsel %vm992_vm15, %v993_v27, %v984_v11 }
 0x3bb   :  { %v991_v16 = vsel %vm989_vm7, %v976_v54, %v990_v1 }
 0x3bc   :  { %v995_v32 = vsel %vm988_vm5, %v991_v16, %v994_v9 }
 0x3bd   :  { %3253 = vmatmul.msk.f32.gmra.mxu2 %vm6762_vm4, %v3237_v44  ;;  %v996_v62 = vsel %vm985_vm3, nan, %v995_v32 }
 0x3be   :  { %3001 = vmatpush.msra.mxu3 %v996_v62 }
 0x3bf   :  { %3254 = vmatmul.msk.f32.vlgmr.msra.gmra.mxu3 %vm6763_vm12, %v3273_v2 }
 0x3c7   :  { %3255 = vmatmul.msk.f32.gmra.mxu3 %vm6764_vm8, %v5810_v42 }
 0x3cf   :  { %3256 = vmatmul.msk.f32.gmra.mxu3 %vm6752_vm0, %v3236_v41 }
 0x3d7   :  { %3257 = vmatmul.msk.f32.gmra.mxu3 %vm6765_vm6, %v3237_v44 }
 0x405   :  { %v2922_v39 = vpop.f32.mrf.mxu0 }
 0x406   :  { %v2951_v60 = vpop.f32.mrf.mxu1  ;;  %v2923_v59 = vadd.f32 %v2922_v39, %v2880_v13 }
 0x407   :  { %v2952_v23 = vadd.f32 %v2951_v60, %v2880_v13 }
 0x408   :  { %v3023_v41 = vmax.f32 %v2923_v59, 0.0 }
 0x409   :  { %v3024_v49 = vmax.f32 %v2952_v23, 0.0 }
 0x40d   :  { %v2925_v34 = vpop.f32.mrf.mxu0 }
 0x40e   :  { %v2954_v51 = vpop.f32.mrf.mxu1  ;;  %v2926_v6 = vadd.f32 %v2925_v34, %v2885_v30 }
 0x40f   :  { %v2955_v7 = vadd.f32 %v2954_v51, %v2885_v30 }
 0x410   :  { %v3027_v24 = vmax.f32 %v2926_v6, 0.0 }
 0x411   :  { %v3028_v4 = vmax.f32 %v2955_v7, 0.0 }
 0x412   :  { %3053 = vmatpush.msrb.mxu0 %v3027_v24 }
 0x413   :  { %3073 = vmatpush.msrb.mxu1 %v3028_v4 }
 0x414   :  { %3054 = vmatpush.msrb.mxu0 %v3023_v41 }
 0x415   :  { %3074 = vmatpush.msrb.mxu1 %v3024_v49 }
 0x416   :  { %3055 = vmatpush.msrb.mxu0 %v3019_v43 }
 0x417   :  { %3075 = vmatpush.msrb.mxu1 %v3020_v25 }
 0x418   :  { %3056 = vmatpush.msrb.mxu0 %v3015_v48 }
 0x419   :  { %3076 = vmatpush.msrb.mxu1 %v3016_v31  ;;  %3258 = vmatmul.msk.f32.vlgmr.msrb.gmra.mxu0 %vm6766_vm9, %v3031_v22 }
 0x41a   :  { %3259 = vmatmul.msk.f32.vlgmr.msrb.gmra.mxu1 %vm6767_vm14, %v3031_v22 }
 0x428   :  { %v2974_v42 = vpop.f32.mrf.mxu2 }
 0x429   :  { %v2975_v61 = vadd.f32 %v2974_v42, %v2870_v35 }
 0x42b   :  { %v3017_v28 = vmax.f32 %v2975_v61, 0.0 }
 0x430   :  { %v2977_v58 = vpop.f32.mrf.mxu2 }
 0x431   :  { %v2978_v63 = vadd.f32 %v2977_v58, %v2875_v12 }
 0x433   :  { %v3021_v26 = vmax.f32 %v2978_v63, 0.0 }
 0x438   :  { %v2980_v2 = vpop.f32.mrf.mxu2 }
 0x439   :  { %v2981_v56 = vadd.f32 %v2980_v2, %v2880_v13 }
 0x43b   :  { %v3025_v15 = vmax.f32 %v2981_v56, 0.0 }
 0x440   :  { %v2983_v38 = vpop.f32.mrf.mxu2 }
 0x441   :  { %v2984_v0 = vadd.f32 %v2983_v38, %v2885_v30 }
 0x442   :  { %v3003_v33 = vpop.f32.mrf.mxu3 }
 0x443   :  { %v3029_v44 = vmax.f32 %v2984_v0, 0.0  ;;  %v3004_v46 = vadd.f32 %v3003_v33, %v2870_v35 }
 0x445   :  { %3093 = vmatpush.msrb.mxu2 %v3029_v44  ;;  %v3018_v57 = vmax.f32 %v3004_v46, 0.0 }
 0x447   :  { %3094 = vmatpush.msrb.mxu2 %v3025_v15 }
 0x449   :  { %3095 = vmatpush.msrb.mxu2 %v3021_v26 }
 0x44a   :  { %v3006_v3 = vpop.f32.mrf.mxu3 }
 0x44b   :  { %3096 = vmatpush.msrb.mxu2 %v3017_v28  ;;  %v3007_v55 = vadd.f32 %v3006_v3, %v2875_v12 }
 0x44c   :  { %3260 = vmatmul.msk.f32.vlgmr.msrb.gmra.mxu2 %vm6768_vm1, %v3031_v22 }
 0x44d   :  { %v3022_v17 = vmax.f32 %v3007_v55, 0.0 }
 0x452   :  { %v3009_v47 = vpop.f32.mrf.mxu3 }
 0x453   :  { %v3010_v45 = vadd.f32 %v3009_v47, %v2880_v13 }
 0x455   :  { %v3026_v5 = vmax.f32 %v3010_v45, 0.0 }
 0x45a   :  { %v3012_v21 = vpop.f32.mrf.mxu3 }
 0x45b   :  { %v3013_v20 = vadd.f32 %v3012_v21, %v2885_v30 }
 0x45d   :  { %v3030_v40 = vmax.f32 %v3013_v20, 0.0 }
 0x45f   :  { %3113 = vmatpush.msrb.mxu3 %v3030_v40 }
 0x461   :  { %3114 = vmatpush.msrb.mxu3 %v3026_v5 }
 0x463   :  { %3115 = vmatpush.msrb.mxu3 %v3022_v17 }
 0x465   :  { %3116 = vmatpush.msrb.mxu3 %v3018_v57 }
 0x466   :  { %3261 = vmatmul.msk.f32.vlgmr.msrb.gmra.mxu3 %vm6769_vm2, %v3031_v22 }
 0x496   :  { %v3058_v54 = vpop.f32.mrf.mxu0 }
 0x497   :  { %v3078_v50 = vpop.f32.mrf.mxu1  ;;  %v3059_v11 = vadd.f32 %v3058_v54, %v3036_v37 }
 0x498   :  { %v3079_v52 = vadd.f32 %v3078_v50, %v3036_v37 }
 0x49a   :  { %v3125_v27 = vrot.slane %v3079_v52, 4 }
 0x49c   :  { %v3128_v1 = vsel %vm3127_vm11, %v3059_v11, %v3125_v27 }
 0x49d   :  { %3132 = vst [vmem:[#allocation2] sm:$0xff] %v3128_v1 }
 0x4cf   :  { %v3098_v16 = vpop.f32.mrf.mxu2 }
 0x4d0   :  { %v3099_v62 = vadd.f32 %v3098_v16, %v3036_v37 }
 0x4e9   :  { %v3118_v9 = vpop.f32.mrf.mxu3 }
 0x4ea   :  { %v3119_v32 = vadd.f32 %v3118_v9, %v3036_v37 }
 0x4ec   :  { %v3126_v29 = vrot.slane %v3119_v32, 4 }
 0x4ee   :  { %v3129_v10 = vsel %vm3127_vm11, %v3099_v62, %v3126_v29 }
 0x4ef   :  { %3133 = vst [vmem:[#allocation2 + $0x8] sm:$0xff] %v3129_v10 }
 0x4f0   :  { %3144 = dma.vmem_to_hbm [thread:$0]  %s3140_s28, 256, %s3142_s29, [#allocation3]  }
 0x4f1   :  { %3298 = dma.done.wait [#allocation3], 256  }
 0x4f2   :  { %3299 = vsyncadd [#allocation3], 4294967040 }
 0x4f3   :  { %3149 = vsyncpa [#allocation3], 1 }

</bundles_post_ra>
